<compile_context>
chip_gen: v6e
topology: v6e:2x2x1
jax: 0.10.0
libtpu: 0.0.40
codegen_flags: <defaults>
</compile_context>

<pallas_src>
import jax
import jax.numpy as jnp
from jax import lax
from jax.experimental import pallas as pl
from jax.experimental.pallas import tpu as pltpu

_NEG = -1e30  # effectively -inf for padded vocab columns (exp-safe)


def _round_up(x, m):
    return ((x + m - 1) // m) * m


def _make_kernel(T_en, T_de, BP, HP, inv_count):
    """Build the fused seq2seq kernel for static (T_en, T_de, padded-B, padded-H)."""

    def kernel(en_ref, de_ref, lab_ref,
               wie_ref, whe_ref, be_ref,
               wid_ref, whd_ref, bd_ref,
               wl_ref, bl_ref,
               out_ref,
               pre_e_ref, pre_d_ref, hs_ref):
        # ---- recurrent weights read once, closed over by the unrolled loops ----
        whe = whe_ref[...]                      # (HP, 4*HP)
        whd = whd_ref[...]                      # (HP, 4*HP)

        # ---- input projections hoisted out of the recurrences ----
        # one big matmul per LSTM over all timesteps, bias folded in.
        pre_e_ref[...] = (jnp.dot(en_ref[...], wie_ref[...],
                                  preferred_element_type=jnp.float32)
                          + be_ref[...])        # (T_en*BP, 4*HP)
        pre_d_ref[...] = (jnp.dot(de_ref[...], wid_ref[...],
                                  preferred_element_type=jnp.float32)
                          + bd_ref[...])        # (T_de*BP, 4*HP)

        def lstm_step(pre, h, c, whh):
            gates = pre + jnp.dot(h, whh, preferred_element_type=jnp.float32)
            # each gate sits on its own 128-lane-aligned slab -> whole-vreg
            # slices, no sub-lane shuffles inside the serial loop.
            i_g = jax.nn.sigmoid(gates[:, 0:HP])
            f_g = jax.nn.sigmoid(gates[:, HP:2 * HP])
            g_g = jnp.tanh(gates[:, 2 * HP:3 * HP])
            o_g = jax.nn.sigmoid(gates[:, 3 * HP:4 * HP])
            c_new = f_g * c + i_g * g_g
            h_new = o_g * jnp.tanh(c_new)
            return h_new, c_new

        h = jnp.zeros((BP, HP), jnp.float32)
        c = jnp.zeros((BP, HP), jnp.float32)

        # ---- encoder recurrence (fully unrolled, static trip count) ----
        # static, sublane-aligned slices: t*BP is a multiple of 8.
        for t in range(T_en):
            h, c = lstm_step(pre_e_ref[t * BP:(t + 1) * BP, :], h, c, whe)

        # ---- decoder recurrence: only pregate + h@W_hh stays serial ----
        for t in range(T_de):
            h, c = lstm_step(pre_d_ref[t * BP:(t + 1) * BP, :], h, c, whd)
            hs_ref[t * BP:(t + 1) * BP, :] = h

        # ---- one batched projection + cross-entropy after the loop ----
        logits = (jnp.dot(hs_ref[...], wl_ref[...],
                          preferred_element_type=jnp.float32)
                  + bl_ref[...])                          # (T_de*BP, Vpad)
        m = jnp.max(logits, axis=-1, keepdims=True)
        lse = m + jnp.log(jnp.sum(jnp.exp(logits - m), axis=-1, keepdims=True))
        lab = lab_ref[...]                                # (T_de*BP, 1) int32
        col = lax.broadcasted_iota(jnp.int32, logits.shape, 1)
        picked = jnp.sum(jnp.where(col == lab, logits, 0.0),
                         axis=-1, keepdims=True)
        nll = jnp.where(lab >= 0, lse - picked, 0.0)      # mask padded batch rows
        out_ref[...] = (jnp.zeros((1, 1), jnp.float32)
                        + jnp.sum(nll) * inv_count)

    return kernel


def init_params(key, e_emb, hidden, en_len, d_emb, ch_len):
    ks = jax.random.split(key, 10)
    s = 0.1
    return {
        "enc_emb": s * jax.random.normal(ks[0], (en_len, e_emb), jnp.float32),
        "dec_emb": s * jax.random.normal(ks[1], (ch_len, d_emb), jnp.float32),
        # LSTM weights pre-transposed: gates = x @ W_ih + h @ W_hh + b,
        # PyTorch gate order [i, f, g, o].
        "w_ih_e": s * jax.random.normal(ks[2], (e_emb, 4 * hidden), jnp.float32),
        "w_hh_e": s * jax.random.normal(ks[3], (hidden, 4 * hidden), jnp.float32),
        "b_e":    s * jax.random.normal(ks[4], (1, 4 * hidden), jnp.float32),
        "w_ih_d": s * jax.random.normal(ks[5], (d_emb, 4 * hidden), jnp.float32),
        "w_hh_d": s * jax.random.normal(ks[6], (hidden, 4 * hidden), jnp.float32),
        "b_d":    s * jax.random.normal(ks[7], (1, 4 * hidden), jnp.float32),
        "w_lin":  s * jax.random.normal(ks[8], (hidden, ch_len), jnp.float32),
        "b_lin":  s * jax.random.normal(ks[9], (1, ch_len), jnp.float32),
    }


@jax.jit
def seq2seq_loss(en_index, ch_index, params):
    H = params["w_hh_e"].shape[0]
    V = params["w_lin"].shape[1]
    HP = _round_up(H, 128)          # each gate -> its own 128-lane slab
    VP = _round_up(V, 128)          # lane-dense logits
    B, T_en = en_index.shape
    BP = _round_up(B, 8)            # sublane-aligned per-timestep row blocks
    decoder_in = ch_index[:, :-1]
    label = ch_index[:, 1:]
    T_de = decoder_in.shape[1]

    # Glue: teacher-forcing split + embedding gathers stay in JAX/XLA.
    en_emb = jnp.take(params["enc_emb"], en_index, axis=0)      # (B,T_en,Ee)
    de_emb = jnp.take(params["dec_emb"], decoder_in, axis=0)    # (B,T_de,Ed)

    # Time-major, batch zero-padded to BP sublanes, flattened: row = t*BP + b.
    en_x = jnp.transpose(en_emb, (1, 0, 2)).astype(jnp.float32)  # (T_en,B,Ee)
    de_x = jnp.transpose(de_emb, (1, 0, 2)).astype(jnp.float32)  # (T_de,B,Ed)
    en_x = jnp.pad(en_x, ((0, 0), (0, BP - B), (0, 0))).reshape(T_en * BP, -1)
    de_x = jnp.pad(de_x, ((0, 0), (0, BP - B), (0, 0))).reshape(T_de * BP, -1)
    lab = jnp.transpose(label, (1, 0)).astype(jnp.int32)         # (T_de,B)
    lab = jnp.pad(lab, ((0, 0), (0, BP - B)),
                  constant_values=-1).reshape(T_de * BP, 1)      # -1 = padded row

    # Zero-pad the gate layout so each gate occupies a full 128-lane slab.
    # Padded h/c lanes stay exactly 0 through the recurrence -> exact result.
    def pad_gate_cols(w):            # (in, 4H) -> (in, 4*HP)
        parts = [jnp.pad(w[:, g * H:(g + 1) * H], ((0, 0), (0, HP - H)))
                 for g in range(4)]
        return jnp.concatenate(parts, axis=1)

    wie = pad_gate_cols(params["w_ih_e"]).astype(jnp.float32)
    wid = pad_gate_cols(params["w_ih_d"]).astype(jnp.float32)
    whe = jnp.pad(pad_gate_cols(params["w_hh_e"]),
                  ((0, HP - H), (0, 0))).astype(jnp.float32)
    whd = jnp.pad(pad_gate_cols(params["w_hh_d"]),
                  ((0, HP - H), (0, 0))).astype(jnp.float32)
    be = pad_gate_cols(params["b_e"]).astype(jnp.float32)
    bd = pad_gate_cols(params["b_d"]).astype(jnp.float32)
    wl = jnp.pad(params["w_lin"], ((0, HP - H), (0, VP - V))).astype(jnp.float32)
    bl = jnp.pad(params["b_lin"], ((0, 0), (0, VP - V)),
                 constant_values=_NEG).astype(jnp.float32)

    kernel = _make_kernel(T_en, T_de, BP, HP, 1.0 / (T_de * B))
    vmem = pl.BlockSpec(memory_space=pltpu.MemorySpace.VMEM)
    out = pl.pallas_call(
        kernel,
        out_shape=jax.ShapeDtypeStruct((1, 1), jnp.float32),
        in_specs=[vmem] * 11,
        out_specs=vmem,
        scratch_shapes=[
            pltpu.VMEM((T_en * BP, 4 * HP), jnp.float32),   # encoder pre-gates
            pltpu.VMEM((T_de * BP, 4 * HP), jnp.float32),   # decoder pre-gates
            pltpu.VMEM((T_de * BP, HP), jnp.float32),       # decoder hidden states
        ],
    )(en_x, de_x, lab, wie, whe, be, wid, whd, bd, wl, bl)
    return out[0, 0]


def ref_loss(en_index, ch_index, params):
    """Pure-JAX reference (mirrors the PyTorch forward, unpadded params)."""
    H = params["w_hh_e"].shape[0]
    decoder_in = ch_index[:, :-1]
    label = ch_index[:, 1:]
    B = en_index.shape[0]

    def lstm(x_seq, h, c, wih, whh, b):
        outs = []
        for t in range(x_seq.shape[1]):
            g = x_seq[:, t, :] @ wih + h @ whh + b
            i = jax.nn.sigmoid(g[:, 0:H])
            f = jax.nn.sigmoid(g[:, H:2 * H])
            gg = jnp.tanh(g[:, 2 * H:3 * H])
            o = jax.nn.sigmoid(g[:, 3 * H:4 * H])
            c = f * c + i * gg
            h = o * jnp.tanh(c)
            outs.append(h)
        return jnp.stack(outs, axis=1), h, c

    en_emb = jnp.take(params["enc_emb"], en_index, axis=0)
    de_emb = jnp.take(params["dec_emb"], decoder_in, axis=0)
    h0 = jnp.zeros((B, H), jnp.float32)
    c0 = jnp.zeros((B, H), jnp.float32)
    _, h_e, c_e = lstm(en_emb, h0, c0,
                       params["w_ih_e"], params["w_hh_e"], params["b_e"])
    dec_out, _, _ = lstm(de_emb, h_e, c_e,
                         params["w_ih_d"], params["w_hh_d"], params["b_d"])
    logits = dec_out @ params["w_lin"] + params["b_lin"]        # (B,T_de,V)
    logits = logits.reshape(-1, logits.shape[-1])
    lab = label.reshape(-1)
    logp = jax.nn.log_softmax(logits, axis=-1)
    nll = -jnp.take_along_axis(logp, lab[:, None], axis=-1)[:, 0]
    return jnp.mean(nll)


if __name__ == "__main__":
    # Small shapes consistent with the module's forward.
    e_emb, d_emb, hidden = 16, 16, 32
    en_len, ch_len = 50, 64
    B, T_en, T_ch = 2, 8, 9

    key = jax.random.PRNGKey(0)
    kp, ke, kc = jax.random.split(key, 3)
    params = init_params(kp, e_emb, hidden, en_len, d_emb, ch_len)
    en_index = jax.random.randint(ke, (B, T_en), 0, en_len, dtype=jnp.int32)
    ch_index = jax.random.randint(kc, (B, T_ch), 0, ch_len, dtype=jnp.int32)

    loss = seq2seq_loss(en_index, ch_index, params)
    loss = jax.block_until_ready(loss)

    ref = ref_loss(en_index, ch_index, params)
    assert jnp.isfinite(loss), "non-finite loss"
    assert jnp.allclose(loss, ref, rtol=5e-2, atol=5e-2), (loss, ref)
    print("KERNEL_OK")
</pallas_src>

<mosaic_0001>
module attributes {stable_mosaic.version = 11 : i64} {
  func.func @kernel(%arg0: memref<64x16xf32, #tpu.memory_space<vmem>>, %arg1: memref<64x16xf32, #tpu.memory_space<vmem>>, %arg2: memref<64x1xi32, #tpu.memory_space<vmem>>, %arg3: memref<16x512xf32, #tpu.memory_space<vmem>>, %arg4: memref<128x512xf32, #tpu.memory_space<vmem>>, %arg5: memref<1x512xf32, #tpu.memory_space<vmem>>, %arg6: memref<16x512xf32, #tpu.memory_space<vmem>>, %arg7: memref<128x512xf32, #tpu.memory_space<vmem>>, %arg8: memref<1x512xf32, #tpu.memory_space<vmem>>, %arg9: memref<128x128xf32, #tpu.memory_space<vmem>>, %arg10: memref<1x128xf32, #tpu.memory_space<vmem>>, %arg11: memref<1x1xf32, #tpu.memory_space<vmem>>, %arg12: memref<64x512xf32, #tpu.memory_space<vmem>>, %arg13: memref<64x512xf32, #tpu.memory_space<vmem>>, %arg14: memref<64x128xf32, #tpu.memory_space<vmem>>) attributes {dimension_semantics = [], scalar_prefetch = 0 : i64, scratch_operands = 3 : i64, tpu.core_type = #tpu.core_type<tc>} {
    %c0 = arith.constant 0 : index
    %c0_0 = arith.constant 0 : index
    %0 = vector.load %arg4[%c0, %c0_0] : memref<128x512xf32, #tpu.memory_space<vmem>>, vector<128x512xf32>
    %c0_1 = arith.constant 0 : index
    %c0_2 = arith.constant 0 : index
    %1 = vector.load %arg7[%c0_1, %c0_2] : memref<128x512xf32, #tpu.memory_space<vmem>>, vector<128x512xf32>
    %c0_3 = arith.constant 0 : index
    %c0_4 = arith.constant 0 : index
    %2 = vector.load %arg0[%c0_3, %c0_4] : memref<64x16xf32, #tpu.memory_space<vmem>>, vector<64x16xf32>
    %c0_5 = arith.constant 0 : index
    %c0_6 = arith.constant 0 : index
    %3 = vector.load %arg3[%c0_5, %c0_6] : memref<16x512xf32, #tpu.memory_space<vmem>>, vector<16x512xf32>
    %cst = arith.constant dense<0.000000e+00> : vector<64x512xf32>
    %4 = tpu.matmul %2, %3, %cst {dimension_numbers = #tpu.dot_dimension_numbers<[1], [0], [0], [1], [0, 0, 1, 1], [], []>} : vector<64x16xf32>, vector<16x512xf32>, vector<64x512xf32> -> vector<64x512xf32>
    %c0_7 = arith.constant 0 : index
    %c0_8 = arith.constant 0 : index
    %5 = vector.load %arg5[%c0_7, %c0_8] : memref<1x512xf32, #tpu.memory_space<vmem>>, vector<1x512xf32>
    %6 = vector.broadcast %5 : vector<1x512xf32> to vector<64x512xf32>
    %7 = arith.addf %4, %6 : vector<64x512xf32>
    %c0_9 = arith.constant 0 : index
    %c0_10 = arith.constant 0 : index
    %8 = vector.load %arg12[%c0_9, %c0_10] : memref<64x512xf32, #tpu.memory_space<vmem>>, vector<64x512xf32>
    tpu.vector_store %arg12[%c0_9, %c0_10], %7 {strides = array<i32>} : memref<64x512xf32, #tpu.memory_space<vmem>>, vector<64x512xf32>,
    %c0_11 = arith.constant 0 : index
    %c0_12 = arith.constant 0 : index
    %9 = vector.load %arg1[%c0_11, %c0_12] : memref<64x16xf32, #tpu.memory_space<vmem>>, vector<64x16xf32>
    %c0_13 = arith.constant 0 : index
    %c0_14 = arith.constant 0 : index
    %10 = vector.load %arg6[%c0_13, %c0_14] : memref<16x512xf32, #tpu.memory_space<vmem>>, vector<16x512xf32>
    %cst_15 = arith.constant dense<0.000000e+00> : vector<64x512xf32>
    %11 = tpu.matmul %9, %10, %cst_15 {dimension_numbers = #tpu.dot_dimension_numbers<[1], [0], [0], [1], [0, 0, 1, 1], [], []>} : vector<64x16xf32>, vector<16x512xf32>, vector<64x512xf32> -> vector<64x512xf32>
    %c0_16 = arith.constant 0 : index
    %c0_17 = arith.constant 0 : index
    %12 = vector.load %arg8[%c0_16, %c0_17] : memref<1x512xf32, #tpu.memory_space<vmem>>, vector<1x512xf32>
    %13 = vector.broadcast %12 : vector<1x512xf32> to vector<64x512xf32>
    %14 = arith.addf %11, %13 : vector<64x512xf32>
    %c0_18 = arith.constant 0 : index
    %c0_19 = arith.constant 0 : index
    %15 = vector.load %arg13[%c0_18, %c0_19] : memref<64x512xf32, #tpu.memory_space<vmem>>, vector<64x512xf32>
    tpu.vector_store %arg13[%c0_18, %c0_19], %14 {strides = array<i32>} : memref<64x512xf32, #tpu.memory_space<vmem>>, vector<64x512xf32>,
    %cst_20 = arith.constant 0.000000e+00 : f32
    %16 = vector.broadcast %cst_20 : f32 to vector<8x128xf32>
    %cst_21 = arith.constant 0.000000e+00 : f32
    %17 = vector.broadcast %cst_21 : f32 to vector<8x128xf32>
    %c0_22 = arith.constant 0 : index
    %c0_23 = arith.constant 0 : index
    %18 = vector.load %arg12[%c0_22, %c0_23] : memref<64x512xf32, #tpu.memory_space<vmem>>, vector<8x512xf32>
    %cst_24 = arith.constant dense<0.000000e+00> : vector<8x512xf32>
    %19 = tpu.matmul %16, %0, %cst_24 {dimension_numbers = #tpu.dot_dimension_numbers<[1], [0], [0], [1], [0, 0, 1, 1], [], []>} : vector<8x128xf32>, vector<128x512xf32>, vector<8x512xf32> -> vector<8x512xf32>
    %20 = arith.addf %18, %19 : vector<8x512xf32>
    %21 = vector.extract_strided_slice %20 {offsets = [0, 0], sizes = [8, 128], strides = [1, 1]} : vector<8x512xf32> to vector<8x128xf32>
    %22 = arith.negf %21 : vector<8x128xf32>
    %23 = math.exp %22 : vector<8x128xf32>
    %cst_25 = arith.constant 1.000000e+00 : f32
    %24 = vector.broadcast %cst_25 : f32 to vector<8x128xf32>
    %25 = arith.addf %24, %23 : vector<8x128xf32>
    %26 = arith.divf %24, %25 : vector<8x128xf32>
    %27 = vector.extract_strided_slice %20 {offsets = [0, 128], sizes = [8, 128], strides = [1, 1]} : vector<8x512xf32> to vector<8x128xf32>
    %28 = arith.negf %27 : vector<8x128xf32>
    %29 = math.exp %28 : vector<8x128xf32>
    %cst_26 = arith.constant 1.000000e+00 : f32
    %30 = vector.broadcast %cst_26 : f32 to vector<8x128xf32>
    %31 = arith.addf %30, %29 : vector<8x128xf32>
    %32 = arith.divf %30, %31 : vector<8x128xf32>
    %33 = vector.extract_strided_slice %20 {offsets = [0, 256], sizes = [8, 128], strides = [1, 1]} : vector<8x512xf32> to vector<8x128xf32>
    %34 = math.tanh %33 : vector<8x128xf32>
    %35 = vector.extract_strided_slice %20 {offsets = [0, 384], sizes = [8, 128], strides = [1, 1]} : vector<8x512xf32> to vector<8x128xf32>
    %36 = arith.negf %35 : vector<8x128xf32>
    %37 = math.exp %36 : vector<8x128xf32>
    %cst_27 = arith.constant 1.000000e+00 : f32
    %38 = vector.broadcast %cst_27 : f32 to vector<8x128xf32>
    %39 = arith.addf %38, %37 : vector<8x128xf32>
    %40 = arith.divf %38, %39 : vector<8x128xf32>
    %41 = arith.mulf %32, %17 : vector<8x128xf32>
    %42 = arith.mulf %26, %34 : vector<8x128xf32>
    %43 = arith.addf %41, %42 : vector<8x128xf32>
    %44 = math.tanh %43 : vector<8x128xf32>
    %45 = arith.mulf %40, %44 : vector<8x128xf32>
    %c8 = arith.constant 8 : index
    %c0_28 = arith.constant 0 : index
    %46 = vector.load %arg12[%c8, %c0_28] : memref<64x512xf32, #tpu.memory_space<vmem>>, vector<8x512xf32>
    %cst_29 = arith.constant dense<0.000000e+00> : vector<8x512xf32>
    %47 = tpu.matmul %45, %0, %cst_29 {dimension_numbers = #tpu.dot_dimension_numbers<[1], [0], [0], [1], [0, 0, 1, 1], [], []>} : vector<8x128xf32>, vector<128x512xf32>, vector<8x512xf32> -> vector<8x512xf32>
    %48 = arith.addf %46, %47 : vector<8x512xf32>
    %49 = vector.extract_strided_slice %48 {offsets = [0, 0], sizes = [8, 128], strides = [1, 1]} : vector<8x512xf32> to vector<8x128xf32>
    %50 = arith.negf %49 : vector<8x128xf32>
    %51 = math.exp %50 : vector<8x128xf32>
    %cst_30 = arith.constant 1.000000e+00 : f32
    %52 = vector.broadcast %cst_30 : f32 to vector<8x128xf32>
    %53 = arith.addf %52, %51 : vector<8x128xf32>
    %54 = arith.divf %52, %53 : vector<8x128xf32>
    %55 = vector.extract_strided_slice %48 {offsets = [0, 128], sizes = [8, 128], strides = [1, 1]} : vector<8x512xf32> to vector<8x128xf32>
    %56 = arith.negf %55 : vector<8x128xf32>
    %57 = math.exp %56 : vector<8x128xf32>
    %cst_31 = arith.constant 1.000000e+00 : f32
    %58 = vector.broadcast %cst_31 : f32 to vector<8x128xf32>
    %59 = arith.addf %58, %57 : vector<8x128xf32>
    %60 = arith.divf %58, %59 : vector<8x128xf32>
    %61 = vector.extract_strided_slice %48 {offsets = [0, 256], sizes = [8, 128], strides = [1, 1]} : vector<8x512xf32> to vector<8x128xf32>
    %62 = math.tanh %61 : vector<8x128xf32>
    %63 = vector.extract_strided_slice %48 {offsets = [0, 384], sizes = [8, 128], strides = [1, 1]} : vector<8x512xf32> to vector<8x128xf32>
    %64 = arith.negf %63 : vector<8x128xf32>
    %65 = math.exp %64 : vector<8x128xf32>
    %cst_32 = arith.constant 1.000000e+00 : f32
    %66 = vector.broadcast %cst_32 : f32 to vector<8x128xf32>
    %67 = arith.addf %66, %65 : vector<8x128xf32>
    %68 = arith.divf %66, %67 : vector<8x128xf32>
    %69 = arith.mulf %60, %43 : vector<8x128xf32>
    %70 = arith.mulf %54, %62 : vector<8x128xf32>
    %71 = arith.addf %69, %70 : vector<8x128xf32>
    %72 = math.tanh %71 : vector<8x128xf32>
    %73 = arith.mulf %68, %72 : vector<8x128xf32>
    %c16 = arith.constant 16 : index
    %c0_33 = arith.constant 0 : index
    %74 = vector.load %arg12[%c16, %c0_33] : memref<64x512xf32, #tpu.memory_space<vmem>>, vector<8x512xf32>
    %cst_34 = arith.constant dense<0.000000e+00> : vector<8x512xf32>
    %75 = tpu.matmul %73, %0, %cst_34 {dimension_numbers = #tpu.dot_dimension_numbers<[1], [0], [0], [1], [0, 0, 1, 1], [], []>} : vector<8x128xf32>, vector<128x512xf32>, vector<8x512xf32> -> vector<8x512xf32>
    %76 = arith.addf %74, %75 : vector<8x512xf32>
    %77 = vector.extract_strided_slice %76 {offsets = [0, 0], sizes = [8, 128], strides = [1, 1]} : vector<8x512xf32> to vector<8x128xf32>
    %78 = arith.negf %77 : vector<8x128xf32>
    %79 = math.exp %78 : vector<8x128xf32>
    %cst_35 = arith.constant 1.000000e+00 : f32
    %80 = vector.broadcast %cst_35 : f32 to vector<8x128xf32>
    %81 = arith.addf %80, %79 : vector<8x128xf32>
    %82 = arith.divf %80, %81 : vector<8x128xf32>
    %83 = vector.extract_strided_slice %76 {offsets = [0, 128], sizes = [8, 128], strides = [1, 1]} : vector<8x512xf32> to vector<8x128xf32>
    %84 = arith.negf %83 : vector<8x128xf32>
    %85 = math.exp %84 : vector<8x128xf32>
    %cst_36 = arith.constant 1.000000e+00 : f32
    %86 = vector.broadcast %cst_36 : f32 to vector<8x128xf32>
    %87 = arith.addf %86, %85 : vector<8x128xf32>
    %88 = arith.divf %86, %87 : vector<8x128xf32>
    %89 = vector.extract_strided_slice %76 {offsets = [0, 256], sizes = [8, 128], strides = [1, 1]} : vector<8x512xf32> to vector<8x128xf32>
    %90 = math.tanh %89 : vector<8x128xf32>
    %91 = vector.extract_strided_slice %76 {offsets = [0, 384], sizes = [8, 128], strides = [1, 1]} : vector<8x512xf32> to vector<8x128xf32>
    %92 = arith.negf %91 : vector<8x128xf32>
    %93 = math.exp %92 : vector<8x128xf32>
    %cst_37 = arith.constant 1.000000e+00 : f32
    %94 = vector.broadcast %cst_37 : f32 to vector<8x128xf32>
    %95 = arith.addf %94, %93 : vector<8x128xf32>
    %96 = arith.divf %94, %95 : vector<8x128xf32>
    %97 = arith.mulf %88, %71 : vector<8x128xf32>
    %98 = arith.mulf %82, %90 : vector<8x128xf32>
    %99 = arith.addf %97, %98 : vector<8x128xf32>
    %100 = math.tanh %99 : vector<8x128xf32>
    %101 = arith.mulf %96, %100 : vector<8x128xf32>
    %c24 = arith.constant 24 : index
    %c0_38 = arith.constant 0 : index
    %102 = vector.load %arg12[%c24, %c0_38] : memref<64x512xf32, #tpu.memory_space<vmem>>, vector<8x512xf32>
    %cst_39 = arith.constant dense<0.000000e+00> : vector<8x512xf32>
    %103 = tpu.matmul %101, %0, %cst_39 {dimension_numbers = #tpu.dot_dimension_numbers<[1], [0], [0], [1], [0, 0, 1, 1], [], []>} : vector<8x128xf32>, vector<128x512xf32>, vector<8x512xf32> -> vector<8x512xf32>
    %104 = arith.addf %102, %103 : vector<8x512xf32>
    %105 = vector.extract_strided_slice %104 {offsets = [0, 0], sizes = [8, 128], strides = [1, 1]} : vector<8x512xf32> to vector<8x128xf32>
    %106 = arith.negf %105 : vector<8x128xf32>
    %107 = math.exp %106 : vector<8x128xf32>
    %cst_40 = arith.constant 1.000000e+00 : f32
    %108 = vector.broadcast %cst_40 : f32 to vector<8x128xf32>
    %109 = arith.addf %108, %107 : vector<8x128xf32>
    %110 = arith.divf %108, %109 : vector<8x128xf32>
    %111 = vector.extract_strided_slice %104 {offsets = [0, 128], sizes = [8, 128], strides = [1, 1]} : vector<8x512xf32> to vector<8x128xf32>
    %112 = arith.negf %111 : vector<8x128xf32>
    %113 = math.exp %112 : vector<8x128xf32>
    %cst_41 = arith.constant 1.000000e+00 : f32
    %114 = vector.broadcast %cst_41 : f32 to vector<8x128xf32>
    %115 = arith.addf %114, %113 : vector<8x128xf32>
    %116 = arith.divf %114, %115 : vector<8x128xf32>
    %117 = vector.extract_strided_slice %104 {offsets = [0, 256], sizes = [8, 128], strides = [1, 1]} : vector<8x512xf32> to vector<8x128xf32>
    %118 = math.tanh %117 : vector<8x128xf32>
    %119 = vector.extract_strided_slice %104 {offsets = [0, 384], sizes = [8, 128], strides = [1, 1]} : vector<8x512xf32> to vector<8x128xf32>
    %120 = arith.negf %119 : vector<8x128xf32>
    %121 = math.exp %120 : vector<8x128xf32>
    %cst_42 = arith.constant 1.000000e+00 : f32
    %122 = vector.broadcast %cst_42 : f32 to vector<8x128xf32>
    %123 = arith.addf %122, %121 : vector<8x128xf32>
    %124 = arith.divf %122, %123 : vector<8x128xf32>
    %125 = arith.mulf %116, %99 : vector<8x128xf32>
    %126 = arith.mulf %110, %118 : vector<8x128xf32>
    %127 = arith.addf %125, %126 : vector<8x128xf32>
    %128 = math.tanh %127 : vector<8x128xf32>
    %129 = arith.mulf %124, %128 : vector<8x128xf32>
    %c32 = arith.constant 32 : index
    %c0_43 = arith.constant 0 : index
    %130 = vector.load %arg12[%c32, %c0_43] : memref<64x512xf32, #tpu.memory_space<vmem>>, vector<8x512xf32>
    %cst_44 = arith.constant dense<0.000000e+00> : vector<8x512xf32>
    %131 = tpu.matmul %129, %0, %cst_44 {dimension_numbers = #tpu.dot_dimension_numbers<[1], [0], [0], [1], [0, 0, 1, 1], [], []>} : vector<8x128xf32>, vector<128x512xf32>, vector<8x512xf32> -> vector<8x512xf32>
    %132 = arith.addf %130, %131 : vector<8x512xf32>
    %133 = vector.extract_strided_slice %132 {offsets = [0, 0], sizes = [8, 128], strides = [1, 1]} : vector<8x512xf32> to vector<8x128xf32>
    %134 = arith.negf %133 : vector<8x128xf32>
    %135 = math.exp %134 : vector<8x128xf32>
    %cst_45 = arith.constant 1.000000e+00 : f32
    %136 = vector.broadcast %cst_45 : f32 to vector<8x128xf32>
    %137 = arith.addf %136, %135 : vector<8x128xf32>
    %138 = arith.divf %136, %137 : vector<8x128xf32>
    %139 = vector.extract_strided_slice %132 {offsets = [0, 128], sizes = [8, 128], strides = [1, 1]} : vector<8x512xf32> to vector<8x128xf32>
    %140 = arith.negf %139 : vector<8x128xf32>
    %141 = math.exp %140 : vector<8x128xf32>
    %cst_46 = arith.constant 1.000000e+00 : f32
    %142 = vector.broadcast %cst_46 : f32 to vector<8x128xf32>
    %143 = arith.addf %142, %141 : vector<8x128xf32>
    %144 = arith.divf %142, %143 : vector<8x128xf32>
    %145 = vector.extract_strided_slice %132 {offsets = [0, 256], sizes = [8, 128], strides = [1, 1]} : vector<8x512xf32> to vector<8x128xf32>
    %146 = math.tanh %145 : vector<8x128xf32>
    %147 = vector.extract_strided_slice %132 {offsets = [0, 384], sizes = [8, 128], strides = [1, 1]} : vector<8x512xf32> to vector<8x128xf32>
    %148 = arith.negf %147 : vector<8x128xf32>
    %149 = math.exp %148 : vector<8x128xf32>
    %cst_47 = arith.constant 1.000000e+00 : f32
    %150 = vector.broadcast %cst_47 : f32 to vector<8x128xf32>
    %151 = arith.addf %150, %149 : vector<8x128xf32>
    %152 = arith.divf %150, %151 : vector<8x128xf32>
    %153 = arith.mulf %144, %127 : vector<8x128xf32>
    %154 = arith.mulf %138, %146 : vector<8x128xf32>
    %155 = arith.addf %153, %154 : vector<8x128xf32>
    %156 = math.tanh %155 : vector<8x128xf32>
    %157 = arith.mulf %152, %156 : vector<8x128xf32>
    %c40 = arith.constant 40 : index
    %c0_48 = arith.constant 0 : index
    %158 = vector.load %arg12[%c40, %c0_48] : memref<64x512xf32, #tpu.memory_space<vmem>>, vector<8x512xf32>
    %cst_49 = arith.constant dense<0.000000e+00> : vector<8x512xf32>
    %159 = tpu.matmul %157, %0, %cst_49 {dimension_numbers = #tpu.dot_dimension_numbers<[1], [0], [0], [1], [0, 0, 1, 1], [], []>} : vector<8x128xf32>, vector<128x512xf32>, vector<8x512xf32> -> vector<8x512xf32>
    %160 = arith.addf %158, %159 : vector<8x512xf32>
    %161 = vector.extract_strided_slice %160 {offsets = [0, 0], sizes = [8, 128], strides = [1, 1]} : vector<8x512xf32> to vector<8x128xf32>
    %162 = arith.negf %161 : vector<8x128xf32>
    %163 = math.exp %162 : vector<8x128xf32>
    %cst_50 = arith.constant 1.000000e+00 : f32
    %164 = vector.broadcast %cst_50 : f32 to vector<8x128xf32>
    %165 = arith.addf %164, %163 : vector<8x128xf32>
    %166 = arith.divf %164, %165 : vector<8x128xf32>
    %167 = vector.extract_strided_slice %160 {offsets = [0, 128], sizes = [8, 128], strides = [1, 1]} : vector<8x512xf32> to vector<8x128xf32>
    %168 = arith.negf %167 : vector<8x128xf32>
    %169 = math.exp %168 : vector<8x128xf32>
    %cst_51 = arith.constant 1.000000e+00 : f32
    %170 = vector.broadcast %cst_51 : f32 to vector<8x128xf32>
    %171 = arith.addf %170, %169 : vector<8x128xf32>
    %172 = arith.divf %170, %171 : vector<8x128xf32>
    %173 = vector.extract_strided_slice %160 {offsets = [0, 256], sizes = [8, 128], strides = [1, 1]} : vector<8x512xf32> to vector<8x128xf32>
    %174 = math.tanh %173 : vector<8x128xf32>
    %175 = vector.extract_strided_slice %160 {offsets = [0, 384], sizes = [8, 128], strides = [1, 1]} : vector<8x512xf32> to vector<8x128xf32>
    %176 = arith.negf %175 : vector<8x128xf32>
    %177 = math.exp %176 : vector<8x128xf32>
    %cst_52 = arith.constant 1.000000e+00 : f32
    %178 = vector.broadcast %cst_52 : f32 to vector<8x128xf32>
    %179 = arith.addf %178, %177 : vector<8x128xf32>
    %180 = arith.divf %178, %179 : vector<8x128xf32>
    %181 = arith.mulf %172, %155 : vector<8x128xf32>
    %182 = arith.mulf %166, %174 : vector<8x128xf32>
    %183 = arith.addf %181, %182 : vector<8x128xf32>
    %184 = math.tanh %183 : vector<8x128xf32>
    %185 = arith.mulf %180, %184 : vector<8x128xf32>
    %c48 = arith.constant 48 : index
    %c0_53 = arith.constant 0 : index
    %186 = vector.load %arg12[%c48, %c0_53] : memref<64x512xf32, #tpu.memory_space<vmem>>, vector<8x512xf32>
    %cst_54 = arith.constant dense<0.000000e+00> : vector<8x512xf32>
    %187 = tpu.matmul %185, %0, %cst_54 {dimension_numbers = #tpu.dot_dimension_numbers<[1], [0], [0], [1], [0, 0, 1, 1], [], []>} : vector<8x128xf32>, vector<128x512xf32>, vector<8x512xf32> -> vector<8x512xf32>
    %188 = arith.addf %186, %187 : vector<8x512xf32>
    %189 = vector.extract_strided_slice %188 {offsets = [0, 0], sizes = [8, 128], strides = [1, 1]} : vector<8x512xf32> to vector<8x128xf32>
    %190 = arith.negf %189 : vector<8x128xf32>
    %191 = math.exp %190 : vector<8x128xf32>
    %cst_55 = arith.constant 1.000000e+00 : f32
    %192 = vector.broadcast %cst_55 : f32 to vector<8x128xf32>
    %193 = arith.addf %192, %191 : vector<8x128xf32>
    %194 = arith.divf %192, %193 : vector<8x128xf32>
    %195 = vector.extract_strided_slice %188 {offsets = [0, 128], sizes = [8, 128], strides = [1, 1]} : vector<8x512xf32> to vector<8x128xf32>
    %196 = arith.negf %195 : vector<8x128xf32>
    %197 = math.exp %196 : vector<8x128xf32>
    %cst_56 = arith.constant 1.000000e+00 : f32
    %198 = vector.broadcast %cst_56 : f32 to vector<8x128xf32>
    %199 = arith.addf %198, %197 : vector<8x128xf32>
    %200 = arith.divf %198, %199 : vector<8x128xf32>
    %201 = vector.extract_strided_slice %188 {offsets = [0, 256], sizes = [8, 128], strides = [1, 1]} : vector<8x512xf32> to vector<8x128xf32>
    %202 = math.tanh %201 : vector<8x128xf32>
    %203 = vector.extract_strided_slice %188 {offsets = [0, 384], sizes = [8, 128], strides = [1, 1]} : vector<8x512xf32> to vector<8x128xf32>
    %204 = arith.negf %203 : vector<8x128xf32>
    %205 = math.exp %204 : vector<8x128xf32>
    %cst_57 = arith.constant 1.000000e+00 : f32
    %206 = vector.broadcast %cst_57 : f32 to vector<8x128xf32>
    %207 = arith.addf %206, %205 : vector<8x128xf32>
    %208 = arith.divf %206, %207 : vector<8x128xf32>
    %209 = arith.mulf %200, %183 : vector<8x128xf32>
    %210 = arith.mulf %194, %202 : vector<8x128xf32>
    %211 = arith.addf %209, %210 : vector<8x128xf32>
    %212 = math.tanh %211 : vector<8x128xf32>
    %213 = arith.mulf %208, %212 : vector<8x128xf32>
    %c56 = arith.constant 56 : index
    %c0_58 = arith.constant 0 : index
    %214 = vector.load %arg12[%c56, %c0_58] : memref<64x512xf32, #tpu.memory_space<vmem>>, vector<8x512xf32>
    %cst_59 = arith.constant dense<0.000000e+00> : vector<8x512xf32>
    %215 = tpu.matmul %213, %0, %cst_59 {dimension_numbers = #tpu.dot_dimension_numbers<[1], [0], [0], [1], [0, 0, 1, 1], [], []>} : vector<8x128xf32>, vector<128x512xf32>, vector<8x512xf32> -> vector<8x512xf32>
    %216 = arith.addf %214, %215 : vector<8x512xf32>
    %217 = vector.extract_strided_slice %216 {offsets = [0, 0], sizes = [8, 128], strides = [1, 1]} : vector<8x512xf32> to vector<8x128xf32>
    %218 = arith.negf %217 : vector<8x128xf32>
    %219 = math.exp %218 : vector<8x128xf32>
    %cst_60 = arith.constant 1.000000e+00 : f32
    %220 = vector.broadcast %cst_60 : f32 to vector<8x128xf32>
    %221 = arith.addf %220, %219 : vector<8x128xf32>
    %222 = arith.divf %220, %221 : vector<8x128xf32>
    %223 = vector.extract_strided_slice %216 {offsets = [0, 128], sizes = [8, 128], strides = [1, 1]} : vector<8x512xf32> to vector<8x128xf32>
    %224 = arith.negf %223 : vector<8x128xf32>
    %225 = math.exp %224 : vector<8x128xf32>
    %cst_61 = arith.constant 1.000000e+00 : f32
    %226 = vector.broadcast %cst_61 : f32 to vector<8x128xf32>
    %227 = arith.addf %226, %225 : vector<8x128xf32>
    %228 = arith.divf %226, %227 : vector<8x128xf32>
    %229 = vector.extract_strided_slice %216 {offsets = [0, 256], sizes = [8, 128], strides = [1, 1]} : vector<8x512xf32> to vector<8x128xf32>
    %230 = math.tanh %229 : vector<8x128xf32>
    %231 = vector.extract_strided_slice %216 {offsets = [0, 384], sizes = [8, 128], strides = [1, 1]} : vector<8x512xf32> to vector<8x128xf32>
    %232 = arith.negf %231 : vector<8x128xf32>
    %233 = math.exp %232 : vector<8x128xf32>
    %cst_62 = arith.constant 1.000000e+00 : f32
    %234 = vector.broadcast %cst_62 : f32 to vector<8x128xf32>
    %235 = arith.addf %234, %233 : vector<8x128xf32>
    %236 = arith.divf %234, %235 : vector<8x128xf32>
    %237 = arith.mulf %228, %211 : vector<8x128xf32>
    %238 = arith.mulf %222, %230 : vector<8x128xf32>
    %239 = arith.addf %237, %238 : vector<8x128xf32>
    %240 = math.tanh %239 : vector<8x128xf32>
    %241 = arith.mulf %236, %240 : vector<8x128xf32>
    %c0_63 = arith.constant 0 : index
    %c0_64 = arith.constant 0 : index
    %242 = vector.load %arg13[%c0_63, %c0_64] : memref<64x512xf32, #tpu.memory_space<vmem>>, vector<8x512xf32>
    %cst_65 = arith.constant dense<0.000000e+00> : vector<8x512xf32>
    %243 = tpu.matmul %241, %1, %cst_65 {dimension_numbers = #tpu.dot_dimension_numbers<[1], [0], [0], [1], [0, 0, 1, 1], [], []>} : vector<8x128xf32>, vector<128x512xf32>, vector<8x512xf32> -> vector<8x512xf32>
    %244 = arith.addf %242, %243 : vector<8x512xf32>
    %245 = vector.extract_strided_slice %244 {offsets = [0, 0], sizes = [8, 128], strides = [1, 1]} : vector<8x512xf32> to vector<8x128xf32>
    %246 = arith.negf %245 : vector<8x128xf32>
    %247 = math.exp %246 : vector<8x128xf32>
    %cst_66 = arith.constant 1.000000e+00 : f32
    %248 = vector.broadcast %cst_66 : f32 to vector<8x128xf32>
    %249 = arith.addf %248, %247 : vector<8x128xf32>
    %250 = arith.divf %248, %249 : vector<8x128xf32>
    %251 = vector.extract_strided_slice %244 {offsets = [0, 128], sizes = [8, 128], strides = [1, 1]} : vector<8x512xf32> to vector<8x128xf32>
    %252 = arith.negf %251 : vector<8x128xf32>
    %253 = math.exp %252 : vector<8x128xf32>
    %cst_67 = arith.constant 1.000000e+00 : f32
    %254 = vector.broadcast %cst_67 : f32 to vector<8x128xf32>
    %255 = arith.addf %254, %253 : vector<8x128xf32>
    %256 = arith.divf %254, %255 : vector<8x128xf32>
    %257 = vector.extract_strided_slice %244 {offsets = [0, 256], sizes = [8, 128], strides = [1, 1]} : vector<8x512xf32> to vector<8x128xf32>
    %258 = math.tanh %257 : vector<8x128xf32>
    %259 = vector.extract_strided_slice %244 {offsets = [0, 384], sizes = [8, 128], strides = [1, 1]} : vector<8x512xf32> to vector<8x128xf32>
    %260 = arith.negf %259 : vector<8x128xf32>
    %261 = math.exp %260 : vector<8x128xf32>
    %cst_68 = arith.constant 1.000000e+00 : f32
    %262 = vector.broadcast %cst_68 : f32 to vector<8x128xf32>
    %263 = arith.addf %262, %261 : vector<8x128xf32>
    %264 = arith.divf %262, %263 : vector<8x128xf32>
    %265 = arith.mulf %256, %239 : vector<8x128xf32>
    %266 = arith.mulf %250, %258 : vector<8x128xf32>
    %267 = arith.addf %265, %266 : vector<8x128xf32>
    %268 = math.tanh %267 : vector<8x128xf32>
    %269 = arith.mulf %264, %268 : vector<8x128xf32>
    %c0_69 = arith.constant 0 : index
    %c0_70 = arith.constant 0 : index
    %270 = vector.load %arg14[%c0_69, %c0_70] : memref<64x128xf32, #tpu.memory_space<vmem>>, vector<8x128xf32>
    tpu.vector_store %arg14[%c0_69, %c0_70], %269 {strides = array<i32>} : memref<64x128xf32, #tpu.memory_space<vmem>>, vector<8x128xf32>,
    %c8_71 = arith.constant 8 : index
    %c0_72 = arith.constant 0 : index
    %271 = vector.load %arg13[%c8_71, %c0_72] : memref<64x512xf32, #tpu.memory_space<vmem>>, vector<8x512xf32>
    %cst_73 = arith.constant dense<0.000000e+00> : vector<8x512xf32>
    %272 = tpu.matmul %269, %1, %cst_73 {dimension_numbers = #tpu.dot_dimension_numbers<[1], [0], [0], [1], [0, 0, 1, 1], [], []>} : vector<8x128xf32>, vector<128x512xf32>, vector<8x512xf32> -> vector<8x512xf32>
    %273 = arith.addf %271, %272 : vector<8x512xf32>
    %274 = vector.extract_strided_slice %273 {offsets = [0, 0], sizes = [8, 128], strides = [1, 1]} : vector<8x512xf32> to vector<8x128xf32>
    %275 = arith.negf %274 : vector<8x128xf32>
    %276 = math.exp %275 : vector<8x128xf32>
    %cst_74 = arith.constant 1.000000e+00 : f32
    %277 = vector.broadcast %cst_74 : f32 to vector<8x128xf32>
    %278 = arith.addf %277, %276 : vector<8x128xf32>
    %279 = arith.divf %277, %278 : vector<8x128xf32>
    %280 = vector.extract_strided_slice %273 {offsets = [0, 128], sizes = [8, 128], strides = [1, 1]} : vector<8x512xf32> to vector<8x128xf32>
    %281 = arith.negf %280 : vector<8x128xf32>
    %282 = math.exp %281 : vector<8x128xf32>
    %cst_75 = arith.constant 1.000000e+00 : f32
    %283 = vector.broadcast %cst_75 : f32 to vector<8x128xf32>
    %284 = arith.addf %283, %282 : vector<8x128xf32>
    %285 = arith.divf %283, %284 : vector<8x128xf32>
    %286 = vector.extract_strided_slice %273 {offsets = [0, 256], sizes = [8, 128], strides = [1, 1]} : vector<8x512xf32> to vector<8x128xf32>
    %287 = math.tanh %286 : vector<8x128xf32>
    %288 = vector.extract_strided_slice %273 {offsets = [0, 384], sizes = [8, 128], strides = [1, 1]} : vector<8x512xf32> to vector<8x128xf32>
    %289 = arith.negf %288 : vector<8x128xf32>
    %290 = math.exp %289 : vector<8x128xf32>
    %cst_76 = arith.constant 1.000000e+00 : f32
    %291 = vector.broadcast %cst_76 : f32 to vector<8x128xf32>
    %292 = arith.addf %291, %290 : vector<8x128xf32>
    %293 = arith.divf %291, %292 : vector<8x128xf32>
    %294 = arith.mulf %285, %267 : vector<8x128xf32>
    %295 = arith.mulf %279, %287 : vector<8x128xf32>
    %296 = arith.addf %294, %295 : vector<8x128xf32>
    %297 = math.tanh %296 : vector<8x128xf32>
    %298 = arith.mulf %293, %297 : vector<8x128xf32>
    %c8_77 = arith.constant 8 : index
    %c0_78 = arith.constant 0 : index
    %299 = vector.load %arg14[%c8_77, %c0_78] : memref<64x128xf32, #tpu.memory_space<vmem>>, vector<8x128xf32>
    tpu.vector_store %arg14[%c8_77, %c0_78], %298 {strides = array<i32>} : memref<64x128xf32, #tpu.memory_space<vmem>>, vector<8x128xf32>,
    %c16_79 = arith.constant 16 : index
    %c0_80 = arith.constant 0 : index
    %300 = vector.load %arg13[%c16_79, %c0_80] : memref<64x512xf32, #tpu.memory_space<vmem>>, vector<8x512xf32>
    %cst_81 = arith.constant dense<0.000000e+00> : vector<8x512xf32>
    %301 = tpu.matmul %298, %1, %cst_81 {dimension_numbers = #tpu.dot_dimension_numbers<[1], [0], [0], [1], [0, 0, 1, 1], [], []>} : vector<8x128xf32>, vector<128x512xf32>, vector<8x512xf32> -> vector<8x512xf32>
    %302 = arith.addf %300, %301 : vector<8x512xf32>
    %303 = vector.extract_strided_slice %302 {offsets = [0, 0], sizes = [8, 128], strides = [1, 1]} : vector<8x512xf32> to vector<8x128xf32>
    %304 = arith.negf %303 : vector<8x128xf32>
    %305 = math.exp %304 : vector<8x128xf32>
    %cst_82 = arith.constant 1.000000e+00 : f32
    %306 = vector.broadcast %cst_82 : f32 to vector<8x128xf32>
    %307 = arith.addf %306, %305 : vector<8x128xf32>
    %308 = arith.divf %306, %307 : vector<8x128xf32>
    %309 = vector.extract_strided_slice %302 {offsets = [0, 128], sizes = [8, 128], strides = [1, 1]} : vector<8x512xf32> to vector<8x128xf32>
    %310 = arith.negf %309 : vector<8x128xf32>
    %311 = math.exp %310 : vector<8x128xf32>
    %cst_83 = arith.constant 1.000000e+00 : f32
    %312 = vector.broadcast %cst_83 : f32 to vector<8x128xf32>
    %313 = arith.addf %312, %311 : vector<8x128xf32>
    %314 = arith.divf %312, %313 : vector<8x128xf32>
    %315 = vector.extract_strided_slice %302 {offsets = [0, 256], sizes = [8, 128], strides = [1, 1]} : vector<8x512xf32> to vector<8x128xf32>
    %316 = math.tanh %315 : vector<8x128xf32>
    %317 = vector.extract_strided_slice %302 {offsets = [0, 384], sizes = [8, 128], strides = [1, 1]} : vector<8x512xf32> to vector<8x128xf32>
    %318 = arith.negf %317 : vector<8x128xf32>
    %319 = math.exp %318 : vector<8x128xf32>
    %cst_84 = arith.constant 1.000000e+00 : f32
    %320 = vector.broadcast %cst_84 : f32 to vector<8x128xf32>
    %321 = arith.addf %320, %319 : vector<8x128xf32>
    %322 = arith.divf %320, %321 : vector<8x128xf32>
    %323 = arith.mulf %314, %296 : vector<8x128xf32>
    %324 = arith.mulf %308, %316 : vector<8x128xf32>
    %325 = arith.addf %323, %324 : vector<8x128xf32>
    %326 = math.tanh %325 : vector<8x128xf32>
    %327 = arith.mulf %322, %326 : vector<8x128xf32>
    %c16_85 = arith.constant 16 : index
    %c0_86 = arith.constant 0 : index
    %328 = vector.load %arg14[%c16_85, %c0_86] : memref<64x128xf32, #tpu.memory_space<vmem>>, vector<8x128xf32>
    tpu.vector_store %arg14[%c16_85, %c0_86], %327 {strides = array<i32>} : memref<64x128xf32, #tpu.memory_space<vmem>>, vector<8x128xf32>,
    %c24_87 = arith.constant 24 : index
    %c0_88 = arith.constant 0 : index
    %329 = vector.load %arg13[%c24_87, %c0_88] : memref<64x512xf32, #tpu.memory_space<vmem>>, vector<8x512xf32>
    %cst_89 = arith.constant dense<0.000000e+00> : vector<8x512xf32>
    %330 = tpu.matmul %327, %1, %cst_89 {dimension_numbers = #tpu.dot_dimension_numbers<[1], [0], [0], [1], [0, 0, 1, 1], [], []>} : vector<8x128xf32>, vector<128x512xf32>, vector<8x512xf32> -> vector<8x512xf32>
    %331 = arith.addf %329, %330 : vector<8x512xf32>
    %332 = vector.extract_strided_slice %331 {offsets = [0, 0], sizes = [8, 128], strides = [1, 1]} : vector<8x512xf32> to vector<8x128xf32>
    %333 = arith.negf %332 : vector<8x128xf32>
    %334 = math.exp %333 : vector<8x128xf32>
    %cst_90 = arith.constant 1.000000e+00 : f32
    %335 = vector.broadcast %cst_90 : f32 to vector<8x128xf32>
    %336 = arith.addf %335, %334 : vector<8x128xf32>
    %337 = arith.divf %335, %336 : vector<8x128xf32>
    %338 = vector.extract_strided_slice %331 {offsets = [0, 128], sizes = [8, 128], strides = [1, 1]} : vector<8x512xf32> to vector<8x128xf32>
    %339 = arith.negf %338 : vector<8x128xf32>
    %340 = math.exp %339 : vector<8x128xf32>
    %cst_91 = arith.constant 1.000000e+00 : f32
    %341 = vector.broadcast %cst_91 : f32 to vector<8x128xf32>
    %342 = arith.addf %341, %340 : vector<8x128xf32>
    %343 = arith.divf %341, %342 : vector<8x128xf32>
    %344 = vector.extract_strided_slice %331 {offsets = [0, 256], sizes = [8, 128], strides = [1, 1]} : vector<8x512xf32> to vector<8x128xf32>
    %345 = math.tanh %344 : vector<8x128xf32>
    %346 = vector.extract_strided_slice %331 {offsets = [0, 384], sizes = [8, 128], strides = [1, 1]} : vector<8x512xf32> to vector<8x128xf32>
    %347 = arith.negf %346 : vector<8x128xf32>
    %348 = math.exp %347 : vector<8x128xf32>
    %cst_92 = arith.constant 1.000000e+00 : f32
    %349 = vector.broadcast %cst_92 : f32 to vector<8x128xf32>
    %350 = arith.addf %349, %348 : vector<8x128xf32>
    %351 = arith.divf %349, %350 : vector<8x128xf32>
    %352 = arith.mulf %343, %325 : vector<8x128xf32>
    %353 = arith.mulf %337, %345 : vector<8x128xf32>
    %354 = arith.addf %352, %353 : vector<8x128xf32>
    %355 = math.tanh %354 : vector<8x128xf32>
    %356 = arith.mulf %351, %355 : vector<8x128xf32>
    %c24_93 = arith.constant 24 : index
    %c0_94 = arith.constant 0 : index
    %357 = vector.load %arg14[%c24_93, %c0_94] : memref<64x128xf32, #tpu.memory_space<vmem>>, vector<8x128xf32>
    tpu.vector_store %arg14[%c24_93, %c0_94], %356 {strides = array<i32>} : memref<64x128xf32, #tpu.memory_space<vmem>>, vector<8x128xf32>,
    %c32_95 = arith.constant 32 : index
    %c0_96 = arith.constant 0 : index
    %358 = vector.load %arg13[%c32_95, %c0_96] : memref<64x512xf32, #tpu.memory_space<vmem>>, vector<8x512xf32>
    %cst_97 = arith.constant dense<0.000000e+00> : vector<8x512xf32>
    %359 = tpu.matmul %356, %1, %cst_97 {dimension_numbers = #tpu.dot_dimension_numbers<[1], [0], [0], [1], [0, 0, 1, 1], [], []>} : vector<8x128xf32>, vector<128x512xf32>, vector<8x512xf32> -> vector<8x512xf32>
    %360 = arith.addf %358, %359 : vector<8x512xf32>
    %361 = vector.extract_strided_slice %360 {offsets = [0, 0], sizes = [8, 128], strides = [1, 1]} : vector<8x512xf32> to vector<8x128xf32>
    %362 = arith.negf %361 : vector<8x128xf32>
    %363 = math.exp %362 : vector<8x128xf32>
    %cst_98 = arith.constant 1.000000e+00 : f32
    %364 = vector.broadcast %cst_98 : f32 to vector<8x128xf32>
    %365 = arith.addf %364, %363 : vector<8x128xf32>
    %366 = arith.divf %364, %365 : vector<8x128xf32>
    %367 = vector.extract_strided_slice %360 {offsets = [0, 128], sizes = [8, 128], strides = [1, 1]} : vector<8x512xf32> to vector<8x128xf32>
    %368 = arith.negf %367 : vector<8x128xf32>
    %369 = math.exp %368 : vector<8x128xf32>
    %cst_99 = arith.constant 1.000000e+00 : f32
    %370 = vector.broadcast %cst_99 : f32 to vector<8x128xf32>
    %371 = arith.addf %370, %369 : vector<8x128xf32>
    %372 = arith.divf %370, %371 : vector<8x128xf32>
    %373 = vector.extract_strided_slice %360 {offsets = [0, 256], sizes = [8, 128], strides = [1, 1]} : vector<8x512xf32> to vector<8x128xf32>
    %374 = math.tanh %373 : vector<8x128xf32>
    %375 = vector.extract_strided_slice %360 {offsets = [0, 384], sizes = [8, 128], strides = [1, 1]} : vector<8x512xf32> to vector<8x128xf32>
    %376 = arith.negf %375 : vector<8x128xf32>
    %377 = math.exp %376 : vector<8x128xf32>
    %cst_100 = arith.constant 1.000000e+00 : f32
    %378 = vector.broadcast %cst_100 : f32 to vector<8x128xf32>
    %379 = arith.addf %378, %377 : vector<8x128xf32>
    %380 = arith.divf %378, %379 : vector<8x128xf32>
    %381 = arith.mulf %372, %354 : vector<8x128xf32>
    %382 = arith.mulf %366, %374 : vector<8x128xf32>
    %383 = arith.addf %381, %382 : vector<8x128xf32>
    %384 = math.tanh %383 : vector<8x128xf32>
    %385 = arith.mulf %380, %384 : vector<8x128xf32>
    %c32_101 = arith.constant 32 : index
    %c0_102 = arith.constant 0 : index
    %386 = vector.load %arg14[%c32_101, %c0_102] : memref<64x128xf32, #tpu.memory_space<vmem>>, vector<8x128xf32>
    tpu.vector_store %arg14[%c32_101, %c0_102], %385 {strides = array<i32>} : memref<64x128xf32, #tpu.memory_space<vmem>>, vector<8x128xf32>,
    %c40_103 = arith.constant 40 : index
    %c0_104 = arith.constant 0 : index
    %387 = vector.load %arg13[%c40_103, %c0_104] : memref<64x512xf32, #tpu.memory_space<vmem>>, vector<8x512xf32>
    %cst_105 = arith.constant dense<0.000000e+00> : vector<8x512xf32>
    %388 = tpu.matmul %385, %1, %cst_105 {dimension_numbers = #tpu.dot_dimension_numbers<[1], [0], [0], [1], [0, 0, 1, 1], [], []>} : vector<8x128xf32>, vector<128x512xf32>, vector<8x512xf32> -> vector<8x512xf32>
    %389 = arith.addf %387, %388 : vector<8x512xf32>
    %390 = vector.extract_strided_slice %389 {offsets = [0, 0], sizes = [8, 128], strides = [1, 1]} : vector<8x512xf32> to vector<8x128xf32>
    %391 = arith.negf %390 : vector<8x128xf32>
    %392 = math.exp %391 : vector<8x128xf32>
    %cst_106 = arith.constant 1.000000e+00 : f32
    %393 = vector.broadcast %cst_106 : f32 to vector<8x128xf32>
    %394 = arith.addf %393, %392 : vector<8x128xf32>
    %395 = arith.divf %393, %394 : vector<8x128xf32>
    %396 = vector.extract_strided_slice %389 {offsets = [0, 128], sizes = [8, 128], strides = [1, 1]} : vector<8x512xf32> to vector<8x128xf32>
    %397 = arith.negf %396 : vector<8x128xf32>
    %398 = math.exp %397 : vector<8x128xf32>
    %cst_107 = arith.constant 1.000000e+00 : f32
    %399 = vector.broadcast %cst_107 : f32 to vector<8x128xf32>
    %400 = arith.addf %399, %398 : vector<8x128xf32>
    %401 = arith.divf %399, %400 : vector<8x128xf32>
    %402 = vector.extract_strided_slice %389 {offsets = [0, 256], sizes = [8, 128], strides = [1, 1]} : vector<8x512xf32> to vector<8x128xf32>
    %403 = math.tanh %402 : vector<8x128xf32>
    %404 = vector.extract_strided_slice %389 {offsets = [0, 384], sizes = [8, 128], strides = [1, 1]} : vector<8x512xf32> to vector<8x128xf32>
    %405 = arith.negf %404 : vector<8x128xf32>
    %406 = math.exp %405 : vector<8x128xf32>
    %cst_108 = arith.constant 1.000000e+00 : f32
    %407 = vector.broadcast %cst_108 : f32 to vector<8x128xf32>
    %408 = arith.addf %407, %406 : vector<8x128xf32>
    %409 = arith.divf %407, %408 : vector<8x128xf32>
    %410 = arith.mulf %401, %383 : vector<8x128xf32>
    %411 = arith.mulf %395, %403 : vector<8x128xf32>
    %412 = arith.addf %410, %411 : vector<8x128xf32>
    %413 = math.tanh %412 : vector<8x128xf32>
    %414 = arith.mulf %409, %413 : vector<8x128xf32>
    %c40_109 = arith.constant 40 : index
    %c0_110 = arith.constant 0 : index
    %415 = vector.load %arg14[%c40_109, %c0_110] : memref<64x128xf32, #tpu.memory_space<vmem>>, vector<8x128xf32>
    tpu.vector_store %arg14[%c40_109, %c0_110], %414 {strides = array<i32>} : memref<64x128xf32, #tpu.memory_space<vmem>>, vector<8x128xf32>,
    %c48_111 = arith.constant 48 : index
    %c0_112 = arith.constant 0 : index
    %416 = vector.load %arg13[%c48_111, %c0_112] : memref<64x512xf32, #tpu.memory_space<vmem>>, vector<8x512xf32>
    %cst_113 = arith.constant dense<0.000000e+00> : vector<8x512xf32>
    %417 = tpu.matmul %414, %1, %cst_113 {dimension_numbers = #tpu.dot_dimension_numbers<[1], [0], [0], [1], [0, 0, 1, 1], [], []>} : vector<8x128xf32>, vector<128x512xf32>, vector<8x512xf32> -> vector<8x512xf32>
    %418 = arith.addf %416, %417 : vector<8x512xf32>
    %419 = vector.extract_strided_slice %418 {offsets = [0, 0], sizes = [8, 128], strides = [1, 1]} : vector<8x512xf32> to vector<8x128xf32>
    %420 = arith.negf %419 : vector<8x128xf32>
    %421 = math.exp %420 : vector<8x128xf32>
    %cst_114 = arith.constant 1.000000e+00 : f32
    %422 = vector.broadcast %cst_114 : f32 to vector<8x128xf32>
    %423 = arith.addf %422, %421 : vector<8x128xf32>
    %424 = arith.divf %422, %423 : vector<8x128xf32>
    %425 = vector.extract_strided_slice %418 {offsets = [0, 128], sizes = [8, 128], strides = [1, 1]} : vector<8x512xf32> to vector<8x128xf32>
    %426 = arith.negf %425 : vector<8x128xf32>
    %427 = math.exp %426 : vector<8x128xf32>
    %cst_115 = arith.constant 1.000000e+00 : f32
    %428 = vector.broadcast %cst_115 : f32 to vector<8x128xf32>
    %429 = arith.addf %428, %427 : vector<8x128xf32>
    %430 = arith.divf %428, %429 : vector<8x128xf32>
    %431 = vector.extract_strided_slice %418 {offsets = [0, 256], sizes = [8, 128], strides = [1, 1]} : vector<8x512xf32> to vector<8x128xf32>
    %432 = math.tanh %431 : vector<8x128xf32>
    %433 = vector.extract_strided_slice %418 {offsets = [0, 384], sizes = [8, 128], strides = [1, 1]} : vector<8x512xf32> to vector<8x128xf32>
    %434 = arith.negf %433 : vector<8x128xf32>
    %435 = math.exp %434 : vector<8x128xf32>
    %cst_116 = arith.constant 1.000000e+00 : f32
    %436 = vector.broadcast %cst_116 : f32 to vector<8x128xf32>
    %437 = arith.addf %436, %435 : vector<8x128xf32>
    %438 = arith.divf %436, %437 : vector<8x128xf32>
    %439 = arith.mulf %430, %412 : vector<8x128xf32>
    %440 = arith.mulf %424, %432 : vector<8x128xf32>
    %441 = arith.addf %439, %440 : vector<8x128xf32>
    %442 = math.tanh %441 : vector<8x128xf32>
    %443 = arith.mulf %438, %442 : vector<8x128xf32>
    %c48_117 = arith.constant 48 : index
    %c0_118 = arith.constant 0 : index
    %444 = vector.load %arg14[%c48_117, %c0_118] : memref<64x128xf32, #tpu.memory_space<vmem>>, vector<8x128xf32>
    tpu.vector_store %arg14[%c48_117, %c0_118], %443 {strides = array<i32>} : memref<64x128xf32, #tpu.memory_space<vmem>>, vector<8x128xf32>,
    %c56_119 = arith.constant 56 : index
    %c0_120 = arith.constant 0 : index
    %445 = vector.load %arg13[%c56_119, %c0_120] : memref<64x512xf32, #tpu.memory_space<vmem>>, vector<8x512xf32>
    %cst_121 = arith.constant dense<0.000000e+00> : vector<8x512xf32>
    %446 = tpu.matmul %443, %1, %cst_121 {dimension_numbers = #tpu.dot_dimension_numbers<[1], [0], [0], [1], [0, 0, 1, 1], [], []>} : vector<8x128xf32>, vector<128x512xf32>, vector<8x512xf32> -> vector<8x512xf32>
    %447 = arith.addf %445, %446 : vector<8x512xf32>
    %448 = vector.extract_strided_slice %447 {offsets = [0, 0], sizes = [8, 128], strides = [1, 1]} : vector<8x512xf32> to vector<8x128xf32>
    %449 = arith.negf %448 : vector<8x128xf32>
    %450 = math.exp %449 : vector<8x128xf32>
    %cst_122 = arith.constant 1.000000e+00 : f32
    %451 = vector.broadcast %cst_122 : f32 to vector<8x128xf32>
    %452 = arith.addf %451, %450 : vector<8x128xf32>
    %453 = arith.divf %451, %452 : vector<8x128xf32>
    %454 = vector.extract_strided_slice %447 {offsets = [0, 128], sizes = [8, 128], strides = [1, 1]} : vector<8x512xf32> to vector<8x128xf32>
    %455 = arith.negf %454 : vector<8x128xf32>
    %456 = math.exp %455 : vector<8x128xf32>
    %cst_123 = arith.constant 1.000000e+00 : f32
    %457 = vector.broadcast %cst_123 : f32 to vector<8x128xf32>
    %458 = arith.addf %457, %456 : vector<8x128xf32>
    %459 = arith.divf %457, %458 : vector<8x128xf32>
    %460 = vector.extract_strided_slice %447 {offsets = [0, 256], sizes = [8, 128], strides = [1, 1]} : vector<8x512xf32> to vector<8x128xf32>
    %461 = math.tanh %460 : vector<8x128xf32>
    %462 = vector.extract_strided_slice %447 {offsets = [0, 384], sizes = [8, 128], strides = [1, 1]} : vector<8x512xf32> to vector<8x128xf32>
    %463 = arith.negf %462 : vector<8x128xf32>
    %464 = math.exp %463 : vector<8x128xf32>
    %cst_124 = arith.constant 1.000000e+00 : f32
    %465 = vector.broadcast %cst_124 : f32 to vector<8x128xf32>
    %466 = arith.addf %465, %464 : vector<8x128xf32>
    %467 = arith.divf %465, %466 : vector<8x128xf32>
    %468 = arith.mulf %459, %441 : vector<8x128xf32>
    %469 = arith.mulf %453, %461 : vector<8x128xf32>
    %470 = arith.addf %468, %469 : vector<8x128xf32>
    %471 = math.tanh %470 : vector<8x128xf32>
    %472 = arith.mulf %467, %471 : vector<8x128xf32>
    %c56_125 = arith.constant 56 : index
    %c0_126 = arith.constant 0 : index
    %473 = vector.load %arg14[%c56_125, %c0_126] : memref<64x128xf32, #tpu.memory_space<vmem>>, vector<8x128xf32>
    tpu.vector_store %arg14[%c56_125, %c0_126], %472 {strides = array<i32>} : memref<64x128xf32, #tpu.memory_space<vmem>>, vector<8x128xf32>,
    %c0_127 = arith.constant 0 : index
    %c0_128 = arith.constant 0 : index
    %474 = vector.load %arg14[%c0_127, %c0_128] : memref<64x128xf32, #tpu.memory_space<vmem>>, vector<64x128xf32>
    %c0_129 = arith.constant 0 : index
    %c0_130 = arith.constant 0 : index
    %475 = vector.load %arg9[%c0_129, %c0_130] : memref<128x128xf32, #tpu.memory_space<vmem>>, vector<128x128xf32>
    %cst_131 = arith.constant dense<0.000000e+00> : vector<64x128xf32>
    %476 = tpu.matmul %474, %475, %cst_131 {dimension_numbers = #tpu.dot_dimension_numbers<[1], [0], [0], [1], [0, 0, 1, 1], [], []>} : vector<64x128xf32>, vector<128x128xf32>, vector<64x128xf32> -> vector<64x128xf32>
    %c0_132 = arith.constant 0 : index
    %c0_133 = arith.constant 0 : index
    %477 = vector.load %arg10[%c0_132, %c0_133] : memref<1x128xf32, #tpu.memory_space<vmem>>, vector<1x128xf32>
    %478 = vector.broadcast %477 : vector<1x128xf32> to vector<64x128xf32>
    %479 = arith.addf %476, %478 : vector<64x128xf32>
    %cst_134 = arith.constant dense<0xFF800000> : vector<64xf32>
    %480 = vector.multi_reduction <maximumf>, %479, %cst_134 [1] : vector<64x128xf32> to vector<64xf32>
    %481 = vector.shape_cast %480 : vector<64xf32> to vector<64x1xf32>
    %482 = vector.broadcast %481 : vector<64x1xf32> to vector<64x128xf32>
    %483 = arith.subf %479, %482 : vector<64x128xf32>
    %484 = math.exp %483 : vector<64x128xf32>
    %cst_135 = arith.constant dense<0.000000e+00> : vector<64xf32>
    %485 = vector.multi_reduction <add>, %484, %cst_135 [1] : vector<64x128xf32> to vector<64xf32>
    %486 = vector.shape_cast %485 : vector<64xf32> to vector<64x1xf32>
    %487 = math.log %486 : vector<64x1xf32>
    %488 = arith.addf %481, %487 : vector<64x1xf32>
    %c0_136 = arith.constant 0 : index
    %c0_137 = arith.constant 0 : index
    %489 = vector.load %arg2[%c0_136, %c0_137] : memref<64x1xi32, #tpu.memory_space<vmem>>, vector<64x1xi32>
    %490 = tpu.iota {dimensions = array<i32: 1>} : vector<64x128xi32>
    %491 = vector.broadcast %489 : vector<64x1xi32> to vector<64x128xi32>
    %492 = arith.cmpi eq, %490, %491 : vector<64x128xi32>
    %cst_138 = arith.constant 0.000000e+00 : f32
    %493 = vector.broadcast %cst_138 : f32 to vector<64x128xf32>
    %494 = arith.select %492, %479, %493 : vector<64x128xi1>, vector<64x128xf32>
    %cst_139 = arith.constant dense<0.000000e+00> : vector<64xf32>
    %495 = vector.multi_reduction <add>, %494, %cst_139 [1] : vector<64x128xf32> to vector<64xf32>
    %496 = vector.shape_cast %495 : vector<64xf32> to vector<64x1xf32>
    %c0_i32 = arith.constant 0 : i32
    %497 = vector.broadcast %c0_i32 : i32 to vector<64x1xi32>
    %498 = arith.cmpi sge, %489, %497 : vector<64x1xi32>
    %499 = arith.subf %488, %496 : vector<64x1xf32>
    %cst_140 = arith.constant 0.000000e+00 : f32
    %500 = vector.broadcast %cst_140 : f32 to vector<64x1xf32>
    %501 = arith.select %498, %499, %500 : vector<64x1xi1>, vector<64x1xf32>
    %cst_141 = arith.constant 0.000000e+00 : f32
    %502 = vector.broadcast %cst_141 : f32 to vector<1x1xf32>
    %503 = vector.shape_cast %501 : vector<64x1xf32> to vector<1x64x1xf32>
    %cst_142 = arith.constant dense<0.000000e+00> : vector<1xf32>
    %504 = vector.multi_reduction <add>, %503, %cst_142 [1, 2] : vector<1x64x1xf32> to vector<1xf32>
    %505 = vector.shape_cast %504 : vector<1xf32> to vector<1x1x1xf32>
    %506 = vector.extract %505[0, 0, 0] : f32 from vector<1x1x1xf32>
    %cst_143 = arith.constant 6.250000e-02 : f32
    %507 = arith.mulf %506, %cst_143 : f32
    %508 = vector.broadcast %507 : f32 to vector<1x1xf32>
    %509 = arith.addf %502, %508 : vector<1x1xf32>
    %c0_144 = arith.constant 0 : index
    %c0_145 = arith.constant 0 : index
    %510 = vector.load %arg11[%c0_144, %c0_145] : memref<1x1xf32, #tpu.memory_space<vmem>>, vector<1x1xf32>
    tpu.vector_store %arg11[%c0_144, %c0_145], %509 {strides = array<i32>} : memref<1x1xf32, #tpu.memory_space<vmem>>, vector<1x1xf32>,
    return
  }
}

</mosaic_0001>

<bundles_post_ra>
// kernel: seq2seq_loss.1
= control target key start
LH: loop header
LB: loop body
LE: loop exit
PB: predicated region body
PF: predicated region fallthrough
CT: control target
= control target key end

     0   :  { %vm205_vm0 = vcmask 130048   ;;  %v7737_v7 = vmov 0.0   ;;  %s7725_s0 = inlined_call_operand.vmem [shape: f32[64,16], index: 0, kind: input, shape index: {}]   ;;  %s7726_s1 = inlined_call_operand.vmem [shape: f32[64,16], index: 1, kind: input, shape index: {}]   ;;  %s7727_s2 = inlined_call_operand.vmem [shape: s32[64,1], index: 2, kind: input, shape index: {}]   ;;  %s7728_s3 = inlined_call_operand.vmem [shape: f32[16,512], index: 3, kind: input, shape index: {}]   ;;  %s7729_s4 = inlined_call_operand.vmem [shape: f32[128,512], index: 4, kind: input, shape index: {}]   ;;  %s7730_s5 = inlined_call_operand.vmem [shape: f32[1,512], index: 5, kind: input, shape index: {}]   ;;  %s7731_s6 = inlined_call_operand.vmem [shape: f32[16,512], index: 6, kind: input, shape index: {}]   ;;  %s7732_s7 = inlined_call_operand.vmem [shape: f32[128,512], index: 7, kind: input, shape index: {}]   ;;  %s7733_s8 = inlined_call_operand.vmem [shape: f32[1,512], index: 8, kind: input, shape index: {}]   ;;  %s7734_s9 = inlined_call_operand.vmem [shape: f32[128,128], index: 9, kind: input, shape index: {}]   ;;  %s7735_s10 = inlined_call_operand.vmem [shape: f32[1,128], index: 10, kind: input, shape index: {}]   ;;  %s7736_s11 = inlined_call_operand.hbm [shape: f32[1,1], index: 11, kind: output, shape index: {}]  }
   0x1   :  { %v180_v0 = vld [vmem:[%s7728_s3 + $0x28] sm:$0xff]  ;;  %v179_v1 = vld [vmem:[%s7728_s3 + $0x20] sm:$0xff]  ;;  %v4631_v5 = vld [vmem:[%s7725_s0 + $0x18] sm:$0xff]  ;;  %294 = vmatprep.mubr.f32.mxu0 %v7737_v7  ;;  %312 = vmatprep.mubr.f32.mxu1 %v7737_v7 }
   0x2   :  { %v176_v2 = vld [vmem:[%s7728_s3 + $0x8] sm:$0xff]  ;;  %258 = vmatprep.subr.mxu0 %v180_v0  ;;  %4099 = vmatprep.subr.mxu1 %v180_v0  ;;  %v175_v3 = vld [vmem:[%s7728_s3] sm:$0xff]  ;;  %v182_v6 = vld [vmem:[%s7728_s3 + $0x38] sm:$0xff] }
   0x3   :  { %259 = vmatpush1.msra.mxu0 %v179_v1  ;;  %4101 = vmatpush1.msra.mxu1 %v179_v1  ;;  %v4626_v4 = vld [vmem:[%s7725_s0] sm:$0xff]  ;;  %v181_v8 = vld [vmem:[%s7728_s3 + $0x30] sm:$0xff]  ;;  %v501_v9 = vld [vmem:[%s7731_s6 + $0x28] sm:$0xff] }
   0x4   :  { %260 = vmatprep.subr.mxu0 %v176_v2  ;;  %4100 = vmatprep.subr.mxu1 %v176_v2  ;;  %v178_v10 = vld [vmem:[%s7728_s3 + $0x18] sm:$0xff]  ;;  %v4655_v11 = vld [vmem:[%s7725_s0 + $0x8] sm:$0xff]  ;;  %v4660_v12 = vld [vmem:[%s7725_s0 + $0x20] sm:$0xff] }
   0x5   :  { %261 = vmatpush1.msra.mxu0 %v175_v3  ;;  %4102 = vmatpush1.msra.mxu1 %v175_v3  ;;  %v500_v13 = vld [vmem:[%s7731_s6 + $0x20] sm:$0xff]  ;;  %v177_v14 = vld [vmem:[%s7728_s3 + $0x10] sm:$0xff]  ;;  %v497_v15 = vld [vmem:[%s7731_s6 + $0x8] sm:$0xff] }
   0x6   :  { %3950 = vmatmul.mubr.msk.f32.vlgmr.msra.gmra.mxu0 %vm205_vm0, %v4626_v4  ;;  %3953 = vmatmul.mubr.msk.f32.vlgmr.msra.gmra.mxu1 %vm205_vm0, %v4631_v5  ;;  %v503_v16 = vld [vmem:[%s7731_s6 + $0x38] sm:$0xff]  ;;  %v4684_v17 = vld [vmem:[%s7725_s0 + $0x10] sm:$0xff]  ;;  %v4689_v18 = vld [vmem:[%s7725_s0 + $0x28] sm:$0xff] }
   0x7   :  { %371 = vmatprep.subr.mxu1 %v182_v6  ;;  %300 = vmatprep.mubr.f32.mxu0 %v7737_v7  ;;  %v496_v19 = vld [vmem:[%s7731_s6] sm:$0xff]  ;;  %v4697_v20 = vld [vmem:[%s7729_s4 + $0x1e8] sm:$0xff]  ;;  %v4707_v21 = vld [vmem:[%s7725_s0 + $0x30] sm:$0xff] }
   0x8   :  { %372 = vmatpush1.msra.mxu1 %v181_v8  ;;  %318 = vmatprep.mubr.f32.mxu1 %v7737_v7  ;;  %v4712_v22 = vld [vmem:[%s7726_s1] sm:$0xff]  ;;  %v4724_v24 = vld [vmem:[%s7729_s4 + $0x1c8] sm:$0xff]  ;;  %v4740_v26 = vld [vmem:[%s7725_s0 + $0x38] sm:$0xff] }
   0x9   :  { %578 = vmatprep.subr.mxu0 %v501_v9  ;;  %373 = vmatprep.subr.mxu1 %v178_v10  ;;  %v4719_v23 = vld [vmem:[%s7729_s4 + $0x1e0] sm:$0xff]  ;;  %v4745_v27 = vld [vmem:[%s7726_s1 + $0x8] sm:$0xff]  ;;  %v4781_v32 = vld [vmem:[%s7726_s1 + $0x10] sm:$0xff] }
   0xa   :  { %3951 = vmatmul.mubr.msk.f32.gmra.mxu0 %vm205_vm0, %v4655_v11  ;;  %3954 = vmatmul.mubr.msk.f32.gmra.mxu1 %vm205_vm0, %v4660_v12  ;;  %v4733_v25 = vld [vmem:[%s7729_s4 + $0x1c0] sm:$0xff]  ;;  %v4752_v28 = vld [vmem:[%s7729_s4 + $0x1a8] sm:$0xff]  ;;  %v502_v34 = vld [vmem:[%s7731_s6 + $0x30] sm:$0xff] }
   0xb   :  { %306 = vmatprep.mubr.f32.mxu0 %v7737_v7  ;;  %324 = vmatprep.mubr.f32.mxu1 %v7737_v7  ;;  %v4758_v29 = vld [vmem:[%s7729_s4 + $0x1a0] sm:$0xff]  ;;  %v4767_v30 = vld [vmem:[%s7729_s4 + $0x188] sm:$0xff]  ;;  %v4817_v38 = vld [vmem:[%s7726_s1 + $0x18] sm:$0xff] }
   0xc   :  { %579 = vmatpush1.msra.mxu0 %v500_v13  ;;  %374 = vmatpush1.msra.mxu1 %v177_v14  ;;  %v4774_v31 = vld [vmem:[%s7729_s4 + $0x180] sm:$0xff]  ;;  %v4786_v33 = vld [vmem:[%s7729_s4 + $0x168] sm:$0xff]  ;;  %v499_v42 = vld [vmem:[%s7731_s6 + $0x18] sm:$0xff] }
   0xd   :  { %580 = vmatprep.subr.mxu0 %v497_v15  ;;  %691 = vmatprep.subr.mxu1 %v503_v16  ;;  %v4795_v35 = vld [vmem:[%s7729_s4 + $0x160] sm:$0xff]  ;;  %v4803_v36 = vld [vmem:[%s7729_s4 + $0x148] sm:$0xff] }
   0xe   :  { %3952 = vmatmul.mubr.msk.f32.gmra.mxu0 %vm205_vm0, %v4684_v17  ;;  %3955 = vmatmul.mubr.msk.f32.gmra.mxu1 %vm205_vm0, %v4689_v18  ;;  %v4811_v37 = vld [vmem:[%s7729_s4 + $0x140] sm:$0xff]  ;;  %v4824_v39 = vld [vmem:[%s7729_s4 + $0x128] sm:$0xff] }
   0xf   :  { %330 = vmatprep.mubr.f32.mxu1 %v7737_v7  ;;  %581 = vmatpush1.msra.mxu0 %v496_v19  ;;  %v4831_v40 = vld [vmem:[%s7729_s4 + $0x120] sm:$0xff]  ;;  %v4840_v41 = vld [vmem:[%s7729_s4 + $0x108] sm:$0xff] }
  0x10   :  { %614 = vmatprep.mubr.f32.mxu0 %v7737_v7  ;;  %812 = vmatprep.subr.mxu0 %v4697_v20  ;;  %v4850_v43 = vld [vmem:[%s7729_s4 + $0x100] sm:$0xff] }
  0x12   :  { %3956 = vmatmul.mubr.msk.f32.gmra.mxu1 %vm205_vm0, %v4707_v21  ;;  %3966 = vmatmul.mubr.msk.f32.vlgmr.msra.gmra.mxu0 %vm205_vm0, %v4712_v22 }
  0x13   :  { %813 = vmatpush1.msra.mxu0 %v4719_v23  ;;  %336 = vmatprep.mubr.f32.mxu1 %v7737_v7 }
  0x14   :  { %814 = vmatprep.subr.mxu0 %v4724_v24  ;;  %620 = vmatprep.mubr.f32.mxu0 %v7737_v7 }
  0x15   :  { %815 = vmatpush1.msra.mxu0 %v4733_v25 }
  0x16   :  { %3957 = vmatmul.mubr.msk.f32.gmra.mxu1 %vm205_vm0, %v4740_v26  ;;  %3967 = vmatmul.mubr.msk.f32.gmra.mxu0 %vm205_vm0, %v4745_v27 }
  0x17   :  { %816 = vmatprep.subr.mxu0 %v4752_v28  ;;  %407 = vmatprep.mubr.f32.mxu1 %v7737_v7 }
  0x18   :  { %817 = vmatpush1.msra.mxu0 %v4758_v29  ;;  %626 = vmatprep.mubr.f32.mxu0 %v7737_v7 }
  0x19   :  { %818 = vmatprep.subr.mxu0 %v4767_v30 }
  0x1a   :  { %819 = vmatpush1.msra.mxu0 %v4774_v31  ;;  %3958 = vmatmul.mubr.msk.f32.vlgmr.msra.gmra.mxu1 %vm205_vm0, %v4626_v4 }
  0x1b   :  { %3968 = vmatmul.mubr.msk.f32.gmra.mxu0 %vm205_vm0, %v4781_v32  ;;  %820 = vmatprep.subr.mxu0 %v4786_v33 }
  0x1c   :  { %692 = vmatpush1.msra.mxu1 %v502_v34  ;;  %821 = vmatpush1.msra.mxu0 %v4795_v35 }
  0x1d   :  { %822 = vmatprep.subr.mxu0 %v4803_v36  ;;  %413 = vmatprep.mubr.f32.mxu1 %v7737_v7 }
  0x1e   :  { %632 = vmatprep.mubr.f32.mxu0 %v7737_v7  ;;  %823 = vmatpush1.msra.mxu0 %v4811_v37 }
  0x1f   :  { %3959 = vmatmul.mubr.msk.f32.gmra.mxu1 %vm205_vm0, %v4655_v11  ;;  %3969 = vmatmul.mubr.msk.f32.gmra.mxu0 %vm205_vm0, %v4817_v38 }
  0x20   :  { %824 = vmatprep.subr.mxu0 %v4824_v39  ;;  %419 = vmatprep.mubr.f32.mxu1 %v7737_v7 }
  0x21   :  { %16 = vsyncpa [#allocation6], 0  ;;  %825 = vmatpush1.msra.mxu0 %v4831_v40  ;;  %638 = vmatprep.mubr.f32.mxu0 %v7737_v7  ;;  %v4857_v44 = vld [vmem:[%s7726_s1 + $0x20] sm:$0xff]  ;;  %v4862_v45 = vld [vmem:[%s7729_s4 + $0xe8] sm:$0xff]  ;;  %vm3906_vm11 = vcmask 7168  }
  0x22   :  { %826 = vmatprep.subr.mxu0 %v4840_v41  ;;  %v4868_v46 = vld [vmem:[%s7729_s4 + $0xe0] sm:$0xff]  ;;  %693 = vmatprep.subr.mxu1 %v499_v42  ;;  %v4876_v47 = vld [vmem:[%s7729_s4 + $0xc8] sm:$0xff]  ;;  %v4926_v54 = vld [vmem:[%s7726_s1 + $0x30] sm:$0xff] }
  0x23   :  { %827 = vmatpush1.msra.mxu0 %v4850_v43  ;;  %3960 = vmatmul.mubr.msk.f32.gmra.mxu1 %vm205_vm0, %v4684_v17  ;;  %7913 = vst [vmem:[#allocation8_spill] sm:$0xff] %v4876_v47  ;;  %v4884_v48 = vld [vmem:[%s7729_s4 + $0xc0] sm:$0xff]  ;;  %v4891_v49 = vld [vmem:[%s7726_s1 + $0x28] sm:$0xff]  ;;  %v498_v56 = vld [vmem:[%s7731_s6 + $0x10] sm:$0xff] }
  0x24   :  { %3970 = vmatmul.mubr.msk.f32.gmra.mxu0 %vm205_vm0, %v4857_v44  ;;  %828 = vmatprep.subr.mxu0 %v4862_v45  ;;  %7914 = vst [vmem:[#allocation9_spill] sm:$0xff] %v4884_v48  ;;  %v4896_v50 = vld [vmem:[%s7729_s4 + $0xa8] sm:$0xff]  ;;  %v4903_v51 = vld [vmem:[%s7729_s4 + $0xa0] sm:$0xff]  ;;  %v4963_v60 = vld [vmem:[%s7726_s1 + $0x38] sm:$0xff] }
  0x25   :  { %829 = vmatpush1.msra.mxu0 %v4868_v46  ;;  %425 = vmatprep.mubr.f32.mxu1 %v7737_v7  ;;  %7915 = vst [vmem:[#allocation10_spill] sm:$0xff] %v4903_v51  ;;  %v4911_v52 = vld [vmem:[%s7729_s4 + $0x88] sm:$0xff]  ;;  %v4919_v53 = vld [vmem:[%s7729_s4 + $0x80] sm:$0xff]  ;;  %v4991_v0 = vld [vmem:[%s7729_s4 + $0x1f8] sm:$0xff] }
  0x26   :  { %830 = vmatprep.subr.mxu0 %v4876_v47  ;;  %644 = vmatprep.mubr.f32.mxu0 %v7737_v7  ;;  %7916 = vst [vmem:[#allocation11_spill] sm:$0xff] %v4911_v52  ;;  %7917 = vst [vmem:[#allocation12_spill] sm:$0xff] %v4919_v53  ;;  %v4931_v55 = vld [vmem:[%s7729_s4 + $0x68] sm:$0xff]  ;;  %v4941_v57 = vld [vmem:[%s7729_s4 + $0x60] sm:$0xff] }
  0x27   :  { %831 = vmatpush1.msra.mxu0 %v4884_v48  ;;  %3961 = vmatmul.mubr.msk.f32.gmra.mxu1 %vm205_vm0, %v4631_v5  ;;  %7918 = vst [vmem:[#allocation13_spill] sm:$0xff] %v4931_v55  ;;  %7919 = vst [vmem:[#allocation14_spill] sm:$0xff] %v4941_v57  ;;  %v4949_v58 = vld [vmem:[%s7729_s4 + $0x48] sm:$0xff]  ;;  %v4957_v59 = vld [vmem:[%s7729_s4 + $0x40] sm:$0xff] }
  0x28   :  { %3971 = vmatmul.mubr.msk.f32.gmra.mxu0 %vm205_vm0, %v4891_v49  ;;  %832 = vmatprep.subr.mxu0 %v4896_v50  ;;  %7920 = vst [vmem:[#allocation15_spill] sm:$0xff] %v4949_v58  ;;  %7921 = vst [vmem:[#allocation16_spill] sm:$0xff] %v4957_v59  ;;  %v4970_v61 = vld [vmem:[%s7729_s4 + $0x28] sm:$0xff]  ;;  %v4977_v62 = vld [vmem:[%s7729_s4 + $0x20] sm:$0xff] }
  0x29   :  { %833 = vmatpush1.msra.mxu0 %v4903_v51  ;;  %431 = vmatprep.mubr.f32.mxu1 %v7737_v7  ;;  %7922 = vst [vmem:[#allocation17_spill] sm:$0xff] %v4970_v61  ;;  %7923 = vst [vmem:[#allocation18_spill] sm:$0xff] %v4977_v62  ;;  %v4986_v63 = vld [vmem:[%s7729_s4 + $0x8] sm:$0xff]  ;;  %v4998_v1 = vld [vmem:[%s7729_s4] sm:$0xff] }
  0x2a   :  { %834 = vmatprep.subr.mxu0 %v4911_v52  ;;  %650 = vmatprep.mubr.f32.mxu0 %v7737_v7  ;;  %7924 = vst [vmem:[#allocation19_spill] sm:$0xff] %v4986_v63  ;;  %7925 = vst [vmem:[#allocation20_spill] sm:$0xff] %v4991_v0  ;;  %v5020_v2 = vld [vmem:[%s7729_s4 + $0x1f0] sm:$0xff]  ;;  %v5026_v3 = vld [vmem:[%s7729_s4 + $0x1d8] sm:$0xff] }
  0x2b   :  { %835 = vmatpush1.msra.mxu0 %v4919_v53  ;;  %3962 = vmatmul.mubr.msk.f32.gmra.mxu1 %vm205_vm0, %v4660_v12  ;;  %7926 = vst [vmem:[#allocation21_spill] sm:$0xff] %v4998_v1  ;;  %v5034_v4 = vld [vmem:[%s7729_s4 + $0x1d0] sm:$0xff]  ;;  %v5042_v5 = vld [vmem:[%s7729_s4 + $0x1b8] sm:$0xff] }
  0x2c   :  { %3972 = vmatmul.mubr.msk.f32.gmra.mxu0 %vm205_vm0, %v4926_v54  ;;  %836 = vmatprep.subr.mxu0 %v4931_v55  ;;  %v5048_v6 = vld [vmem:[%s7729_s4 + $0x1b0] sm:$0xff]  ;;  %v5055_v8 = vld [vmem:[%s7729_s4 + $0x198] sm:$0xff] }
  0x2d   :  { %694 = vmatpush1.msra.mxu1 %v498_v56  ;;  %837 = vmatpush1.msra.mxu0 %v4941_v57  ;;  %v5064_v9 = vld [vmem:[%s7729_s4 + $0x190] sm:$0xff]  ;;  %v5071_v10 = vld [vmem:[%s7729_s4 + $0x178] sm:$0xff] }
  0x2e   :  { %838 = vmatprep.subr.mxu0 %v4949_v58  ;;  %437 = vmatprep.mubr.f32.mxu1 %v7737_v7  ;;  %v5077_v11 = vld [vmem:[%s7729_s4 + $0x170] sm:$0xff]  ;;  %v5084_v12 = vld [vmem:[%s7729_s4 + $0x158] sm:$0xff] }
  0x2f   :  { %656 = vmatprep.mubr.f32.mxu0 %v7737_v7  ;;  %839 = vmatpush1.msra.mxu0 %v4957_v59  ;;  %v5093_v13 = vld [vmem:[%s7729_s4 + $0x150] sm:$0xff]  ;;  %v5100_v14 = vld [vmem:[%s7729_s4 + $0x138] sm:$0xff] }
  0x30   :  { %3963 = vmatmul.mubr.msk.f32.gmra.mxu1 %vm205_vm0, %v4689_v18  ;;  %3973 = vmatmul.mubr.msk.f32.gmra.mxu0 %vm205_vm0, %v4963_v60  ;;  %v5106_v15 = vld [vmem:[%s7729_s4 + $0x130] sm:$0xff]  ;;  %v5113_v16 = vld [vmem:[%s7729_s4 + $0x118] sm:$0xff] }
  0x31   :  { %840 = vmatprep.subr.mxu0 %v4970_v61  ;;  %443 = vmatprep.mubr.f32.mxu1 %v7737_v7  ;;  %v5122_v17 = vld [vmem:[%s7729_s4 + $0x110] sm:$0xff]  ;;  %v5129_v18 = vld [vmem:[%s7729_s4 + $0xf8] sm:$0xff] }
  0x32   :  { %841 = vmatpush1.msra.mxu0 %v4977_v62  ;;  %876 = vmatprep.mubr.f32.mxu0 %v7737_v7  ;;  %v5135_v19 = vld [vmem:[%s7729_s4 + $0xf0] sm:$0xff]  ;;  %v5216_v56 = vld [vmem:[%s7729_s4 + $0x38] sm:$0xff] }
  0x33   :  { %842 = vmatprep.subr.mxu0 %v4986_v63  ;;  %883 = vmatprep.subr.mxu1 %v4991_v0  ;;  %v5180_v34 = vld [vmem:[%s7729_s4 + $0x90] sm:$0xff]  ;;  %7935 = vst [vmem:[#allocation30_spill] sm:$0xff] %v5216_v56 }
  0x34   :  { %843 = vmatpush1.msra.mxu0 %v4998_v1  ;;  %3964 = vmatmul.mubr.msk.f32.gmra.mxu1 %vm205_vm0, %v4707_v21  ;;  %v5142_v21 = vld [vmem:[%s7729_s4 + $0xd8] sm:$0xff]  ;;  %7930 = vst [vmem:[#allocation25_spill] sm:$0xff] %v5180_v34  ;;  %v5193_v42 = vld [vmem:[%s7729_s4 + $0x70] sm:$0xff] }
  0x35   :  { %877 = vmatmul.mubr.f32.vlgmr.msra.gmra.mxu0 %v7737_v7  ;;  %449 = vmatprep.mubr.f32.mxu1 %v7737_v7  ;;  %7932 = vst [vmem:[#allocation27_spill] sm:$0xff] %v5193_v42 }
  0x36   :  { %986 = vmatprep.subr.mxu0 %v4697_v20  ;;  %1050 = vmatprep.mubr.f32.mxu0 %v7737_v7 }
  0x37   :  { %987 = vmatpush1.msra.mxu0 %v4719_v23 }
  0x38   :  { %3965 = vmatmul.mubr.msk.f32.gmra.mxu1 %vm205_vm0, %v4740_v26  ;;  %988 = vmatprep.subr.mxu0 %v4724_v24  ;;  %v5158_v26 = vld [vmem:[%s7729_s4 + $0xb8] sm:$0xff] }
  0x39   :  { %727 = vmatprep.mubr.f32.mxu1 %v7737_v7  ;;  %989 = vmatpush1.msra.mxu0 %v4733_v25  ;;  %7927 = vst [vmem:[#allocation22_spill] sm:$0xff] %v5158_v26 }
  0x3a   :  { %990 = vmatprep.subr.mxu0 %v4752_v28 }
  0x3b   :  { %991 = vmatpush1.msra.mxu0 %v4758_v29 }
  0x3c   :  { %3974 = vmatmul.mubr.msk.f32.vlgmr.msra.gmra.mxu1 %vm205_vm0, %v4712_v22  ;;  %992 = vmatprep.subr.mxu0 %v4767_v30  ;;  %v5151_v22 = vld [vmem:[%s7729_s4 + $0xd0] sm:$0xff] }
  0x3d   :  { %884 = vmatpush1.msra.mxu1 %v5020_v2  ;;  %733 = vmatprep.mubr.f32.mxu1 %v7737_v7 }
  0x3e   :  { %885 = vmatprep.subr.mxu1 %v5026_v3  ;;  %993 = vmatpush1.msra.mxu0 %v4774_v31 }
  0x3f   :  { %886 = vmatpush1.msra.mxu1 %v5034_v4  ;;  %994 = vmatprep.subr.mxu0 %v4786_v33 }
  0x40   :  { %3975 = vmatmul.mubr.msk.f32.gmra.mxu1 %vm205_vm0, %v4745_v27  ;;  %887 = vmatprep.subr.mxu1 %v5042_v5  ;;  %v5164_v27 = vld [vmem:[%s7729_s4 + $0xb0] sm:$0xff] }
  0x41   :  { %888 = vmatpush1.msra.mxu1 %v5048_v6  ;;  %739 = vmatprep.mubr.f32.mxu1 %v7737_v7  ;;  %7928 = vst [vmem:[#allocation23_spill] sm:$0xff] %v5164_v27 }
  0x42   :  { %889 = vmatprep.subr.mxu1 %v5055_v8  ;;  %995 = vmatpush1.msra.mxu0 %v4795_v35 }
  0x43   :  { %890 = vmatpush1.msra.mxu1 %v5064_v9  ;;  %996 = vmatprep.subr.mxu0 %v4803_v36 }
  0x44   :  { %3976 = vmatmul.mubr.msk.f32.gmra.mxu1 %vm205_vm0, %v4781_v32  ;;  %891 = vmatprep.subr.mxu1 %v5071_v10  ;;  %v5171_v32 = vld [vmem:[%s7729_s4 + $0x98] sm:$0xff] }
  0x45   :  { %892 = vmatpush1.msra.mxu1 %v5077_v11  ;;  %745 = vmatprep.mubr.f32.mxu1 %v7737_v7  ;;  %7929 = vst [vmem:[#allocation24_spill] sm:$0xff] %v5171_v32 }
  0x46   :  { %893 = vmatprep.subr.mxu1 %v5084_v12  ;;  %997 = vmatpush1.msra.mxu0 %v4811_v37 }
  0x47   :  { %894 = vmatpush1.msra.mxu1 %v5093_v13  ;;  %998 = vmatprep.subr.mxu0 %v4824_v39 }
  0x48   :  { %3977 = vmatmul.mubr.msk.f32.gmra.mxu1 %vm205_vm0, %v4817_v38  ;;  %895 = vmatprep.subr.mxu1 %v5100_v14  ;;  %v5187_v38 = vld [vmem:[%s7729_s4 + $0x78] sm:$0xff] }
  0x49   :  { %896 = vmatpush1.msra.mxu1 %v5106_v15  ;;  %751 = vmatprep.mubr.f32.mxu1 %v7737_v7  ;;  %7931 = vst [vmem:[#allocation26_spill] sm:$0xff] %v5187_v38 }
  0x4a   :  { %897 = vmatprep.subr.mxu1 %v5113_v16  ;;  %999 = vmatpush1.msra.mxu0 %v4831_v40 }
  0x4b   :  { %898 = vmatpush1.msra.mxu1 %v5122_v17  ;;  %1000 = vmatprep.subr.mxu0 %v4840_v41 }
  0x4c   :  { %3978 = vmatmul.mubr.msk.f32.gmra.mxu1 %vm205_vm0, %v4857_v44  ;;  %899 = vmatprep.subr.mxu1 %v5129_v18  ;;  %v5200_v44 = vld [vmem:[%s7729_s4 + $0x58] sm:$0xff] }
  0x4d   :  { %900 = vmatpush1.msra.mxu1 %v5135_v19  ;;  %757 = vmatprep.mubr.f32.mxu1 %v7737_v7  ;;  %7933 = vst [vmem:[#allocation28_spill] sm:$0xff] %v5200_v44 }
  0x4e   :  { %901 = vmatprep.subr.mxu1 %v5142_v21  ;;  %1001 = vmatpush1.msra.mxu0 %v4850_v43 }
  0x4f   :  { %902 = vmatpush1.msra.mxu1 %v5151_v22  ;;  %1002 = vmatprep.subr.mxu0 %v4862_v45 }
  0x50   :  { %3979 = vmatmul.mubr.msk.f32.gmra.mxu1 %vm205_vm0, %v4891_v49  ;;  %903 = vmatprep.subr.mxu1 %v5158_v26  ;;  %v5209_v49 = vld [vmem:[%s7729_s4 + $0x50] sm:$0xff] }
  0x51   :  { %904 = vmatpush1.msra.mxu1 %v5164_v27  ;;  %763 = vmatprep.mubr.f32.mxu1 %v7737_v7  ;;  %7934 = vst [vmem:[#allocation29_spill] sm:$0xff] %v5209_v49 }
  0x52   :  { %905 = vmatprep.subr.mxu1 %v5171_v32  ;;  %1003 = vmatpush1.msra.mxu0 %v4868_v46 }
  0x53   :  { %906 = vmatpush1.msra.mxu1 %v5180_v34  ;;  %1004 = vmatprep.subr.mxu0 %v4876_v47  ;;  %v5238_v47 = vld [vmem:[%s7729_s4 + $0x10] sm:$0xff] }
  0x54   :  { %3980 = vmatmul.mubr.msk.f32.gmra.mxu1 %vm205_vm0, %v4926_v54  ;;  %907 = vmatprep.subr.mxu1 %v5187_v38  ;;  %v5222_v54 = vld [vmem:[%s7729_s4 + $0x30] sm:$0xff]  ;;  %7938 = vst [vmem:[#allocation33_spill] sm:$0xff] %v5238_v47 }
  0x55   :  { %908 = vmatpush1.msra.mxu1 %v5193_v42  ;;  %769 = vmatprep.mubr.f32.mxu1 %v7737_v7  ;;  %7936 = vst [vmem:[#allocation31_spill] sm:$0xff] %v5222_v54  ;;  %v5229_v7 = vld [vmem:[%s7729_s4 + $0x18] sm:$0xff] }
  0x56   :  { %909 = vmatprep.subr.mxu1 %v5200_v44  ;;  %1005 = vmatpush1.msra.mxu0 %v4884_v48  ;;  %7937 = vst [vmem:[#allocation32_spill] sm:$0xff] %v5229_v7  ;;  %v7939_v48 = vmov 0.0  }
  0x57   :  { %910 = vmatpush1.msra.mxu1 %v5209_v49  ;;  %1006 = vmatprep.subr.mxu0 %v4896_v50 }
  0x58   :  { %3981 = vmatmul.mubr.msk.f32.gmra.mxu1 %vm205_vm0, %v4963_v60  ;;  %911 = vmatprep.subr.mxu1 %v5216_v56 }
  0x59   :  { %912 = vmatpush1.msra.mxu1 %v5222_v54  ;;  %947 = vmatprep.mubr.f32.mxu1 %v7939_v48 }
  0x5a   :  { %913 = vmatprep.subr.mxu1 %v5229_v7  ;;  %1007 = vmatpush1.msra.mxu0 %v4903_v51 }
  0x5b   :  { %914 = vmatpush1.msra.mxu1 %v5238_v47  ;;  %1008 = vmatprep.subr.mxu0 %v4911_v52 }
  0x5c   :  { %948 = vmatmul.mubr.f32.vlgmr.msra.gmra.mxu1 %v7939_v48  ;;  %1057 = vmatprep.subr.mxu1 %v4991_v0 }
  0x5d   :  { %1058 = vmatpush1.msra.mxu1 %v5020_v2  ;;  %1009 = vmatpush1.msra.mxu0 %v4919_v53 }
  0x5e   :  { %1059 = vmatprep.subr.mxu1 %v5026_v3  ;;  %1010 = vmatprep.subr.mxu0 %v4931_v55 }
  0x5f   :  { %1060 = vmatpush1.msra.mxu1 %v5034_v4  ;;  %1011 = vmatpush1.msra.mxu0 %v4941_v57 }
  0x60   :  { %1061 = vmatprep.subr.mxu1 %v5042_v5  ;;  %1012 = vmatprep.subr.mxu0 %v4949_v58 }
  0x61   :  { %1062 = vmatpush1.msra.mxu1 %v5048_v6  ;;  %1013 = vmatpush1.msra.mxu0 %v4957_v59 }
  0x62   :  { %1063 = vmatprep.subr.mxu1 %v5055_v8  ;;  %1014 = vmatprep.subr.mxu0 %v4970_v61 }
  0x63   :  { %1064 = vmatpush1.msra.mxu1 %v5064_v9  ;;  %1015 = vmatpush1.msra.mxu0 %v4977_v62 }
  0x64   :  { %1065 = vmatprep.subr.mxu1 %v5071_v10  ;;  %1016 = vmatprep.subr.mxu0 %v4986_v63 }
  0x65   :  { %1066 = vmatpush1.msra.mxu1 %v5077_v11  ;;  %1017 = vmatpush1.msra.mxu0 %v4998_v1  ;;  %v183_v1 = vld [vmem:[%s7730_s5] sm:$0xf] }
  0x66   :  { %1067 = vmatprep.subr.mxu1 %v5084_v12  ;;  %1121 = vmatprep.mubr.f32.mxu1 %v7939_v48 }
  0x67   :  { %1068 = vmatpush1.msra.mxu1 %v5093_v13  ;;  %1160 = vmatprep.subr.mxu0 %v4697_v20  ;;  %v7756_v20 = vlaneseq }
  0x68   :  { %1069 = vmatprep.subr.mxu1 %v5100_v14 }
  0x69   :  { %1070 = vmatpush1.msra.mxu1 %v5106_v15  ;;  %v5292_v60 = vshrl.u32 %v7756_v20, 7 }
  0x6a   :  { %1071 = vmatprep.subr.mxu1 %v5113_v16 }
  0x6b   :  { %1072 = vmatpush1.msra.mxu1 %v5122_v17  ;;  %v187_v48 = vsub.s32 0, %v5292_v60  ;;  %v191_v63 = vsub.s32 1, %v5292_v60 }
  0x6c   :  { %1073 = vmatprep.subr.mxu1 %v5129_v18 }
  0x6d   :  { %1074 = vmatpush1.msra.mxu1 %v5135_v19  ;;  %v5299_v62 = vrot.slane %v183_v1, %v187_v48 }
  0x6e   :  { %1075 = vmatprep.subr.mxu1 %v5142_v21 }
  0x6f   :  { %1076 = vmatpush1.msra.mxu1 %v5151_v22 }
  0x70   :  { %1077 = vmatprep.subr.mxu1 %v5158_v26 }
  0x71   :  { %1078 = vmatpush1.msra.mxu1 %v5164_v27 }
  0x72   :  { %1079 = vmatprep.subr.mxu1 %v5171_v32 }
  0x73   :  { %1080 = vmatpush1.msra.mxu1 %v5180_v34 }
  0x74   :  { %1081 = vmatprep.subr.mxu1 %v5187_v38 }
  0x75   :  { %1082 = vmatpush1.msra.mxu1 %v5193_v42 }
  0x76   :  { %1083 = vmatprep.subr.mxu1 %v5200_v44 }
  0x77   :  { %1084 = vmatpush1.msra.mxu1 %v5209_v49 }
  0x78   :  { %1085 = vmatprep.subr.mxu1 %v5216_v56 }
  0x79   :  { %1086 = vmatpush1.msra.mxu1 %v5222_v54  ;;  %v5301_v54 = vrot.slane %v183_v1, %v191_v63 }
  0x7a   :  { %1087 = vmatprep.subr.mxu1 %v5229_v7 }
  0x7b   :  { %1088 = vmatpush1.msra.mxu1 %v5238_v47 }
  0x7c   :  { %1231 = vmatprep.subr.mxu1 %v4991_v0 }
  0xc6   :  { %v5303_v7 = vpop.f32.mrf.mxu0  ;;  %v314_v47 = vpop.f32.mrf.mxu1 }
  0xc7   :  { %v5306_v0 = vadd.f32 %v314_v47, %v5299_v62  ;;  %v5322_v47 = vld [vmem:[%s7733_s8] sm:$0xf] }
  0xc8   :  { %v5308_v20 = vpop.f32.mrf.mxu0  ;;  %v316_v56 = vpop.f32.mrf.mxu1 }
  0xc9   :  { %7940 = vst [vmem:[#allocation34_spill] sm:$0xff] %v5306_v0  ;;  %v5311_v61 = vadd.f32 %v316_v56, %v5301_v54 }
  0xca   :  { %v302_v49 = vpop.f32.mrf.mxu0  ;;  %v320_v59 = vpop.f32.mrf.mxu1 }
  0xcb   :  { %7941 = vst [vmem:[#allocation35_spill] sm:$0xff] %v5311_v61  ;;  %v5314_v44 = vadd.f32 %v302_v49, %v5299_v62  ;;  %v5317_v58 = vadd.f32 %v320_v59, %v5299_v62 }
  0xcc   :  { %v304_v42 = vpop.f32.mrf.mxu0  ;;  %v322_v57 = vpop.f32.mrf.mxu1 }
  0xcd   :  { %7942 = vst [vmem:[#allocation36_spill] sm:$0xff] %v5314_v44  ;;  %7943 = vst [vmem:[#allocation37_spill] sm:$0xff] %v5317_v58  ;;  %v5325_v0 = vadd.f32 %v304_v42, %v5301_v54  ;;  %v5328_v56 = vadd.f32 %v322_v57, %v5301_v54  ;;  %v5337_v58 = vrot.slane %v5322_v47, %v187_v48 }
  0xce   :  { %v308_v61 = vpop.f32.mrf.mxu0  ;;  %v326_v38 = vpop.f32.mrf.mxu1  ;;  %v5346_v57 = vrot.slane %v5322_v47, %v191_v63 }
  0xcf   :  { %7944 = vst [vmem:[#allocation38_spill] sm:$0xff] %v5325_v0  ;;  %7945 = vst [vmem:[#allocation39_spill] sm:$0xff] %v5328_v56  ;;  %v5331_v49 = vadd.f32 %v308_v61, %v5299_v62  ;;  %v5334_v59 = vadd.f32 %v326_v38, %v5299_v62 }
  0xd0   :  { %v310_v44 = vpop.f32.mrf.mxu0  ;;  %v328_v55 = vpop.f32.mrf.mxu1 }
  0xd1   :  { %7946 = vst [vmem:[#allocation40_spill] sm:$0xff] %v5331_v49  ;;  %7947 = vst [vmem:[#allocation41_spill] sm:$0xff] %v5334_v59  ;;  %v5340_v34 = vadd.f32 %v310_v44, %v5301_v54  ;;  %v5343_v42 = vadd.f32 %v328_v55, %v5301_v54 }
  0xd2   :  { %v332_v56 = vpop.f32.mrf.mxu1  ;;  %v616_v61 = vpop.f32.mrf.mxu0 }
  0xd3   :  { %7948 = vst [vmem:[#allocation42_spill] sm:$0xff] %v5340_v34  ;;  %7949 = vst [vmem:[#allocation43_spill] sm:$0xff] %v5343_v42  ;;  %v5349_v49 = vadd.f32 %v332_v56, %v5299_v62  ;;  %v5352_v38 = vadd.f32 %v616_v61, %v5337_v58 }
  0xd4   :  { %v334_v48 = vpop.f32.mrf.mxu1  ;;  %v618_v59 = vpop.f32.mrf.mxu0 }
  0xd5   :  { %7950 = vst [vmem:[#allocation44_spill] sm:$0xff] %v5349_v49  ;;  %7951 = vst [vmem:[#allocation45_spill] sm:$0xff] %v5352_v38  ;;  %v5355_v0 = vadd.f32 %v334_v48, %v5301_v54  ;;  %v5358_v44 = vadd.f32 %v618_v59, %v5346_v57  ;;  %v195_v48 = vsub.s32 2, %v5292_v60 }
  0xd6   :  { %v338_v55 = vpop.f32.mrf.mxu1  ;;  %v622_v42 = vpop.f32.mrf.mxu0 }
  0xd7   :  { %7952 = vst [vmem:[#allocation46_spill] sm:$0xff] %v5355_v0  ;;  %7953 = vst [vmem:[#allocation47_spill] sm:$0xff] %v5358_v44  ;;  %v5361_v63 = vadd.f32 %v338_v55, %v5299_v62  ;;  %v5364_v34 = vadd.f32 %v622_v42, %v5337_v58  ;;  %v199_v55 = vsub.s32 3, %v5292_v60 }
  0xd8   :  { %v340_v56 = vpop.f32.mrf.mxu1  ;;  %v624_v49 = vpop.f32.mrf.mxu0 }
  0xd9   :  { %7954 = vst [vmem:[#allocation48_spill] sm:$0xff] %v5361_v63  ;;  %7955 = vst [vmem:[#allocation49_spill] sm:$0xff] %v5364_v34  ;;  %v5367_v61 = vadd.f32 %v340_v56, %v5301_v54  ;;  %v5370_v38 = vadd.f32 %v624_v49, %v5346_v57  ;;  %v5381_v63 = vrot.slane %v183_v1, %v195_v48 }
  0xda   :  { %v5373_v59 = vpop.f32.mrf.mxu1 }
  0xdb   :  { %7956 = vst [vmem:[#allocation50_spill] sm:$0xff] %v5367_v61  ;;  %7957 = vst [vmem:[#allocation51_spill] sm:$0xff] %v5370_v38  ;;  %v628_v44 = vpop.f32.mrf.mxu0  ;;  %v5386_v61 = vrot.slane %v183_v1, %v199_v55 }
  0xdc   :  { %v5376_v0 = vadd.f32 %v628_v44, %v5337_v58  ;;  %v5379_v42 = vpop.f32.mrf.mxu1 }
  0xdd   :  { %v630_v34 = vpop.f32.mrf.mxu0 }
  0xde   :  { %7958 = vst [vmem:[#allocation52_spill] sm:$0xff] %v5376_v0  ;;  %v5384_v56 = vadd.f32 %v630_v34, %v5346_v57 }
  0xdf   :  { %v415_v49 = vpop.f32.mrf.mxu1  ;;  %v634_v38 = vpop.f32.mrf.mxu0 }
  0xe0   :  { %7959 = vst [vmem:[#allocation53_spill] sm:$0xff] %v5384_v56  ;;  %v5389_v53 = vadd.f32 %v415_v49, %v5381_v63  ;;  %v5392_v44 = vadd.f32 %v634_v38, %v5337_v58 }
  0xe1   :  { %v417_v0 = vpop.f32.mrf.mxu1  ;;  %v636_v60 = vpop.f32.mrf.mxu0 }
  0xe2   :  { %7960 = vst [vmem:[#allocation54_spill] sm:$0xff] %v5389_v53  ;;  %7961 = vst [vmem:[#allocation55_spill] sm:$0xff] %v5392_v44  ;;  %v5395_v32 = vadd.f32 %v417_v0, %v5386_v61  ;;  %v5398_v52 = vadd.f32 %v636_v60, %v5346_v57 }
  0xe3   :  { %v421_v34 = vpop.f32.mrf.mxu1 }
  0xe4   :  { %7962 = vst [vmem:[#allocation56_spill] sm:$0xff] %v5395_v32  ;;  %7963 = vst [vmem:[#allocation57_spill] sm:$0xff] %v5398_v52  ;;  %v5401_v56 = vadd.f32 %v421_v34, %v5381_v63  ;;  %v640_v1 = vpop.f32.mrf.mxu0 }
  0xe5   :  { %v5404_v27 = vadd.f32 %v640_v1, %v5337_v58  ;;  %v423_v49 = vpop.f32.mrf.mxu1 }
  0xe6   :  { %7964 = vst [vmem:[#allocation58_spill] sm:$0xff] %v5401_v56  ;;  %v5407_v38 = vadd.f32 %v423_v49, %v5386_v61  ;;  %v642_v44 = vpop.f32.mrf.mxu0 }
  0xe7   :  { %7965 = vst [vmem:[#allocation59_spill] sm:$0xff] %v5404_v27  ;;  %v5410_v53 = vadd.f32 %v642_v44, %v5346_v57  ;;  %v427_v0 = vpop.f32.mrf.mxu1 }
  0xe8   :  { %7966 = vst [vmem:[#allocation60_spill] sm:$0xff] %v5407_v38  ;;  %v5413_v60 = vadd.f32 %v427_v0, %v5381_v63  ;;  %v646_v52 = vpop.f32.mrf.mxu0 }
  0xe9   :  { %7967 = vst [vmem:[#allocation61_spill] sm:$0xff] %v5410_v53  ;;  %v5416_v34 = vadd.f32 %v646_v52, %v5337_v58  ;;  %v429_v56 = vpop.f32.mrf.mxu1 }
  0xea   :  { %7968 = vst [vmem:[#allocation62_spill] sm:$0xff] %v5413_v60  ;;  %v5419_v1 = vadd.f32 %v429_v56, %v5386_v61  ;;  %v648_v27 = vpop.f32.mrf.mxu0 }
  0xeb   :  { %7969 = vst [vmem:[#allocation63_spill] sm:$0xff] %v5416_v34  ;;  %v5422_v49 = vadd.f32 %v648_v27, %v5346_v57  ;;  %v433_v38 = vpop.f32.mrf.mxu1 }
  0xec   :  { %7970 = vst [vmem:[#allocation64_spill] sm:$0xff] %v5419_v1  ;;  %v5425_v44 = vadd.f32 %v433_v38, %v5381_v63  ;;  %v652_v53 = vpop.f32.mrf.mxu0 }
  0xed   :  { %7971 = vst [vmem:[#allocation65_spill] sm:$0xff] %v5422_v49  ;;  %v5428_v0 = vadd.f32 %v652_v53, %v5337_v58  ;;  %v435_v60 = vpop.f32.mrf.mxu1 }
  0xee   :  { %7972 = vst [vmem:[#allocation66_spill] sm:$0xff] %v5425_v44  ;;  %v5431_v52 = vadd.f32 %v435_v60, %v5386_v61  ;;  %v654_v34 = vpop.f32.mrf.mxu0 }
  0xef   :  { %7973 = vst [vmem:[#allocation67_spill] sm:$0xff] %v5428_v0  ;;  %v5434_v56 = vadd.f32 %v654_v34, %v5346_v57 }
  0xf0   :  { %7974 = vst [vmem:[#allocation68_spill] sm:$0xff] %v5431_v52  ;;  %v439_v1 = vpop.f32.mrf.mxu1  ;;  %v658_v32 = vpop.f32.mrf.mxu0 }
  0xf1   :  { %7975 = vst [vmem:[#allocation69_spill] sm:$0xff] %v5434_v56  ;;  %v5437_v27 = vadd.f32 %v439_v1, %v5381_v63  ;;  %v5440_v38 = vadd.f32 %v658_v32, %v5337_v58  ;;  %v517_v32 = vrot.slane %v5322_v47, %v195_v48  ;;  %v297_v48 = vadd.f32 %v5303_v7, %v5299_v62 }
  0xf2   :  { %v441_v49 = vpop.f32.mrf.mxu1  ;;  %v660_v44 = vpop.f32.mrf.mxu0 }
  0xf3   :  { %7976 = vst [vmem:[#allocation70_spill] sm:$0xff] %v5437_v27  ;;  %7977 = vst [vmem:[#allocation71_spill] sm:$0xff] %v5440_v38  ;;  %v5443_v53 = vadd.f32 %v441_v49, %v5386_v61  ;;  %v5446_v60 = vadd.f32 %v660_v44, %v5346_v57  ;;  %v521_v57 = vrot.slane %v5322_v47, %v199_v55 }
  0xf4   :  { %v445_v0 = vpop.f32.mrf.mxu1 }
  0xf5   :  { %7978 = vst [vmem:[#allocation72_spill] sm:$0xff] %v5443_v53  ;;  %7979 = vst [vmem:[#allocation73_spill] sm:$0xff] %v5446_v60  ;;  %v5449_v34 = vadd.f32 %v445_v0, %v5381_v63  ;;  %v878_v38 = vpop.f32.mrf.mxu0 }
  0xf6   :  { %v447_v56 = vpop.f32.mrf.mxu1 }
  0xf7   :  { %7980 = vst [vmem:[#allocation74_spill] sm:$0xff] %v5449_v34  ;;  %v5452_v52 = vadd.f32 %v447_v56, %v5386_v61  ;;  %v880_v60 = vpop.f32.mrf.mxu0  ;;  %v299_v56 = vadd.f32 %v5308_v20, %v5301_v54 }
  0xf8   :  { %v451_v1 = vpop.f32.mrf.mxu1 }
  0xf9   :  { %7981 = vst [vmem:[#allocation75_spill] sm:$0xff] %v5452_v52  ;;  %v5455_v58 = vadd.f32 %v451_v1, %v5381_v63 }
  0xfa   :  { %v453_v49 = vpop.f32.mrf.mxu1 }
  0xfb   :  { %7982 = vst [vmem:[#allocation76_spill] sm:$0xff] %v5455_v58  ;;  %v5459_v27 = vadd.f32 %v453_v49, %v5386_v61  ;;  %v955_v58 = vadd.f32 %v880_v60, %v299_v56  ;;  %v954_v49 = vadd.f32 %v878_v38, %v297_v48 }
  0xfc   :  { %v729_v44 = vpop.f32.mrf.mxu1 }
  0xfd   :  { %7983 = vst [vmem:[#allocation77_spill] sm:$0xff] %v5459_v27  ;;  %v5462_v0 = vadd.f32 %v729_v44, %v517_v32  ;;  %v3983_v44 = vmul.f32 -1.442695, %v955_v58  ;;  %v3982_v51 = vmul.f32 -1.442695, %v954_v49 }
  0xfe   :  { %v731_v34 = vpop.f32.mrf.mxu1 }
  0xff   :  { %7984 = vst [vmem:[#allocation78_spill] sm:$0xff] %v5462_v0  ;;  %v5466_v52 = vadd.f32 %v731_v34, %v521_v57  ;;  %4110 = vpow2.f32 %v3983_v44 }
 0x100   :  { %v735_v1 = vpop.f32.mrf.mxu1  ;;  %4112 = vpow2.f32 %v3982_v51 }
 0x101   :  { %7985 = vst [vmem:[#allocation79_spill] sm:$0xff] %v5466_v52  ;;  %v5470_v53 = vadd.f32 %v735_v1, %v517_v32 }
 0x102   :  { %v737_v27 = vpop.f32.mrf.mxu1 }
 0x103   :  { %7986 = vst [vmem:[#allocation80_spill] sm:$0xff] %v5470_v53  ;;  %v5472_v47 = vadd.f32 %v737_v27, %v521_v57 }
 0x104   :  { %v741_v55 = vpop.f32.mrf.mxu1 }
 0x105   :  { %7987 = vst [vmem:[#allocation81_spill] sm:$0xff] %v5472_v47  ;;  %v5474_v0 = vadd.f32 %v741_v55, %v517_v32  ;;  %v8047_v47 = vld [vmem:[#allocation64_spill] sm:$0xff] }
 0x106   :  { %v743_v26 = vpop.f32.mrf.mxu1 }
 0x107   :  { %7988 = vst [vmem:[#allocation82_spill] sm:$0xff] %v5474_v0  ;;  %v5476_v54 = vadd.f32 %v743_v26, %v521_v57 }
 0x108   :  { %v747_v20 = vpop.f32.mrf.mxu1 }
 0x109   :  { %7989 = vst [vmem:[#allocation83_spill] sm:$0xff] %v5476_v54  ;;  %v5478_v34 = vadd.f32 %v747_v20, %v517_v32 }
 0x10a   :  { %v749_v7 = vpop.f32.mrf.mxu1 }
 0x10b   :  { %7990 = vst [vmem:[#allocation84_spill] sm:$0xff] %v5478_v34  ;;  %v5480_v62 = vadd.f32 %v749_v7, %v521_v57 }
 0x10c   :  { %v753_v38 = vpop.f32.mrf.mxu1  ;;  %v4111_v44 = vpop.eup %4110 }
 0x10d   :  { %7991 = vst [vmem:[#allocation85_spill] sm:$0xff] %v5480_v62  ;;  %v5482_v60 = vadd.f32 %v753_v38, %v517_v32  ;;  %v4113_v20 = vpop.eup %4112  ;;  %v967_v38 = vadd.f32 1.0, %v4111_v44 }
 0x10e   :  { %v755_v27 = vpop.f32.mrf.mxu1 }
 0x10f   :  { %7992 = vst [vmem:[#allocation86_spill] sm:$0xff] %v5482_v60  ;;  %v5484_v56 = vadd.f32 %v755_v27, %v521_v57  ;;  %v961_v27 = vadd.f32 1.0, %v4113_v20  ;;  %4114 = vrcp.f32 %v967_v38  ;;  %v8022_v38 = vld [vmem:[#allocation32_spill] sm:$0xff] }
 0x110   :  { %v759_v58 = vpop.f32.mrf.mxu1 }
 0x111   :  { %7993 = vst [vmem:[#allocation87_spill] sm:$0xff] %v5484_v56  ;;  %v5486_v48 = vadd.f32 %v759_v58, %v517_v32  ;;  %v410_v58 = vadd.f32 %v5373_v59, %v5381_v63  ;;  %4116 = vrcp.f32 %v961_v27  ;;  %v8023_v27 = vld [vmem:[#allocation21_spill] sm:$0xff] }
 0x112   :  { %v761_v1 = vpop.f32.mrf.mxu1 }
 0x113   :  { %7994 = vst [vmem:[#allocation88_spill] sm:$0xff] %v5486_v48  ;;  %v5488_v26 = vadd.f32 %v761_v1, %v521_v57 }
 0x114   :  { %v765_v49 = vpop.f32.mrf.mxu1 }
 0x115   :  { %7995 = vst [vmem:[#allocation89_spill] sm:$0xff] %v5488_v26  ;;  %v5490_v55 = vadd.f32 %v765_v49, %v517_v32  ;;  %v412_v49 = vadd.f32 %v5379_v42, %v5386_v61 }
 0x116   :  { %v767_v51 = vpop.f32.mrf.mxu1 }
 0x117   :  { %7996 = vst [vmem:[#allocation90_spill] sm:$0xff] %v5490_v55  ;;  %v5492_v7 = vadd.f32 %v767_v51, %v521_v57 }
 0x118   :  { %v771_v34 = vpop.f32.mrf.mxu1 }
 0x119   :  { %7997 = vst [vmem:[#allocation91_spill] sm:$0xff] %v5492_v7  ;;  %v5494_v60 = vadd.f32 %v771_v34, %v517_v32 }
 0x11a   :  { %v773_v56 = vpop.f32.mrf.mxu1 }
 0x11b   :  { %7998 = vst [vmem:[#allocation92_spill] sm:$0xff] %v5494_v60  ;;  %v5498_v48 = vadd.f32 %v773_v56, %v521_v57 }
 0x11c   :  { %v949_v1 = vpop.f32.mrf.mxu1  ;;  %v4115_v32 = vpop.eup %4114 }
 0x11d   :  { %7999 = vst [vmem:[#allocation93_spill] sm:$0xff] %v5498_v48  ;;  %v956_v55 = vadd.f32 %v949_v1, %v410_v58  ;;  %v977_v60 = vmul.f32 0.0, %v4115_v32  ;;  %v8024_v58 = vmov 0.0   ;;  %v8025_v1 = vld [vmem:[#allocation33_spill] sm:$0xff]  ;;  %v8028_v32 = vld [vmem:[#allocation36_spill] sm:$0xff] }
 0x11e   :  { %v951_v51 = vpop.f32.mrf.mxu1  ;;  %v4117_v34 = vpop.eup %4116 }
 0x11f   :  { %4118 = vtanh.f32 %v956_v55  ;;  %v957_v7 = vadd.f32 %v951_v51, %v412_v49  ;;  %v8020_v55 = vld [vmem:[#allocation31_spill] sm:$0xff]  ;;  %v5572_v49 = vld [vmem:[%s7729_s4 + $0x1e8] sm:$0xff] }
 0x120   :  { %v8027_v51 = vld [vmem:[#allocation20_spill] sm:$0xff] }
 0x121   :  { %v3984_v44 = vmul.f32 -1.442695, %v957_v7  ;;  %v8021_v7 = vld [vmem:[#allocation19_spill] sm:$0xff] }
 0x123   :  { %4120 = vpow2.f32 %v3984_v44 }
 0x12c   :  { %v4119_v20 = vpop.eup %4118 }
 0x12d   :  { %v978_v26 = vmul.f32 %v4119_v20, %v4117_v34 }
 0x12f   :  { %v5502_v63 = vadd.f32 %v978_v26, %v977_v60  ;;  %v8018_v60 = vld [vmem:[#allocation30_spill] sm:$0xff] }
 0x130   :  { %v4121_v59 = vpop.eup %4120  ;;  %v8019_v26 = vld [vmem:[#allocation18_spill] sm:$0xff] }
 0x131   :  { %v974_v57 = vadd.f32 1.0, %v4121_v59  ;;  %4122 = vtanh.f32 %v5502_v63 }
 0x133   :  { %4124 = vrcp.f32 %v974_v57  ;;  %v8029_v57 = vld [vmem:[#allocation38_spill] sm:$0xff] }
 0x13e   :  { %v4123_v61 = vpop.eup %4122 }
 0x140   :  { %v4125_v42 = vpop.eup %4124 }
 0x141   :  { %v981_v56 = vmul.f32 %v4125_v42, %v4123_v61 }
 0x143   :  { %1051 = vmatmul.mubr.f32.vlgmr.msra.gmra.mxu0 %v981_v56  ;;  %1122 = vmatmul.mubr.f32.vlgmr.msra.gmra.mxu1 %v981_v56 }
 0x144   :  { %1161 = vmatpush1.msra.mxu0 %v4719_v23  ;;  %1232 = vmatpush1.msra.mxu1 %v5020_v2  ;;  %v8000_v23 = vld [vmem:[#allocation8_spill] sm:$0xff] }
 0x145   :  { %1162 = vmatprep.subr.mxu0 %v4724_v24  ;;  %1233 = vmatprep.subr.mxu1 %v5026_v3  ;;  %v8001_v24 = vld [vmem:[#allocation9_spill] sm:$0xff]  ;;  %8026 = vst [vmem:[#allocation8_spill] sm:$0xff] %v5572_v49 }
 0x146   :  { %1163 = vmatpush1.msra.mxu0 %v4733_v25  ;;  %1234 = vmatpush1.msra.mxu1 %v5034_v4  ;;  %v8002_v25 = vld [vmem:[#allocation22_spill] sm:$0xff] }
 0x147   :  { %1164 = vmatprep.subr.mxu0 %v4752_v28  ;;  %1235 = vmatprep.subr.mxu1 %v5042_v5  ;;  %v8003_v28 = vld [vmem:[#allocation10_spill] sm:$0xff] }
 0x148   :  { %1165 = vmatpush1.msra.mxu0 %v4758_v29  ;;  %1236 = vmatpush1.msra.mxu1 %v5048_v6  ;;  %v8004_v29 = vld [vmem:[#allocation23_spill] sm:$0xff] }
 0x149   :  { %1166 = vmatprep.subr.mxu0 %v4767_v30  ;;  %1237 = vmatprep.subr.mxu1 %v5055_v8  ;;  %v8005_v30 = vld [vmem:[#allocation11_spill] sm:$0xff] }
 0x14a   :  { %1167 = vmatpush1.msra.mxu0 %v4774_v31  ;;  %1238 = vmatpush1.msra.mxu1 %v5064_v9  ;;  %v8006_v31 = vld [vmem:[#allocation24_spill] sm:$0xff] }
 0x14b   :  { %1168 = vmatprep.subr.mxu0 %v4786_v33  ;;  %1239 = vmatprep.subr.mxu1 %v5071_v10  ;;  %v8007_v33 = vld [vmem:[#allocation12_spill] sm:$0xff] }
 0x14c   :  { %1169 = vmatpush1.msra.mxu0 %v4795_v35  ;;  %1240 = vmatpush1.msra.mxu1 %v5077_v11  ;;  %v8008_v35 = vld [vmem:[#allocation25_spill] sm:$0xff] }
 0x14d   :  { %1170 = vmatprep.subr.mxu0 %v4803_v36  ;;  %1241 = vmatprep.subr.mxu1 %v5084_v12  ;;  %v8009_v36 = vld [vmem:[#allocation13_spill] sm:$0xff] }
 0x14e   :  { %1171 = vmatpush1.msra.mxu0 %v4811_v37  ;;  %1242 = vmatpush1.msra.mxu1 %v5093_v13  ;;  %v8010_v37 = vld [vmem:[#allocation26_spill] sm:$0xff] }
 0x14f   :  { %1172 = vmatprep.subr.mxu0 %v4824_v39  ;;  %1243 = vmatprep.subr.mxu1 %v5100_v14  ;;  %v8011_v39 = vld [vmem:[#allocation14_spill] sm:$0xff] }
 0x150   :  { %1173 = vmatpush1.msra.mxu0 %v4831_v40  ;;  %1244 = vmatpush1.msra.mxu1 %v5106_v15  ;;  %v8012_v40 = vld [vmem:[#allocation27_spill] sm:$0xff] }
 0x151   :  { %1174 = vmatprep.subr.mxu0 %v4840_v41  ;;  %1245 = vmatprep.subr.mxu1 %v5113_v16  ;;  %v8013_v41 = vld [vmem:[#allocation15_spill] sm:$0xff] }
 0x152   :  { %1175 = vmatpush1.msra.mxu0 %v4850_v43  ;;  %1246 = vmatpush1.msra.mxu1 %v5122_v17  ;;  %v8014_v43 = vld [vmem:[#allocation28_spill] sm:$0xff] }
 0x153   :  { %1176 = vmatprep.subr.mxu0 %v4862_v45  ;;  %1247 = vmatprep.subr.mxu1 %v5129_v18  ;;  %v8015_v45 = vld [vmem:[#allocation16_spill] sm:$0xff] }
 0x154   :  { %1177 = vmatpush1.msra.mxu0 %v4868_v46  ;;  %1248 = vmatpush1.msra.mxu1 %v5135_v19  ;;  %v8016_v46 = vld [vmem:[#allocation29_spill] sm:$0xff] }
 0x155   :  { %1178 = vmatprep.subr.mxu0 %v8000_v23  ;;  %1249 = vmatprep.subr.mxu1 %v5142_v21 }
 0x156   :  { %1179 = vmatpush1.msra.mxu0 %v8001_v24  ;;  %1250 = vmatpush1.msra.mxu1 %v5151_v22  ;;  %v8030_v24 = vld [vmem:[#allocation56_spill] sm:$0xff] }
 0x157   :  { %1180 = vmatprep.subr.mxu0 %v4896_v50  ;;  %1251 = vmatprep.subr.mxu1 %v8002_v25  ;;  %v8017_v50 = vld [vmem:[#allocation17_spill] sm:$0xff] }
 0x158   :  { %1181 = vmatpush1.msra.mxu0 %v8003_v28  ;;  %1252 = vmatpush1.msra.mxu1 %v8004_v29 }
 0x159   :  { %1182 = vmatprep.subr.mxu0 %v8005_v30  ;;  %1253 = vmatprep.subr.mxu1 %v8006_v31  ;;  %v8031_v30 = vld [vmem:[#allocation54_spill] sm:$0xff] }
 0x15a   :  { %1183 = vmatpush1.msra.mxu0 %v8007_v33  ;;  %1254 = vmatpush1.msra.mxu1 %v8008_v35 }
 0x15b   :  { %1184 = vmatprep.subr.mxu0 %v8009_v36  ;;  %1255 = vmatprep.subr.mxu1 %v8010_v37 }
 0x15c   :  { %1185 = vmatpush1.msra.mxu0 %v8011_v39  ;;  %1256 = vmatpush1.msra.mxu1 %v8012_v40 }
 0x15d   :  { %1186 = vmatprep.subr.mxu0 %v8013_v41  ;;  %1257 = vmatprep.subr.mxu1 %v8014_v43 }
 0x15e   :  { %1187 = vmatpush1.msra.mxu0 %v8015_v45  ;;  %1258 = vmatpush1.msra.mxu1 %v8016_v46 }
 0x15f   :  { %1188 = vmatprep.subr.mxu0 %v8017_v50  ;;  %1259 = vmatprep.subr.mxu1 %v8018_v60 }
 0x160   :  { %1189 = vmatpush1.msra.mxu0 %v8019_v26  ;;  %1260 = vmatpush1.msra.mxu1 %v8020_v55 }
 0x161   :  { %1190 = vmatprep.subr.mxu0 %v8021_v7  ;;  %1261 = vmatprep.subr.mxu1 %v8022_v38 }
 0x162   :  { %1191 = vmatpush1.msra.mxu0 %v8023_v27  ;;  %1224 = vmatprep.mubr.f32.mxu0 %v8024_v58 }
 0x163   :  { %1262 = vmatpush1.msra.mxu1 %v8025_v1  ;;  %1295 = vmatprep.mubr.f32.mxu1 %v8024_v58 }
 0x164   :  { %1334 = vmatprep.subr.mxu0 %v5572_v49  ;;  %1405 = vmatprep.subr.mxu1 %v8027_v51 }
 0x203   :  { %v1052_v44 = vpop.f32.mrf.mxu0  ;;  %v1123_v42 = vpop.f32.mrf.mxu1 }
 0x204   :  { %v1128_v34 = vadd.f32 %v1052_v44, %v8028_v32  ;;  %v1130_v33 = vadd.f32 %v1123_v42, %v8031_v30  ;;  %v5734_v30 = vld [vmem:[%s7729_s4 + $0x88] sm:$0xff] }
 0x205   :  { %v1054_v20 = vpop.f32.mrf.mxu0  ;;  %v1125_v23 = vpop.f32.mrf.mxu1 }
 0x206   :  { %v3985_v59 = vmul.f32 -1.442695, %v1128_v34  ;;  %v1129_v61 = vadd.f32 %v1054_v20, %v8029_v57  ;;  %v1131_v28 = vadd.f32 %v1125_v23, %v8030_v24 }
 0x208   :  { %4126 = vpow2.f32 %v3985_v59  ;;  %v3986_v56 = vmul.f32 -1.442695, %v1129_v61  ;;  %v3987_v36 = vmul.f32 -1.442695, %v1131_v28  ;;  %v5727_v28 = vld [vmem:[%s7729_s4 + $0xa0] sm:$0xff] }
 0x20a   :  { %4128 = vpow2.f32 %v3986_v56 }
 0x20b   :  { %4130 = vtanh.f32 %v1130_v33  ;;  %v5741_v33 = vld [vmem:[%s7729_s4 + $0x80] sm:$0xff] }
 0x20c   :  { %4132 = vpow2.f32 %v3987_v36  ;;  %v5748_v36 = vld [vmem:[%s7729_s4 + $0x68] sm:$0xff] }
 0x20d   :  { %8032 = vst [vmem:[#allocation9_spill] sm:$0xff] %v5748_v36 }
 0x215   :  { %v4127_v48 = vpop.eup %4126 }
 0x216   :  { %v1135_v62 = vadd.f32 1.0, %v4127_v48 }
 0x217   :  { %v4129_v0 = vpop.eup %4128 }
 0x218   :  { %4134 = vrcp.f32 %v1135_v62  ;;  %v1141_v44 = vadd.f32 1.0, %v4129_v0  ;;  %v4131_v32 = vpop.eup %4130  ;;  %v5587_v0 = vld [vmem:[%s7729_s4 + $0x1e0] sm:$0xff]  ;;  %v5594_v62 = vld [vmem:[%s7729_s4 + $0x1c8] sm:$0xff] }
 0x219   :  { %v4133_v34 = vpop.eup %4132 }
 0x21a   :  { %4136 = vrcp.f32 %v1141_v44  ;;  %v1148_v61 = vadd.f32 1.0, %v4133_v34 }
 0x21c   :  { %4138 = vrcp.f32 %v1148_v61 }
 0x225   :  { %v4135_v20 = vpop.eup %4134 }
 0x226   :  { %v1152_v59 = vmul.f32 %v4135_v20, %v4131_v32  ;;  %v8035_v20 = vld [vmem:[#allocation60_spill] sm:$0xff] }
 0x227   :  { %v4137_v57 = vpop.eup %4136 }
 0x228   :  { %v1151_v56 = vmul.f32 %v4137_v57, %v5502_v63  ;;  %v5601_v63 = vld [vmem:[%s7729_s4 + $0x1c0] sm:$0xff]  ;;  %v8036_v57 = vld [vmem:[#allocation58_spill] sm:$0xff] }
 0x229   :  { %v4139_v48 = vpop.eup %4138 }
 0x22a   :  { %v5581_v23 = vadd.f32 %v1152_v59, %v1151_v56 }
 0x22c   :  { %4140 = vtanh.f32 %v5581_v23 }
 0x239   :  { %v4141_v42 = vpop.eup %4140 }
 0x23a   :  { %v1155_v24 = vmul.f32 %v4141_v42, %v4139_v48 }
 0x23c   :  { %1225 = vmatmul.mubr.f32.vlgmr.msra.gmra.mxu0 %v1155_v24  ;;  %1296 = vmatmul.mubr.f32.vlgmr.msra.gmra.mxu1 %v1155_v24 }
 0x23d   :  { %1335 = vmatpush1.msra.mxu0 %v5587_v0  ;;  %1406 = vmatpush1.msra.mxu1 %v5020_v2  ;;  %v5608_v2 = vld [vmem:[%s7729_s4 + $0x1a8] sm:$0xff] }
 0x23e   :  { %1336 = vmatprep.subr.mxu0 %v5594_v62  ;;  %1407 = vmatprep.subr.mxu1 %v5026_v3  ;;  %v5615_v3 = vld [vmem:[%s7729_s4 + $0x1a0] sm:$0xff] }
 0x23f   :  { %1337 = vmatpush1.msra.mxu0 %v5601_v63  ;;  %1408 = vmatpush1.msra.mxu1 %v5034_v4  ;;  %v5622_v4 = vld [vmem:[%s7729_s4 + $0x188] sm:$0xff] }
 0x240   :  { %1338 = vmatprep.subr.mxu0 %v5608_v2  ;;  %1409 = vmatprep.subr.mxu1 %v5042_v5  ;;  %v5629_v5 = vld [vmem:[%s7729_s4 + $0x180] sm:$0xff] }
 0x241   :  { %1339 = vmatpush1.msra.mxu0 %v5615_v3  ;;  %1410 = vmatpush1.msra.mxu1 %v5048_v6  ;;  %v5636_v6 = vld [vmem:[%s7729_s4 + $0x168] sm:$0xff] }
 0x242   :  { %1340 = vmatprep.subr.mxu0 %v5622_v4  ;;  %1411 = vmatprep.subr.mxu1 %v5055_v8  ;;  %v5643_v8 = vld [vmem:[%s7729_s4 + $0x160] sm:$0xff] }
 0x243   :  { %1341 = vmatpush1.msra.mxu0 %v5629_v5  ;;  %1412 = vmatpush1.msra.mxu1 %v5064_v9  ;;  %v5650_v9 = vld [vmem:[%s7729_s4 + $0x148] sm:$0xff] }
 0x244   :  { %1342 = vmatprep.subr.mxu0 %v5636_v6  ;;  %1413 = vmatprep.subr.mxu1 %v5071_v10  ;;  %v5657_v10 = vld [vmem:[%s7729_s4 + $0x140] sm:$0xff] }
 0x245   :  { %1343 = vmatpush1.msra.mxu0 %v5643_v8  ;;  %1414 = vmatpush1.msra.mxu1 %v5077_v11  ;;  %v5664_v11 = vld [vmem:[%s7729_s4 + $0x128] sm:$0xff] }
 0x246   :  { %1344 = vmatprep.subr.mxu0 %v5650_v9  ;;  %1415 = vmatprep.subr.mxu1 %v5084_v12  ;;  %v5671_v12 = vld [vmem:[%s7729_s4 + $0x120] sm:$0xff] }
 0x247   :  { %1345 = vmatpush1.msra.mxu0 %v5657_v10  ;;  %1416 = vmatpush1.msra.mxu1 %v5093_v13  ;;  %v5678_v13 = vld [vmem:[%s7729_s4 + $0x108] sm:$0xff] }
 0x248   :  { %1346 = vmatprep.subr.mxu0 %v5664_v11  ;;  %1417 = vmatprep.subr.mxu1 %v5100_v14  ;;  %v5685_v14 = vld [vmem:[%s7729_s4 + $0x100] sm:$0xff] }
 0x249   :  { %1347 = vmatpush1.msra.mxu0 %v5671_v12  ;;  %1418 = vmatpush1.msra.mxu1 %v5106_v15  ;;  %v5692_v15 = vld [vmem:[%s7729_s4 + $0xe8] sm:$0xff] }
 0x24a   :  { %1348 = vmatprep.subr.mxu0 %v5678_v13  ;;  %1419 = vmatprep.subr.mxu1 %v5113_v16  ;;  %v5699_v16 = vld [vmem:[%s7729_s4 + $0xe0] sm:$0xff] }
 0x24b   :  { %1349 = vmatpush1.msra.mxu0 %v5685_v14  ;;  %1420 = vmatpush1.msra.mxu1 %v5122_v17  ;;  %v5706_v17 = vld [vmem:[%s7729_s4 + $0xc8] sm:$0xff] }
 0x24c   :  { %1350 = vmatprep.subr.mxu0 %v5692_v15  ;;  %1421 = vmatprep.subr.mxu1 %v5129_v18  ;;  %v5713_v18 = vld [vmem:[%s7729_s4 + $0xc0] sm:$0xff] }
 0x24d   :  { %1351 = vmatpush1.msra.mxu0 %v5699_v16  ;;  %1422 = vmatpush1.msra.mxu1 %v5135_v19  ;;  %v5720_v19 = vld [vmem:[%s7729_s4 + $0xa8] sm:$0xff] }
 0x24e   :  { %1352 = vmatprep.subr.mxu0 %v5706_v17  ;;  %1423 = vmatprep.subr.mxu1 %v5142_v21 }
 0x24f   :  { %1353 = vmatpush1.msra.mxu0 %v5713_v18  ;;  %1424 = vmatpush1.msra.mxu1 %v5151_v22 }
 0x250   :  { %1354 = vmatprep.subr.mxu0 %v5720_v19  ;;  %1425 = vmatprep.subr.mxu1 %v8002_v25 }
 0x251   :  { %1355 = vmatpush1.msra.mxu0 %v5727_v28  ;;  %1426 = vmatpush1.msra.mxu1 %v8004_v29 }
 0x252   :  { %1356 = vmatprep.subr.mxu0 %v5734_v30  ;;  %1427 = vmatprep.subr.mxu1 %v8006_v31 }
 0x253   :  { %1357 = vmatpush1.msra.mxu0 %v5741_v33  ;;  %1428 = vmatpush1.msra.mxu1 %v8008_v35 }
 0x254   :  { %1358 = vmatprep.subr.mxu0 %v5748_v36  ;;  %1429 = vmatprep.subr.mxu1 %v8010_v37 }
 0x255   :  { %1359 = vmatpush1.msra.mxu0 %v8011_v39  ;;  %1430 = vmatpush1.msra.mxu1 %v8012_v40 }
 0x256   :  { %1360 = vmatprep.subr.mxu0 %v8013_v41  ;;  %1431 = vmatprep.subr.mxu1 %v8014_v43  ;;  %v8033_v41 = vld [vmem:[#allocation40_spill] sm:$0xff] }
 0x257   :  { %1361 = vmatpush1.msra.mxu0 %v8015_v45  ;;  %1432 = vmatpush1.msra.mxu1 %v8016_v46 }
 0x258   :  { %1362 = vmatprep.subr.mxu0 %v8017_v50  ;;  %1433 = vmatprep.subr.mxu1 %v8018_v60 }
 0x259   :  { %1363 = vmatpush1.msra.mxu0 %v8019_v26  ;;  %1434 = vmatpush1.msra.mxu1 %v8020_v55 }
 0x25a   :  { %1364 = vmatprep.subr.mxu0 %v8021_v7  ;;  %1435 = vmatprep.subr.mxu1 %v8022_v38  ;;  %v8034_v7 = vld [vmem:[#allocation42_spill] sm:$0xff] }
 0x25b   :  { %1365 = vmatpush1.msra.mxu0 %v8023_v27  ;;  %1398 = vmatprep.mubr.f32.mxu0 %v8024_v58 }
 0x25c   :  { %1436 = vmatpush1.msra.mxu1 %v8025_v1  ;;  %1469 = vmatprep.mubr.f32.mxu1 %v8024_v58 }
 0x25d   :  { %1508 = vmatprep.subr.mxu0 %v5572_v49  ;;  %1579 = vmatprep.subr.mxu1 %v8027_v51 }
 0x2fc   :  { %v1226_v39 = vpop.f32.mrf.mxu0  ;;  %v1297_v32 = vpop.f32.mrf.mxu1 }
 0x2fd   :  { %v1302_v45 = vadd.f32 %v1226_v39, %v8033_v41  ;;  %v1304_v61 = vadd.f32 %v1297_v32, %v8036_v57  ;;  %v5796_v57 = vld [vmem:[%s7729_s4 + $0x1d0] sm:$0xff] }
 0x2fe   :  { %v1228_v50 = vpop.f32.mrf.mxu0  ;;  %v1299_v34 = vpop.f32.mrf.mxu1 }
 0x2ff   :  { %v3988_v26 = vmul.f32 -1.442695, %v1302_v45  ;;  %v1303_v44 = vadd.f32 %v1228_v50, %v8034_v7  ;;  %v1305_v59 = vadd.f32 %v1299_v34, %v8035_v20 }
 0x301   :  { %4142 = vpow2.f32 %v3988_v26  ;;  %v3989_v27 = vmul.f32 -1.442695, %v1303_v44  ;;  %v3990_v56 = vmul.f32 -1.442695, %v1305_v59  ;;  %v5782_v59 = vld [vmem:[%s7729_s4 + $0x1f0] sm:$0xff] }
 0x303   :  { %4144 = vpow2.f32 %v3989_v27 }
 0x304   :  { %4146 = vtanh.f32 %v1304_v61  ;;  %v5803_v61 = vld [vmem:[%s7729_s4 + $0x1b8] sm:$0xff] }
 0x305   :  { %4148 = vpow2.f32 %v3990_v56  ;;  %v5810_v56 = vld [vmem:[%s7729_s4 + $0x1b0] sm:$0xff] }
 0x30e   :  { %v4143_v48 = vpop.eup %4142 }
 0x30f   :  { %v1309_v42 = vadd.f32 1.0, %v4143_v48  ;;  %v5817_v48 = vld [vmem:[%s7729_s4 + $0x198] sm:$0xff] }
 0x310   :  { %v4145_v51 = vpop.eup %4144 }
 0x311   :  { %4150 = vrcp.f32 %v1309_v42  ;;  %v1315_v24 = vadd.f32 1.0, %v4145_v51  ;;  %v4147_v39 = vpop.eup %4146  ;;  %v5824_v42 = vld [vmem:[%s7729_s4 + $0x190] sm:$0xff]  ;;  %v5831_v51 = vld [vmem:[%s7729_s4 + $0x178] sm:$0xff] }
 0x312   :  { %v4149_v41 = vpop.eup %4148 }
 0x313   :  { %4152 = vrcp.f32 %v1315_v24  ;;  %v1322_v7 = vadd.f32 1.0, %v4149_v41  ;;  %v5838_v24 = vld [vmem:[%s7729_s4 + $0x170] sm:$0xff] }
 0x314   :  { %v5852_v41 = vld [vmem:[%s7729_s4 + $0x150] sm:$0xff] }
 0x315   :  { %4154 = vrcp.f32 %v1322_v7  ;;  %v5880_v7 = vld [vmem:[%s7729_s4 + $0x110] sm:$0xff] }
 0x31e   :  { %v4151_v45 = vpop.eup %4150 }
 0x31f   :  { %v1326_v50 = vmul.f32 %v4151_v45, %v4147_v39  ;;  %v5845_v39 = vld [vmem:[%s7729_s4 + $0x158] sm:$0xff] }
 0x320   :  { %v4153_v26 = vpop.eup %4152  ;;  %v5859_v45 = vld [vmem:[%s7729_s4 + $0x138] sm:$0xff] }
 0x321   :  { %v1325_v44 = vmul.f32 %v4153_v26, %v5581_v23  ;;  %v5789_v23 = vld [vmem:[%s7729_s4 + $0x1d8] sm:$0xff] }
 0x322   :  { %v4155_v32 = vpop.eup %4154  ;;  %v5873_v26 = vld [vmem:[%s7729_s4 + $0x118] sm:$0xff] }
 0x323   :  { %v5775_v27 = vadd.f32 %v1326_v50, %v1325_v44  ;;  %v5866_v50 = vld [vmem:[%s7729_s4 + $0x130] sm:$0xff]  ;;  %v5887_v44 = vld [vmem:[%s7729_s4 + $0xf8] sm:$0xff] }
 0x325   :  { %4156 = vtanh.f32 %v5775_v27 }
 0x332   :  { %v4157_v34 = vpop.eup %4156 }
 0x333   :  { %v1329_v20 = vmul.f32 %v4157_v34, %v4155_v32  ;;  %v5894_v32 = vld [vmem:[%s7729_s4 + $0xf0] sm:$0xff]  ;;  %v8046_v34 = vld [vmem:[#allocation35_spill] sm:$0xff] }
 0x335   :  { %1399 = vmatmul.mubr.f32.vlgmr.msra.gmra.mxu0 %v1329_v20  ;;  %1470 = vmatmul.mubr.f32.vlgmr.msra.gmra.mxu1 %v1329_v20 }
 0x336   :  { %1509 = vmatpush1.msra.mxu0 %v5587_v0  ;;  %1580 = vmatpush1.msra.mxu1 %v5782_v59 }
 0x337   :  { %1510 = vmatprep.subr.mxu0 %v5594_v62  ;;  %1581 = vmatprep.subr.mxu1 %v5789_v23 }
 0x338   :  { %1511 = vmatpush1.msra.mxu0 %v5601_v63  ;;  %1582 = vmatpush1.msra.mxu1 %v5796_v57 }
 0x339   :  { %1512 = vmatprep.subr.mxu0 %v5608_v2  ;;  %1583 = vmatprep.subr.mxu1 %v5803_v61 }
 0x33a   :  { %1513 = vmatpush1.msra.mxu0 %v5615_v3  ;;  %1584 = vmatpush1.msra.mxu1 %v5810_v56 }
 0x33b   :  { %1514 = vmatprep.subr.mxu0 %v5622_v4  ;;  %1585 = vmatprep.subr.mxu1 %v5817_v48 }
 0x33c   :  { %1515 = vmatpush1.msra.mxu0 %v5629_v5  ;;  %1586 = vmatpush1.msra.mxu1 %v5824_v42 }
 0x33d   :  { %1516 = vmatprep.subr.mxu0 %v5636_v6  ;;  %1587 = vmatprep.subr.mxu1 %v5831_v51 }
 0x33e   :  { %1517 = vmatpush1.msra.mxu0 %v5643_v8  ;;  %1588 = vmatpush1.msra.mxu1 %v5838_v24 }
 0x33f   :  { %1518 = vmatprep.subr.mxu0 %v5650_v9  ;;  %1589 = vmatprep.subr.mxu1 %v5845_v39 }
 0x340   :  { %1519 = vmatpush1.msra.mxu0 %v5657_v10  ;;  %1590 = vmatpush1.msra.mxu1 %v5852_v41 }
 0x341   :  { %1520 = vmatprep.subr.mxu0 %v5664_v11  ;;  %1591 = vmatprep.subr.mxu1 %v5859_v45 }
 0x342   :  { %1521 = vmatpush1.msra.mxu0 %v5671_v12  ;;  %1592 = vmatpush1.msra.mxu1 %v5866_v50 }
 0x343   :  { %1522 = vmatprep.subr.mxu0 %v5678_v13  ;;  %1593 = vmatprep.subr.mxu1 %v5873_v26 }
 0x344   :  { %1523 = vmatpush1.msra.mxu0 %v5685_v14  ;;  %1594 = vmatpush1.msra.mxu1 %v5880_v7 }
 0x345   :  { %1524 = vmatprep.subr.mxu0 %v5692_v15  ;;  %1595 = vmatprep.subr.mxu1 %v5887_v44 }
 0x346   :  { %1525 = vmatpush1.msra.mxu0 %v5699_v16  ;;  %1596 = vmatpush1.msra.mxu1 %v5894_v32 }
 0x347   :  { %1526 = vmatprep.subr.mxu0 %v5706_v17  ;;  %1597 = vmatprep.subr.mxu1 %v5142_v21  ;;  %v5914_v21 = vld [vmem:[%s7729_s4 + $0x60] sm:$0xff] }
 0x348   :  { %1527 = vmatpush1.msra.mxu0 %v5713_v18  ;;  %1598 = vmatpush1.msra.mxu1 %v5151_v22  ;;  %8037 = vst [vmem:[#allocation22_spill] sm:$0xff] %v5914_v21  ;;  %v5921_v22 = vld [vmem:[%s7729_s4 + $0x48] sm:$0xff] }
 0x349   :  { %1528 = vmatprep.subr.mxu0 %v5720_v19  ;;  %1599 = vmatprep.subr.mxu1 %v8002_v25  ;;  %8038 = vst [vmem:[#allocation10_spill] sm:$0xff] %v5921_v22  ;;  %v5928_v25 = vld [vmem:[%s7729_s4 + $0x40] sm:$0xff] }
 0x34a   :  { %1529 = vmatpush1.msra.mxu0 %v5727_v28  ;;  %1600 = vmatpush1.msra.mxu1 %v8004_v29  ;;  %8039 = vst [vmem:[#allocation23_spill] sm:$0xff] %v5928_v25  ;;  %v5935_v29 = vld [vmem:[%s7729_s4 + $0x28] sm:$0xff] }
 0x34b   :  { %1530 = vmatprep.subr.mxu0 %v5734_v30  ;;  %1601 = vmatprep.subr.mxu1 %v8006_v31  ;;  %8040 = vst [vmem:[#allocation11_spill] sm:$0xff] %v5935_v29  ;;  %v5942_v31 = vld [vmem:[%s7729_s4 + $0x20] sm:$0xff] }
 0x34c   :  { %1531 = vmatpush1.msra.mxu0 %v5741_v33  ;;  %1602 = vmatpush1.msra.mxu1 %v8008_v35  ;;  %8041 = vst [vmem:[#allocation24_spill] sm:$0xff] %v5942_v31  ;;  %v5949_v35 = vld [vmem:[%s7729_s4 + $0x8] sm:$0xff] }
 0x34d   :  { %1532 = vmatprep.subr.mxu0 %v5748_v36  ;;  %1603 = vmatprep.subr.mxu1 %v8010_v37  ;;  %8042 = vst [vmem:[#allocation12_spill] sm:$0xff] %v5949_v35  ;;  %v5956_v37 = vld [vmem:[%s7729_s4] sm:$0xff] }
 0x34e   :  { %1533 = vmatpush1.msra.mxu0 %v5914_v21  ;;  %1604 = vmatpush1.msra.mxu1 %v8012_v40  ;;  %8043 = vst [vmem:[#allocation25_spill] sm:$0xff] %v5956_v37  ;;  %v5966_v40 = vld [vmem:[%s7729_s4 + $0x1f8] sm:$0xff] }
 0x34f   :  { %1534 = vmatprep.subr.mxu0 %v5921_v22  ;;  %1605 = vmatprep.subr.mxu1 %v8014_v43  ;;  %8044 = vst [vmem:[#allocation13_spill] sm:$0xff] %v5966_v40 }
 0x350   :  { %1535 = vmatpush1.msra.mxu0 %v5928_v25  ;;  %1606 = vmatpush1.msra.mxu1 %v8016_v46  ;;  %v8045_v46 = vld [vmem:[#allocation34_spill] sm:$0xff] }
 0x351   :  { %1536 = vmatprep.subr.mxu0 %v5935_v29  ;;  %1607 = vmatprep.subr.mxu1 %v8018_v60 }
 0x352   :  { %1537 = vmatpush1.msra.mxu0 %v5942_v31  ;;  %1608 = vmatpush1.msra.mxu1 %v8020_v55 }
 0x353   :  { %1538 = vmatprep.subr.mxu0 %v5949_v35  ;;  %1609 = vmatprep.subr.mxu1 %v8022_v38 }
 0x354   :  { %1539 = vmatpush1.msra.mxu0 %v5956_v37  ;;  %1572 = vmatprep.mubr.f32.mxu0 %v8024_v58 }
 0x355   :  { %1610 = vmatpush1.msra.mxu1 %v8025_v1  ;;  %1643 = vmatprep.mubr.f32.mxu1 %v8024_v58 }
 0x356   :  { %1682 = vmatprep.subr.mxu0 %v5572_v49  ;;  %1753 = vmatprep.subr.mxu1 %v5966_v40  ;;  %v8048_v49 = vld [vmem:[#allocation62_spill] sm:$0xff] }
 0x3f5   :  { %v1400_v43 = vpop.f32.mrf.mxu0  ;;  %v1471_v1 = vpop.f32.mrf.mxu1 }
 0x3f6   :  { %v1476_v60 = vadd.f32 %v1400_v43, %v8045_v46  ;;  %v1478_v58 = vadd.f32 %v1471_v1, %v8048_v49  ;;  %v6015_v49 = vld [vmem:[%s7729_s4 + $0xd8] sm:$0xff] }
 0x3f7   :  { %v1402_v55 = vpop.f32.mrf.mxu0  ;;  %v1473_v53 = vpop.f32.mrf.mxu1  ;;  %v6057_v1 = vld [vmem:[%s7729_s4 + $0x78] sm:$0xff] }
 0x3f8   :  { %v3991_v38 = vmul.f32 -1.442695, %v1476_v60  ;;  %v1477_v20 = vadd.f32 %v1402_v55, %v8046_v34  ;;  %v1479_v52 = vadd.f32 %v1473_v53, %v8047_v47  ;;  %8050 = vst [vmem:[#allocation14_spill] sm:$0xff] %v6057_v1 }
 0x3fa   :  { %4158 = vpow2.f32 %v3991_v38  ;;  %v3992_v54 = vmul.f32 -1.442695, %v1477_v20  ;;  %v3993_v37 = vmul.f32 -1.442695, %v1479_v52 }
 0x3fc   :  { %4160 = vpow2.f32 %v3992_v54 }
 0x3fd   :  { %4162 = vtanh.f32 %v1478_v58 }
 0x3fe   :  { %4164 = vpow2.f32 %v3993_v37  ;;  %v6043_v37 = vld [vmem:[%s7729_s4 + $0x98] sm:$0xff] }
 0x407   :  { %v4159_v35 = vpop.eup %4158 }
 0x408   :  { %v1483_v31 = vadd.f32 1.0, %v4159_v35  ;;  %v6036_v35 = vld [vmem:[%s7729_s4 + $0xb0] sm:$0xff] }
 0x409   :  { %v4161_v40 = vpop.eup %4160 }
 0x40a   :  { %4166 = vrcp.f32 %v1483_v31  ;;  %v1489_v43 = vadd.f32 1.0, %v4161_v40  ;;  %v4163_v46 = vpop.eup %4162  ;;  %v6029_v31 = vld [vmem:[%s7729_s4 + $0xb8] sm:$0xff]  ;;  %v6050_v40 = vld [vmem:[%s7729_s4 + $0x90] sm:$0xff] }
 0x40b   :  { %v4165_v60 = vpop.eup %4164  ;;  %8049 = vst [vmem:[#allocation26_spill] sm:$0xff] %v6050_v40 }
 0x40c   :  { %4168 = vrcp.f32 %v1489_v43  ;;  %v1496_v54 = vadd.f32 1.0, %v4165_v60  ;;  %v6064_v43 = vld [vmem:[%s7729_s4 + $0x70] sm:$0xff] }
 0x40d   :  { %8051 = vst [vmem:[#allocation27_spill] sm:$0xff] %v6064_v43  ;;  %v6078_v60 = vld [vmem:[%s7729_s4 + $0x50] sm:$0xff] }
 0x40e   :  { %4170 = vrcp.f32 %v1496_v54  ;;  %8053 = vst [vmem:[#allocation28_spill] sm:$0xff] %v6078_v60  ;;  %v8057_v54 = vld [vmem:[#allocation12_spill] sm:$0xff] }
 0x417   :  { %v4167_v55 = vpop.eup %4166 }
 0x418   :  { %v1500_v38 = vmul.f32 %v4167_v55, %v4163_v46  ;;  %v6071_v46 = vld [vmem:[%s7729_s4 + $0x58] sm:$0xff] }
 0x419   :  { %v4169_v34 = vpop.eup %4168  ;;  %8052 = vst [vmem:[#allocation15_spill] sm:$0xff] %v6071_v46  ;;  %v6085_v55 = vld [vmem:[%s7729_s4 + $0x38] sm:$0xff] }
 0x41a   :  { %v1499_v20 = vmul.f32 %v4169_v34, %v5775_v27  ;;  %v6022_v27 = vld [vmem:[%s7729_s4 + $0xd0] sm:$0xff]  ;;  %8054 = vst [vmem:[#allocation16_spill] sm:$0xff] %v6085_v55 }
 0x41b   :  { %v4171_v52 = vpop.eup %4170  ;;  %v6092_v34 = vld [vmem:[%s7729_s4 + $0x30] sm:$0xff] }
 0x41c   :  { %v5974_v53 = vadd.f32 %v1500_v38, %v1499_v20  ;;  %v8055_v38 = vld [vmem:[#allocation24_spill] sm:$0xff]  ;;  %8056 = vst [vmem:[#allocation29_spill] sm:$0xff] %v6092_v34  ;;  %v6099_v20 = vld [vmem:[%s7729_s4 + $0x18] sm:$0xff] }
 0x41d   :  { %8058 = vst [vmem:[#allocation17_spill] sm:$0xff] %v6099_v20 }
 0x41e   :  { %4172 = vtanh.f32 %v5974_v53 }
 0x42b   :  { %v4173_v47 = vpop.eup %4172 }
 0x42c   :  { %v1503_v58 = vmul.f32 %v4173_v47, %v4171_v52  ;;  %v8059_v52 = vld [vmem:[#allocation25_spill] sm:$0xff]  ;;  %v8060_v47 = vmov 0.0  }
 0x42e   :  { %1573 = vmatmul.mubr.f32.vlgmr.msra.gmra.mxu0 %v1503_v58  ;;  %1644 = vmatmul.mubr.f32.vlgmr.msra.gmra.mxu1 %v1503_v58  ;;  %v6107_v58 = vld [vmem:[%s7729_s4 + $0x10] sm:$0xff] }
 0x42f   :  { %1683 = vmatpush1.msra.mxu0 %v5587_v0  ;;  %1754 = vmatpush1.msra.mxu1 %v5782_v59  ;;  %8061 = vst [vmem:[#allocation30_spill] sm:$0xff] %v6107_v58 }
 0x430   :  { %1684 = vmatprep.subr.mxu0 %v5594_v62  ;;  %1755 = vmatprep.subr.mxu1 %v5789_v23 }
 0x431   :  { %1685 = vmatpush1.msra.mxu0 %v5601_v63  ;;  %1756 = vmatpush1.msra.mxu1 %v5796_v57 }
 0x432   :  { %1686 = vmatprep.subr.mxu0 %v5608_v2  ;;  %1757 = vmatprep.subr.mxu1 %v5803_v61 }
 0x433   :  { %1687 = vmatpush1.msra.mxu0 %v5615_v3  ;;  %1758 = vmatpush1.msra.mxu1 %v5810_v56 }
 0x434   :  { %1688 = vmatprep.subr.mxu0 %v5622_v4  ;;  %1759 = vmatprep.subr.mxu1 %v5817_v48 }
 0x435   :  { %1689 = vmatpush1.msra.mxu0 %v5629_v5  ;;  %1760 = vmatpush1.msra.mxu1 %v5824_v42 }
 0x436   :  { %1690 = vmatprep.subr.mxu0 %v5636_v6  ;;  %1761 = vmatprep.subr.mxu1 %v5831_v51 }
 0x437   :  { %1691 = vmatpush1.msra.mxu0 %v5643_v8  ;;  %1762 = vmatpush1.msra.mxu1 %v5838_v24 }
 0x438   :  { %1692 = vmatprep.subr.mxu0 %v5650_v9  ;;  %1763 = vmatprep.subr.mxu1 %v5845_v39 }
 0x439   :  { %1693 = vmatpush1.msra.mxu0 %v5657_v10  ;;  %1764 = vmatpush1.msra.mxu1 %v5852_v41 }
 0x43a   :  { %1694 = vmatprep.subr.mxu0 %v5664_v11  ;;  %1765 = vmatprep.subr.mxu1 %v5859_v45 }
 0x43b   :  { %1695 = vmatpush1.msra.mxu0 %v5671_v12  ;;  %1766 = vmatpush1.msra.mxu1 %v5866_v50 }
 0x43c   :  { %1696 = vmatprep.subr.mxu0 %v5678_v13  ;;  %1767 = vmatprep.subr.mxu1 %v5873_v26 }
 0x43d   :  { %1697 = vmatpush1.msra.mxu0 %v5685_v14  ;;  %1768 = vmatpush1.msra.mxu1 %v5880_v7 }
 0x43e   :  { %1698 = vmatprep.subr.mxu0 %v5692_v15  ;;  %1769 = vmatprep.subr.mxu1 %v5887_v44 }
 0x43f   :  { %1699 = vmatpush1.msra.mxu0 %v5699_v16  ;;  %1770 = vmatpush1.msra.mxu1 %v5894_v32 }
 0x440   :  { %1700 = vmatprep.subr.mxu0 %v5706_v17  ;;  %1771 = vmatprep.subr.mxu1 %v6015_v49 }
 0x441   :  { %1701 = vmatpush1.msra.mxu0 %v5713_v18  ;;  %1772 = vmatpush1.msra.mxu1 %v6022_v27 }
 0x442   :  { %1702 = vmatprep.subr.mxu0 %v5720_v19  ;;  %1773 = vmatprep.subr.mxu1 %v6029_v31 }
 0x443   :  { %1703 = vmatpush1.msra.mxu0 %v5727_v28  ;;  %1774 = vmatpush1.msra.mxu1 %v6036_v35 }
 0x444   :  { %1704 = vmatprep.subr.mxu0 %v5734_v30  ;;  %1775 = vmatprep.subr.mxu1 %v6043_v37 }
 0x445   :  { %1705 = vmatpush1.msra.mxu0 %v5741_v33  ;;  %1776 = vmatpush1.msra.mxu1 %v6050_v40 }
 0x446   :  { %1706 = vmatprep.subr.mxu0 %v5748_v36  ;;  %1777 = vmatprep.subr.mxu1 %v6057_v1  ;;  %v8067_v1 = vld [vmem:[#allocation66_spill] sm:$0xff] }
 0x447   :  { %1707 = vmatpush1.msra.mxu0 %v5914_v21  ;;  %1778 = vmatpush1.msra.mxu1 %v6064_v43  ;;  %v8066_v21 = vld [vmem:[#allocation68_spill] sm:$0xff] }
 0x448   :  { %1708 = vmatprep.subr.mxu0 %v5921_v22  ;;  %1779 = vmatprep.subr.mxu1 %v6071_v46 }
 0x449   :  { %1709 = vmatpush1.msra.mxu0 %v5928_v25  ;;  %1780 = vmatpush1.msra.mxu1 %v6078_v60  ;;  %v8065_v60 = vld [vmem:[#allocation39_spill] sm:$0xff] }
 0x44a   :  { %1710 = vmatprep.subr.mxu0 %v5935_v29  ;;  %1781 = vmatprep.subr.mxu1 %v6085_v55  ;;  %v8064_v55 = vld [vmem:[#allocation37_spill] sm:$0xff] }
 0x44b   :  { %1711 = vmatpush1.msra.mxu0 %v8055_v38  ;;  %1782 = vmatpush1.msra.mxu1 %v6092_v34  ;;  %v8063_v34 = vld [vmem:[#allocation13_spill] sm:$0xff] }
 0x44c   :  { %1712 = vmatprep.subr.mxu0 %v8057_v54  ;;  %1783 = vmatprep.subr.mxu1 %v6099_v20  ;;  %v8062_v54 = vld [vmem:[#allocation8_spill] sm:$0xff] }
 0x44d   :  { %1713 = vmatpush1.msra.mxu0 %v8059_v52  ;;  %1746 = vmatprep.mubr.f32.mxu0 %v8060_v47 }
 0x44e   :  { %1784 = vmatpush1.msra.mxu1 %v6107_v58  ;;  %1817 = vmatprep.mubr.f32.mxu1 %v8060_v47 }
 0x44f   :  { %1856 = vmatprep.subr.mxu0 %v8062_v54  ;;  %1927 = vmatprep.subr.mxu1 %v8063_v34 }
 0x4ee   :  { %v1574_v38 = vpop.f32.mrf.mxu0  ;;  %v1645_v46 = vpop.f32.mrf.mxu1 }
 0x4ef   :  { %v1650_v20 = vadd.f32 %v1574_v38, %v8064_v55  ;;  %v1652_v47 = vadd.f32 %v1645_v46, %v8067_v1 }
 0x4f0   :  { %v1576_v29 = vpop.f32.mrf.mxu0  ;;  %v1647_v43 = vpop.f32.mrf.mxu1 }
 0x4f1   :  { %v3994_v52 = vmul.f32 -1.442695, %v1650_v20  ;;  %v1651_v25 = vadd.f32 %v1576_v29, %v8065_v60  ;;  %v1653_v58 = vadd.f32 %v1647_v43, %v8066_v21 }
 0x4f3   :  { %4174 = vpow2.f32 %v3994_v52  ;;  %v3995_v22 = vmul.f32 -1.442695, %v1651_v25  ;;  %v3996_v36 = vmul.f32 -1.442695, %v1653_v58  ;;  %v8074_v58 = vld [vmem:[#allocation15_spill] sm:$0xff] }
 0x4f5   :  { %4176 = vpow2.f32 %v3995_v22 }
 0x4f6   :  { %4178 = vtanh.f32 %v1652_v47  ;;  %v8073_v47 = vld [vmem:[#allocation10_spill] sm:$0xff] }
 0x4f7   :  { %4180 = vpow2.f32 %v3996_v36  ;;  %v8068_v36 = vld [vmem:[#allocation26_spill] sm:$0xff] }
 0x500   :  { %v4175_v54 = vpop.eup %4174 }
 0x501   :  { %v1657_v40 = vadd.f32 1.0, %v4175_v54  ;;  %v8072_v54 = vld [vmem:[#allocation27_spill] sm:$0xff] }
 0x502   :  { %v4177_v34 = vpop.eup %4176 }
 0x503   :  { %4182 = vrcp.f32 %v1657_v40  ;;  %v1663_v55 = vadd.f32 1.0, %v4177_v34  ;;  %v4179_v38 = vpop.eup %4178  ;;  %v8070_v40 = vld [vmem:[#allocation14_spill] sm:$0xff] }
 0x504   :  { %v4181_v29 = vpop.eup %4180  ;;  %v8071_v34 = vld [vmem:[#allocation22_spill] sm:$0xff] }
 0x505   :  { %4184 = vrcp.f32 %v1663_v55  ;;  %v1670_v22 = vadd.f32 1.0, %v4181_v29  ;;  %v8075_v55 = vld [vmem:[#allocation23_spill] sm:$0xff] }
 0x506   :  { %v8077_v29 = vld [vmem:[#allocation11_spill] sm:$0xff] }
 0x507   :  { %4186 = vrcp.f32 %v1670_v22  ;;  %v8081_v22 = vld [vmem:[#allocation12_spill] sm:$0xff] }
 0x510   :  { %v4183_v60 = vpop.eup %4182 }
 0x511   :  { %v1674_v20 = vmul.f32 %v4183_v60, %v4179_v38  ;;  %v8076_v38 = vld [vmem:[#allocation28_spill] sm:$0xff] }
 0x512   :  { %v4185_v25 = vpop.eup %4184  ;;  %v8078_v60 = vld [vmem:[#allocation16_spill] sm:$0xff] }
 0x513   :  { %v1673_v52 = vmul.f32 %v4185_v25, %v5974_v53  ;;  %v8069_v53 = vld [vmem:[#allocation9_spill] sm:$0xff] }
 0x514   :  { %v4187_v1 = vpop.eup %4186  ;;  %v8080_v25 = vld [vmem:[#allocation29_spill] sm:$0xff] }
 0x515   :  { %v6118_v21 = vadd.f32 %v1674_v20, %v1673_v52  ;;  %v8079_v20 = vld [vmem:[#allocation24_spill] sm:$0xff]  ;;  %v8082_v52 = vld [vmem:[#allocation17_spill] sm:$0xff] }
 0x517   :  { %4188 = vtanh.f32 %v6118_v21 }
 0x524   :  { %v4189_v43 = vpop.eup %4188 }
 0x525   :  { %v1677_v46 = vmul.f32 %v4189_v43, %v4187_v1  ;;  %v8083_v1 = vld [vmem:[#allocation25_spill] sm:$0xff]  ;;  %v8084_v43 = vmov 0.0  }
 0x527   :  { %1747 = vmatmul.mubr.f32.vlgmr.msra.gmra.mxu0 %v1677_v46  ;;  %1818 = vmatmul.mubr.f32.vlgmr.msra.gmra.mxu1 %v1677_v46  ;;  %v8085_v46 = vld [vmem:[#allocation30_spill] sm:$0xff] }
 0x528   :  { %1857 = vmatpush1.msra.mxu0 %v5587_v0  ;;  %1928 = vmatpush1.msra.mxu1 %v5782_v59 }
 0x529   :  { %1858 = vmatprep.subr.mxu0 %v5594_v62  ;;  %1929 = vmatprep.subr.mxu1 %v5789_v23 }
 0x52a   :  { %1859 = vmatpush1.msra.mxu0 %v5601_v63  ;;  %1930 = vmatpush1.msra.mxu1 %v5796_v57 }
 0x52b   :  { %1860 = vmatprep.subr.mxu0 %v5608_v2  ;;  %1931 = vmatprep.subr.mxu1 %v5803_v61 }
 0x52c   :  { %1861 = vmatpush1.msra.mxu0 %v5615_v3  ;;  %1932 = vmatpush1.msra.mxu1 %v5810_v56 }
 0x52d   :  { %1862 = vmatprep.subr.mxu0 %v5622_v4  ;;  %1933 = vmatprep.subr.mxu1 %v5817_v48 }
 0x52e   :  { %1863 = vmatpush1.msra.mxu0 %v5629_v5  ;;  %1934 = vmatpush1.msra.mxu1 %v5824_v42 }
 0x52f   :  { %1864 = vmatprep.subr.mxu0 %v5636_v6  ;;  %1935 = vmatprep.subr.mxu1 %v5831_v51 }
 0x530   :  { %1865 = vmatpush1.msra.mxu0 %v5643_v8  ;;  %1936 = vmatpush1.msra.mxu1 %v5838_v24 }
 0x531   :  { %1866 = vmatprep.subr.mxu0 %v5650_v9  ;;  %1937 = vmatprep.subr.mxu1 %v5845_v39 }
 0x532   :  { %1867 = vmatpush1.msra.mxu0 %v5657_v10  ;;  %1938 = vmatpush1.msra.mxu1 %v5852_v41 }
 0x533   :  { %1868 = vmatprep.subr.mxu0 %v5664_v11  ;;  %1939 = vmatprep.subr.mxu1 %v5859_v45 }
 0x534   :  { %1869 = vmatpush1.msra.mxu0 %v5671_v12  ;;  %1940 = vmatpush1.msra.mxu1 %v5866_v50 }
 0x535   :  { %1870 = vmatprep.subr.mxu0 %v5678_v13  ;;  %1941 = vmatprep.subr.mxu1 %v5873_v26 }
 0x536   :  { %1871 = vmatpush1.msra.mxu0 %v5685_v14  ;;  %1942 = vmatpush1.msra.mxu1 %v5880_v7 }
 0x537   :  { %1872 = vmatprep.subr.mxu0 %v5692_v15  ;;  %1943 = vmatprep.subr.mxu1 %v5887_v44 }
 0x538   :  { %1873 = vmatpush1.msra.mxu0 %v5699_v16  ;;  %1944 = vmatpush1.msra.mxu1 %v5894_v32 }
 0x539   :  { %1874 = vmatprep.subr.mxu0 %v5706_v17  ;;  %1945 = vmatprep.subr.mxu1 %v6015_v49 }
 0x53a   :  { %1875 = vmatpush1.msra.mxu0 %v5713_v18  ;;  %1946 = vmatpush1.msra.mxu1 %v6022_v27 }
 0x53b   :  { %1876 = vmatprep.subr.mxu0 %v5720_v19  ;;  %1947 = vmatprep.subr.mxu1 %v6029_v31 }
 0x53c   :  { %1877 = vmatpush1.msra.mxu0 %v5727_v28  ;;  %1948 = vmatpush1.msra.mxu1 %v6036_v35 }
 0x53d   :  { %1878 = vmatprep.subr.mxu0 %v5734_v30  ;;  %1949 = vmatprep.subr.mxu1 %v6043_v37 }
 0x53e   :  { %1879 = vmatpush1.msra.mxu0 %v5741_v33  ;;  %1950 = vmatpush1.msra.mxu1 %v8068_v36 }
 0x53f   :  { %1880 = vmatprep.subr.mxu0 %v8069_v53  ;;  %1951 = vmatprep.subr.mxu1 %v8070_v40  ;;  %v8091_v40 = vld [vmem:[#allocation70_spill] sm:$0xff] }
 0x540   :  { %1881 = vmatpush1.msra.mxu0 %v8071_v34  ;;  %1952 = vmatpush1.msra.mxu1 %v8072_v54  ;;  %v8090_v34 = vld [vmem:[#allocation72_spill] sm:$0xff] }
 0x541   :  { %1882 = vmatprep.subr.mxu0 %v8073_v47  ;;  %1953 = vmatprep.subr.mxu1 %v8074_v58 }
 0x542   :  { %1883 = vmatpush1.msra.mxu0 %v8075_v55  ;;  %1954 = vmatpush1.msra.mxu1 %v8076_v38  ;;  %v8086_v38 = vld [vmem:[#allocation8_spill] sm:$0xff] }
 0x543   :  { %1884 = vmatprep.subr.mxu0 %v8077_v29  ;;  %1955 = vmatprep.subr.mxu1 %v8078_v60  ;;  %v8087_v29 = vld [vmem:[#allocation13_spill] sm:$0xff] }
 0x544   :  { %1885 = vmatpush1.msra.mxu0 %v8079_v20  ;;  %1956 = vmatpush1.msra.mxu1 %v8080_v25  ;;  %v8088_v20 = vld [vmem:[#allocation41_spill] sm:$0xff] }
 0x545   :  { %1886 = vmatprep.subr.mxu0 %v8081_v22  ;;  %1957 = vmatprep.subr.mxu1 %v8082_v52  ;;  %v8089_v22 = vld [vmem:[#allocation43_spill] sm:$0xff] }
 0x546   :  { %1887 = vmatpush1.msra.mxu0 %v8083_v1  ;;  %1920 = vmatprep.mubr.f32.mxu0 %v8084_v43 }
 0x547   :  { %1958 = vmatpush1.msra.mxu1 %v8085_v46  ;;  %1991 = vmatprep.mubr.f32.mxu1 %v8084_v43 }
 0x548   :  { %2030 = vmatprep.subr.mxu0 %v8086_v38  ;;  %2101 = vmatprep.subr.mxu1 %v8087_v29 }
 0x5e7   :  { %v1748_v60 = vpop.f32.mrf.mxu0  ;;  %v1819_v52 = vpop.f32.mrf.mxu1 }
 0x5e8   :  { %v1824_v55 = vadd.f32 %v1748_v60, %v8088_v20  ;;  %v1826_v43 = vadd.f32 %v1819_v52, %v8091_v40 }
 0x5e9   :  { %v1750_v25 = vpop.f32.mrf.mxu0  ;;  %v1821_v54 = vpop.f32.mrf.mxu1 }
 0x5ea   :  { %v3997_v58 = vmul.f32 -1.442695, %v1824_v55  ;;  %v1825_v47 = vadd.f32 %v1750_v25, %v8089_v22  ;;  %v1827_v46 = vadd.f32 %v1821_v54, %v8090_v34 }
 0x5ec   :  { %4190 = vpow2.f32 %v3997_v58  ;;  %v3998_v1 = vmul.f32 -1.442695, %v1825_v47  ;;  %v3999_v53 = vmul.f32 -1.442695, %v1827_v46  ;;  %v6277_v46 = vld [vmem:[%s7732_s7 + $0x1f8] sm:$0xff] }
 0x5ed   :  { %8115 = vst [vmem:[#allocation31_spill] sm:$0xff] %v6277_v46 }
 0x5ee   :  { %4192 = vpow2.f32 %v3998_v1 }
 0x5ef   :  { %4194 = vtanh.f32 %v1826_v43  ;;  %v6272_v43 = vld [vmem:[%s7732_s7 + $0x1e8] sm:$0xff] }
 0x5f0   :  { %4196 = vpow2.f32 %v3999_v53  ;;  %8114 = vst [vmem:[#allocation18_spill] sm:$0xff] %v6272_v43 }
 0x5f9   :  { %v4191_v38 = vpop.eup %4190 }
 0x5fa   :  { %v1831_v36 = vadd.f32 1.0, %v4191_v38  ;;  %v6284_v38 = vld [vmem:[%s7732_s7 + $0x1e0] sm:$0xff] }
 0x5fb   :  { %v4193_v29 = vpop.eup %4192 }
 0x5fc   :  { %4198 = vrcp.f32 %v1831_v36  ;;  %v1837_v60 = vadd.f32 1.0, %v4193_v29  ;;  %v4195_v55 = vpop.eup %4194  ;;  %v6289_v29 = vld [vmem:[%s7732_s7 + $0x1f0] sm:$0xff] }
 0x5fd   :  { %v4197_v20 = vpop.eup %4196 }
 0x5fe   :  { %4200 = vrcp.f32 %v1837_v60  ;;  %v1844_v22 = vadd.f32 1.0, %v4197_v20  ;;  %v6296_v60 = vld [vmem:[%s7732_s7 + $0x1c8] sm:$0xff]  ;;  %v6308_v20 = vld [vmem:[%s7732_s7 + $0x1c0] sm:$0xff] }
 0x600   :  { %4202 = vrcp.f32 %v1844_v22  ;;  %v6332_v22 = vld [vmem:[%s7732_s7 + $0x1a0] sm:$0xff] }
 0x609   :  { %v4199_v58 = vpop.eup %4198 }
 0x60a   :  { %v1848_v25 = vmul.f32 %v4199_v58, %v4195_v55  ;;  %v6301_v55 = vld [vmem:[%s7732_s7 + $0x1d8] sm:$0xff]  ;;  %v6313_v58 = vld [vmem:[%s7732_s7 + $0x1d0] sm:$0xff] }
 0x60b   :  { %v4201_v47 = vpop.eup %4200 }
 0x60c   :  { %v1847_v1 = vmul.f32 %v4201_v47, %v6118_v21  ;;  %v6325_v47 = vld [vmem:[%s7732_s7 + $0x1b8] sm:$0xff] }
 0x60d   :  { %v4203_v40 = vpop.eup %4202 }
 0x60e   :  { %v6192_v34 = vadd.f32 %v1848_v25, %v1847_v1  ;;  %v6320_v25 = vld [vmem:[%s7732_s7 + $0x1a8] sm:$0xff]  ;;  %v6337_v1 = vld [vmem:[%s7732_s7 + $0x1b0] sm:$0xff] }
 0x610   :  { %4204 = vtanh.f32 %v6192_v34 }
 0x61d   :  { %v4205_v54 = vpop.eup %4204 }
 0x61e   :  { %v1851_v52 = vmul.f32 %v4205_v54, %v4203_v40  ;;  %v6349_v40 = vld [vmem:[%s7732_s7 + $0x198] sm:$0xff]  ;;  %v6356_v54 = vld [vmem:[%s7732_s7 + $0x180] sm:$0xff] }
 0x620   :  { %1921 = vmatmul.mubr.f32.vlgmr.msra.gmra.mxu0 %v1851_v52  ;;  %1992 = vmatmul.mubr.f32.vlgmr.msra.gmra.mxu1 %v1851_v52  ;;  %v6361_v52 = vld [vmem:[%s7732_s7 + $0x190] sm:$0xff] }
 0x621   :  { %2031 = vmatpush1.msra.mxu0 %v5587_v0  ;;  %2102 = vmatpush1.msra.mxu1 %v5782_v59  ;;  %v8092_v0 = vld [vmem:[#allocation26_spill] sm:$0xff] }
 0x622   :  { %2032 = vmatprep.subr.mxu0 %v5594_v62  ;;  %2103 = vmatprep.subr.mxu1 %v5789_v23  ;;  %v8093_v62 = vld [vmem:[#allocation9_spill] sm:$0xff]  ;;  %v8111_v59 = vld [vmem:[#allocation46_spill] sm:$0xff] }
 0x623   :  { %2033 = vmatpush1.msra.mxu0 %v5601_v63  ;;  %2104 = vmatpush1.msra.mxu1 %v5796_v57  ;;  %v8094_v63 = vld [vmem:[#allocation14_spill] sm:$0xff] }
 0x624   :  { %2034 = vmatprep.subr.mxu0 %v5608_v2  ;;  %2105 = vmatprep.subr.mxu1 %v5803_v61  ;;  %v8095_v2 = vld [vmem:[#allocation22_spill] sm:$0xff] }
 0x625   :  { %2035 = vmatpush1.msra.mxu0 %v5615_v3  ;;  %2106 = vmatpush1.msra.mxu1 %v5810_v56  ;;  %v8096_v3 = vld [vmem:[#allocation27_spill] sm:$0xff] }
 0x626   :  { %2036 = vmatprep.subr.mxu0 %v5622_v4  ;;  %2107 = vmatprep.subr.mxu1 %v5817_v48  ;;  %v8097_v4 = vld [vmem:[#allocation10_spill] sm:$0xff]  ;;  %v8112_v48 = vld [vmem:[#allocation75_spill] sm:$0xff] }
 0x627   :  { %2037 = vmatpush1.msra.mxu0 %v5629_v5  ;;  %2108 = vmatpush1.msra.mxu1 %v5824_v42  ;;  %v8098_v5 = vld [vmem:[#allocation15_spill] sm:$0xff] }
 0x628   :  { %2038 = vmatprep.subr.mxu0 %v5636_v6  ;;  %2109 = vmatprep.subr.mxu1 %v5831_v51  ;;  %v8099_v6 = vld [vmem:[#allocation23_spill] sm:$0xff]  ;;  %v8113_v51 = vld [vmem:[#allocation74_spill] sm:$0xff] }
 0x629   :  { %2039 = vmatpush1.msra.mxu0 %v5643_v8  ;;  %2110 = vmatpush1.msra.mxu1 %v5838_v24  ;;  %v8100_v8 = vld [vmem:[#allocation28_spill] sm:$0xff] }
 0x62a   :  { %2040 = vmatprep.subr.mxu0 %v5650_v9  ;;  %2111 = vmatprep.subr.mxu1 %v5845_v39  ;;  %v8101_v9 = vld [vmem:[#allocation11_spill] sm:$0xff] }
 0x62b   :  { %2041 = vmatpush1.msra.mxu0 %v5657_v10  ;;  %2112 = vmatpush1.msra.mxu1 %v5852_v41  ;;  %v8102_v10 = vld [vmem:[#allocation16_spill] sm:$0xff] }
 0x62c   :  { %2042 = vmatprep.subr.mxu0 %v5664_v11  ;;  %2113 = vmatprep.subr.mxu1 %v5859_v45  ;;  %v8103_v11 = vld [vmem:[#allocation24_spill] sm:$0xff] }
 0x62d   :  { %2043 = vmatpush1.msra.mxu0 %v5671_v12  ;;  %2114 = vmatpush1.msra.mxu1 %v5866_v50  ;;  %v8104_v12 = vld [vmem:[#allocation29_spill] sm:$0xff] }
 0x62e   :  { %2044 = vmatprep.subr.mxu0 %v5678_v13  ;;  %2115 = vmatprep.subr.mxu1 %v5873_v26  ;;  %v8105_v13 = vld [vmem:[#allocation12_spill] sm:$0xff] }
 0x62f   :  { %2045 = vmatpush1.msra.mxu0 %v5685_v14  ;;  %2116 = vmatpush1.msra.mxu1 %v5880_v7  ;;  %v8106_v14 = vld [vmem:[#allocation17_spill] sm:$0xff] }
 0x630   :  { %2046 = vmatprep.subr.mxu0 %v5692_v15  ;;  %2117 = vmatprep.subr.mxu1 %v5887_v44  ;;  %v8107_v15 = vld [vmem:[#allocation25_spill] sm:$0xff] }
 0x631   :  { %2047 = vmatpush1.msra.mxu0 %v5699_v16  ;;  %2118 = vmatpush1.msra.mxu1 %v5894_v32  ;;  %v8108_v16 = vmov 0.0  }
 0x632   :  { %2048 = vmatprep.subr.mxu0 %v5706_v17  ;;  %2119 = vmatprep.subr.mxu1 %v6015_v49  ;;  %v8109_v17 = vld [vmem:[#allocation30_spill] sm:$0xff] }
 0x633   :  { %2049 = vmatpush1.msra.mxu0 %v5713_v18  ;;  %2120 = vmatpush1.msra.mxu1 %v6022_v27 }
 0x634   :  { %2050 = vmatprep.subr.mxu0 %v5720_v19  ;;  %2121 = vmatprep.subr.mxu1 %v6029_v31  ;;  %v8110_v19 = vld [vmem:[#allocation44_spill] sm:$0xff] }
 0x635   :  { %2051 = vmatpush1.msra.mxu0 %v5727_v28  ;;  %2122 = vmatpush1.msra.mxu1 %v6036_v35 }
 0x636   :  { %2052 = vmatprep.subr.mxu0 %v5734_v30  ;;  %2123 = vmatprep.subr.mxu1 %v6043_v37 }
 0x637   :  { %2053 = vmatpush1.msra.mxu0 %v5741_v33  ;;  %2124 = vmatpush1.msra.mxu1 %v8092_v0  ;;  %v6368_v0 = vld [vmem:[%s7732_s7 + $0x168] sm:$0xff] }
 0x638   :  { %2054 = vmatprep.subr.mxu0 %v8093_v62  ;;  %2125 = vmatprep.subr.mxu1 %v8094_v63  ;;  %v6373_v62 = vld [vmem:[%s7732_s7 + $0x178] sm:$0xff]  ;;  %v6380_v63 = vld [vmem:[%s7732_s7 + $0x160] sm:$0xff] }
 0x639   :  { %2055 = vmatpush1.msra.mxu0 %v8095_v2  ;;  %2126 = vmatpush1.msra.mxu1 %v8096_v3  ;;  %v6385_v2 = vld [vmem:[%s7732_s7 + $0x170] sm:$0xff]  ;;  %v6392_v3 = vld [vmem:[%s7732_s7 + $0x148] sm:$0xff] }
 0x63a   :  { %2056 = vmatprep.subr.mxu0 %v8097_v4  ;;  %2127 = vmatprep.subr.mxu1 %v8098_v5  ;;  %v6397_v4 = vld [vmem:[%s7732_s7 + $0x158] sm:$0xff]  ;;  %v6404_v5 = vld [vmem:[%s7732_s7 + $0x140] sm:$0xff] }
 0x63b   :  { %2057 = vmatpush1.msra.mxu0 %v8099_v6  ;;  %2128 = vmatpush1.msra.mxu1 %v8100_v8  ;;  %v6409_v6 = vld [vmem:[%s7732_s7 + $0x150] sm:$0xff]  ;;  %v6416_v8 = vld [vmem:[%s7732_s7 + $0x128] sm:$0xff] }
 0x63c   :  { %2058 = vmatprep.subr.mxu0 %v8101_v9  ;;  %2129 = vmatprep.subr.mxu1 %v8102_v10  ;;  %v6421_v9 = vld [vmem:[%s7732_s7 + $0x138] sm:$0xff]  ;;  %v6428_v10 = vld [vmem:[%s7732_s7 + $0x120] sm:$0xff] }
 0x63d   :  { %2059 = vmatpush1.msra.mxu0 %v8103_v11  ;;  %2130 = vmatpush1.msra.mxu1 %v8104_v12  ;;  %v6433_v11 = vld [vmem:[%s7732_s7 + $0x130] sm:$0xff]  ;;  %v6440_v12 = vld [vmem:[%s7732_s7 + $0x108] sm:$0xff] }
 0x63e   :  { %2060 = vmatprep.subr.mxu0 %v8105_v13  ;;  %2131 = vmatprep.subr.mxu1 %v8106_v14  ;;  %v6445_v13 = vld [vmem:[%s7732_s7 + $0x118] sm:$0xff]  ;;  %v6450_v14 = vld [vmem:[%s7732_s7 + $0x100] sm:$0xff] }
 0x63f   :  { %2061 = vmatpush1.msra.mxu0 %v8107_v15  ;;  %2094 = vmatprep.mubr.f32.mxu0 %v8108_v16  ;;  %v6457_v15 = vld [vmem:[%s7732_s7 + $0x110] sm:$0xff] }
 0x640   :  { %2132 = vmatpush1.msra.mxu1 %v8109_v17  ;;  %2165 = vmatprep.mubr.f32.mxu1 %v8108_v16  ;;  %v6462_v17 = vld [vmem:[%s7732_s7 + $0xe8] sm:$0xff] }
 0x641   :  { %2204 = vmatprep.subr.mxu0 %v6272_v43  ;;  %2275 = vmatprep.subr.mxu1 %v6277_v46 }
 0x6e0   :  { %v1922_v18 = vpop.f32.mrf.mxu0  ;;  %v1993_v57 = vpop.f32.mrf.mxu1 }
 0x6e1   :  { %v1998_v28 = vadd.f32 %v1922_v18, %v8110_v19  ;;  %v2000_v24 = vadd.f32 %v1993_v57, %v8113_v51  ;;  %v6467_v18 = vld [vmem:[%s7732_s7 + $0xf8] sm:$0xff]  ;;  %v6474_v19 = vld [vmem:[%s7732_s7 + $0xe0] sm:$0xff]  ;;  %v6508_v57 = vld [vmem:[%s7732_s7 + $0xa8] sm:$0xff] }
 0x6e2   :  { %v1924_v30 = vpop.f32.mrf.mxu0  ;;  %v1995_v56 = vpop.f32.mrf.mxu1  ;;  %v6537_v51 = vld [vmem:[%s7732_s7 + $0x98] sm:$0xff] }
 0x6e3   :  { %v4000_v33 = vmul.f32 -1.442695, %v1998_v28  ;;  %v1999_v23 = vadd.f32 %v1924_v30, %v8111_v59  ;;  %v2001_v42 = vadd.f32 %v1995_v56, %v8112_v48  ;;  %v6479_v28 = vld [vmem:[%s7732_s7 + $0xf0] sm:$0xff]  ;;  %v6484_v30 = vld [vmem:[%s7732_s7 + $0xc8] sm:$0xff]  ;;  %v6496_v59 = vld [vmem:[%s7732_s7 + $0xc0] sm:$0xff] }
 0x6e4   :  { %v6520_v56 = vld [vmem:[%s7732_s7 + $0xa0] sm:$0xff]  ;;  %v6525_v48 = vld [vmem:[%s7732_s7 + $0xb0] sm:$0xff] }
 0x6e5   :  { %4206 = vpow2.f32 %v4000_v33  ;;  %v4001_v61 = vmul.f32 -1.442695, %v1999_v23  ;;  %v4002_v39 = vmul.f32 -1.442695, %v2001_v42  ;;  %v6491_v33 = vld [vmem:[%s7732_s7 + $0xd8] sm:$0xff]  ;;  %v6501_v23 = vld [vmem:[%s7732_s7 + $0xd0] sm:$0xff] }
 0x6e6   :  { %v6532_v42 = vld [vmem:[%s7732_s7 + $0x88] sm:$0xff] }
 0x6e7   :  { %4208 = vpow2.f32 %v4001_v61  ;;  %v6513_v61 = vld [vmem:[%s7732_s7 + $0xb8] sm:$0xff] }
 0x6e8   :  { %4210 = vtanh.f32 %v2000_v24  ;;  %v6544_v24 = vld [vmem:[%s7732_s7 + $0x80] sm:$0xff] }
 0x6e9   :  { %4212 = vpow2.f32 %v4002_v39  ;;  %v6549_v39 = vld [vmem:[%s7732_s7 + $0x90] sm:$0xff] }
 0x6ea   :  { %8116 = vst [vmem:[#allocation19_spill] sm:$0xff] %v6549_v39 }
 0x6f2   :  { %v4207_v41 = vpop.eup %4206 }
 0x6f3   :  { %v2005_v45 = vadd.f32 1.0, %v4207_v41  ;;  %v6556_v41 = vld [vmem:[%s7732_s7 + $0x68] sm:$0xff] }
 0x6f4   :  { %v4209_v50 = vpop.eup %4208  ;;  %8117 = vst [vmem:[#allocation32_spill] sm:$0xff] %v6556_v41 }
 0x6f5   :  { %4214 = vrcp.f32 %v2005_v45  ;;  %v2011_v26 = vadd.f32 1.0, %v4209_v50  ;;  %v4211_v7 = vpop.eup %4210  ;;  %v6561_v45 = vld [vmem:[%s7732_s7 + $0x78] sm:$0xff]  ;;  %v6568_v50 = vld [vmem:[%s7732_s7 + $0x60] sm:$0xff] }
 0x6f6   :  { %v4213_v44 = vpop.eup %4212  ;;  %8118 = vst [vmem:[#allocation21_spill] sm:$0xff] %v6561_v45  ;;  %8119 = vst [vmem:[#allocation33_spill] sm:$0xff] %v6568_v50 }
 0x6f7   :  { %4216 = vrcp.f32 %v2011_v26  ;;  %v2018_v31 = vadd.f32 1.0, %v4213_v44  ;;  %v6573_v26 = vld [vmem:[%s7732_s7 + $0x70] sm:$0xff]  ;;  %v6585_v44 = vld [vmem:[%s7732_s7 + $0x58] sm:$0xff] }
 0x6f8   :  { %8120 = vst [vmem:[#allocation20_spill] sm:$0xff] %v6573_v26  ;;  %8122 = vst [vmem:[#allocation38_spill] sm:$0xff] %v6585_v44 }
 0x6f9   :  { %4218 = vrcp.f32 %v2018_v31  ;;  %v6609_v31 = vld [vmem:[%s7732_s7 + $0x38] sm:$0xff] }
 0x6fa   :  { %8126 = vst [vmem:[#allocation42_spill] sm:$0xff] %v6609_v31 }
 0x702   :  { %v4215_v32 = vpop.eup %4214 }
 0x703   :  { %v2022_v49 = vmul.f32 %v4215_v32, %v4211_v7  ;;  %v6580_v7 = vld [vmem:[%s7732_s7 + $0x48] sm:$0xff]  ;;  %v6592_v32 = vld [vmem:[%s7732_s7 + $0x40] sm:$0xff] }
 0x704   :  { %v4217_v27 = vpop.eup %4216  ;;  %8121 = vst [vmem:[#allocation36_spill] sm:$0xff] %v6580_v7  ;;  %8123 = vst [vmem:[#allocation56_spill] sm:$0xff] %v6592_v32 }
 0x705   :  { %v2021_v35 = vmul.f32 %v4217_v27, %v6192_v34  ;;  %v6344_v34 = vld [vmem:[%s7732_s7 + $0x188] sm:$0xff] }
 0x706   :  { %v4219_v21 = vpop.eup %4218  ;;  %v6604_v27 = vld [vmem:[%s7732_s7 + $0x28] sm:$0xff] }
 0x707   :  { %v6264_v37 = vadd.f32 %v2022_v49, %v2021_v35  ;;  %v6597_v49 = vld [vmem:[%s7732_s7 + $0x50] sm:$0xff]  ;;  %8125 = vst [vmem:[#allocation40_spill] sm:$0xff] %v6604_v27  ;;  %v6616_v35 = vld [vmem:[%s7732_s7 + $0x20] sm:$0xff] }
 0x708   :  { %8124 = vst [vmem:[#allocation54_spill] sm:$0xff] %v6597_v49  ;;  %8127 = vst [vmem:[#allocation60_spill] sm:$0xff] %v6616_v35 }
 0x709   :  { %4220 = vtanh.f32 %v6264_v37 }
 0x716   :  { %v4221_v36 = vpop.eup %4220 }
 0x717   :  { %v2025_v53 = vmul.f32 %v4221_v36, %v4219_v21  ;;  %v6621_v21 = vld [vmem:[%s7732_s7 + $0x30] sm:$0xff]  ;;  %v6628_v36 = vld [vmem:[%s7732_s7 + $0x8] sm:$0xff] }
 0x718   :  { %8128 = vst [vmem:[#allocation58_spill] sm:$0xff] %v6621_v21  ;;  %8129 = vst [vmem:[#allocation34_spill] sm:$0xff] %v6628_v36 }
 0x719   :  { %2095 = vmatmul.mubr.f32.vlgmr.msra.gmra.mxu0 %v2025_v53  ;;  %2166 = vmatmul.mubr.f32.vlgmr.msra.gmra.mxu1 %v2025_v53  ;;  %v6633_v53 = vld [vmem:[%s7732_s7 + $0x18] sm:$0xff] }
 0x71a   :  { %2268 = vmatprep.mubr.f32.mxu0 %v8108_v16  ;;  %2339 = vmatprep.mubr.f32.mxu1 %v8108_v16  ;;  %8130 = vst [vmem:[#allocation35_spill] sm:$0xff] %v6633_v53  ;;  %v6640_v16 = vld [vmem:[%s7732_s7] sm:$0xff] }
 0x71b   :  { %2205 = vmatpush1.msra.mxu0 %v6284_v38  ;;  %2276 = vmatpush1.msra.mxu1 %v6289_v29  ;;  %8131 = vst [vmem:[#allocation64_spill] sm:$0xff] %v6640_v16 }
 0x71c   :  { %2206 = vmatprep.subr.mxu0 %v6296_v60  ;;  %2277 = vmatprep.subr.mxu1 %v6301_v55 }
 0x71d   :  { %2207 = vmatpush1.msra.mxu0 %v6308_v20  ;;  %2278 = vmatpush1.msra.mxu1 %v6313_v58 }
 0x71e   :  { %2208 = vmatprep.subr.mxu0 %v6320_v25  ;;  %2279 = vmatprep.subr.mxu1 %v6325_v47 }
 0x71f   :  { %2209 = vmatpush1.msra.mxu0 %v6332_v22  ;;  %2280 = vmatpush1.msra.mxu1 %v6337_v1 }
 0x720   :  { %2210 = vmatprep.subr.mxu0 %v6344_v34  ;;  %2281 = vmatprep.subr.mxu1 %v6349_v40 }
 0x721   :  { %2211 = vmatpush1.msra.mxu0 %v6356_v54  ;;  %2282 = vmatpush1.msra.mxu1 %v6361_v52 }
 0x722   :  { %2212 = vmatprep.subr.mxu0 %v6368_v0  ;;  %2283 = vmatprep.subr.mxu1 %v6373_v62 }
 0x723   :  { %2213 = vmatpush1.msra.mxu0 %v6380_v63  ;;  %2284 = vmatpush1.msra.mxu1 %v6385_v2 }
 0x724   :  { %2214 = vmatprep.subr.mxu0 %v6392_v3  ;;  %2285 = vmatprep.subr.mxu1 %v6397_v4 }
 0x725   :  { %2215 = vmatpush1.msra.mxu0 %v6404_v5  ;;  %2286 = vmatpush1.msra.mxu1 %v6409_v6 }
 0x726   :  { %2216 = vmatprep.subr.mxu0 %v6416_v8  ;;  %2287 = vmatprep.subr.mxu1 %v6421_v9 }
 0x727   :  { %2217 = vmatpush1.msra.mxu0 %v6428_v10  ;;  %2288 = vmatpush1.msra.mxu1 %v6433_v11 }
 0x728   :  { %2218 = vmatprep.subr.mxu0 %v6440_v12  ;;  %2289 = vmatprep.subr.mxu1 %v6445_v13 }
 0x729   :  { %2219 = vmatpush1.msra.mxu0 %v6450_v14  ;;  %2290 = vmatpush1.msra.mxu1 %v6457_v15 }
 0x72a   :  { %2220 = vmatprep.subr.mxu0 %v6462_v17  ;;  %2291 = vmatprep.subr.mxu1 %v6467_v18 }
 0x72b   :  { %2221 = vmatpush1.msra.mxu0 %v6474_v19  ;;  %2292 = vmatpush1.msra.mxu1 %v6479_v28 }
 0x72c   :  { %2222 = vmatprep.subr.mxu0 %v6484_v30  ;;  %2293 = vmatprep.subr.mxu1 %v6491_v33 }
 0x72d   :  { %2223 = vmatpush1.msra.mxu0 %v6496_v59  ;;  %2294 = vmatpush1.msra.mxu1 %v6501_v23 }
 0x72e   :  { %2224 = vmatprep.subr.mxu0 %v6508_v57  ;;  %2295 = vmatprep.subr.mxu1 %v6513_v61 }
 0x72f   :  { %2225 = vmatpush1.msra.mxu0 %v6520_v56  ;;  %2296 = vmatpush1.msra.mxu1 %v6525_v48 }
 0x730   :  { %2226 = vmatprep.subr.mxu0 %v6532_v42  ;;  %2297 = vmatprep.subr.mxu1 %v6537_v51 }
 0x731   :  { %2227 = vmatpush1.msra.mxu0 %v6544_v24  ;;  %2298 = vmatpush1.msra.mxu1 %v6549_v39 }
 0x732   :  { %2228 = vmatprep.subr.mxu0 %v6556_v41  ;;  %2299 = vmatprep.subr.mxu1 %v6561_v45  ;;  %v8136_v45 = vld [vmem:[#allocation76_spill] sm:$0xff] }
 0x733   :  { %2229 = vmatpush1.msra.mxu0 %v6568_v50  ;;  %2300 = vmatpush1.msra.mxu1 %v6573_v26  ;;  %v8135_v50 = vld [vmem:[#allocation77_spill] sm:$0xff] }
 0x734   :  { %2230 = vmatprep.subr.mxu0 %v6580_v7  ;;  %2301 = vmatprep.subr.mxu1 %v6585_v44 }
 0x735   :  { %2231 = vmatpush1.msra.mxu0 %v6592_v32  ;;  %2302 = vmatpush1.msra.mxu1 %v6597_v49  ;;  %v6645_v49 = vld [vmem:[%s7732_s7 + $0x10] sm:$0xff] }
 0x736   :  { %2232 = vmatprep.subr.mxu0 %v6604_v27  ;;  %2303 = vmatprep.subr.mxu1 %v6609_v31  ;;  %8132 = vst [vmem:[#allocation62_spill] sm:$0xff] %v6645_v49  ;;  %v8133_v27 = vld [vmem:[#allocation48_spill] sm:$0xff] }
 0x737   :  { %2233 = vmatpush1.msra.mxu0 %v6616_v35  ;;  %2304 = vmatpush1.msra.mxu1 %v6621_v21  ;;  %v8134_v35 = vld [vmem:[#allocation50_spill] sm:$0xff] }
 0x738   :  { %2234 = vmatprep.subr.mxu0 %v6628_v36  ;;  %2305 = vmatprep.subr.mxu1 %v6633_v53 }
 0x739   :  { %2235 = vmatpush1.msra.mxu0 %v6640_v16  ;;  %2306 = vmatpush1.msra.mxu1 %v6645_v49 }
 0x73a   :  { %2379 = vmatprep.subr.mxu0 %v6272_v43  ;;  %2450 = vmatprep.subr.mxu1 %v6277_v46 }
 0x7d9   :  { %v2096_v31 = vpop.f32.mrf.mxu0  ;;  %v2167_v21 = vpop.f32.mrf.mxu1 }
 0x7da   :  { %v2172_v32 = vadd.f32 %v2096_v31, %v8133_v27  ;;  %v2174_v49 = vadd.f32 %v2167_v21, %v8136_v45  ;;  %v8142_v21 = vld [vmem:[#allocation36_spill] sm:$0xff] }
 0x7db   :  { %v2098_v44 = vpop.f32.mrf.mxu0  ;;  %v2169_v53 = vpop.f32.mrf.mxu1 }
 0x7dc   :  { %v4003_v7 = vmul.f32 -1.442695, %v2172_v32  ;;  %v2173_v26 = vadd.f32 %v2098_v44, %v8134_v35  ;;  %v2175_v16 = vadd.f32 %v2169_v53, %v8135_v50  ;;  %v8143_v53 = vld [vmem:[#allocation38_spill] sm:$0xff] }
 0x7de   :  { %4222 = vpow2.f32 %v4003_v7  ;;  %v4004_v36 = vmul.f32 -1.442695, %v2173_v26  ;;  %v4005_v41 = vmul.f32 -1.442695, %v2175_v16 }
 0x7e0   :  { %4224 = vpow2.f32 %v4004_v36 }
 0x7e1   :  { %4226 = vtanh.f32 %v2174_v49  ;;  %v8141_v49 = vld [vmem:[#allocation20_spill] sm:$0xff] }
 0x7e2   :  { %4228 = vpow2.f32 %v4005_v41  ;;  %v8140_v41 = vld [vmem:[#allocation33_spill] sm:$0xff] }
 0x7eb   :  { %v4223_v43 = vpop.eup %4222 }
 0x7ec   :  { %v2179_v39 = vadd.f32 1.0, %v4223_v43 }
 0x7ed   :  { %v4225_v46 = vpop.eup %4224 }
 0x7ee   :  { %4230 = vrcp.f32 %v2179_v39  ;;  %v2185_v27 = vadd.f32 1.0, %v4225_v46  ;;  %v4227_v32 = vpop.eup %4226  ;;  %v8138_v46 = vld [vmem:[#allocation32_spill] sm:$0xff]  ;;  %v8139_v39 = vld [vmem:[#allocation21_spill] sm:$0xff] }
 0x7ef   :  { %v4229_v44 = vpop.eup %4228 }
 0x7f0   :  { %4232 = vrcp.f32 %v2185_v27  ;;  %v2192_v35 = vadd.f32 1.0, %v4229_v44  ;;  %v8144_v27 = vld [vmem:[#allocation56_spill] sm:$0xff] }
 0x7f1   :  { %v8146_v44 = vld [vmem:[#allocation40_spill] sm:$0xff] }
 0x7f2   :  { %4234 = vrcp.f32 %v2192_v35  ;;  %v8150_v35 = vld [vmem:[#allocation34_spill] sm:$0xff] }
 0x7fb   :  { %v4231_v7 = vpop.eup %4230 }
 0x7fc   :  { %v2196_v31 = vmul.f32 %v4231_v7, %v4227_v32  ;;  %v8145_v32 = vld [vmem:[#allocation54_spill] sm:$0xff] }
 0x7fd   :  { %v4233_v26 = vpop.eup %4232  ;;  %v8147_v7 = vld [vmem:[#allocation42_spill] sm:$0xff] }
 0x7fe   :  { %v2195_v36 = vmul.f32 %v4233_v26, %v6264_v37  ;;  %v8137_v37 = vld [vmem:[#allocation19_spill] sm:$0xff]  ;;  %v8149_v26 = vld [vmem:[#allocation58_spill] sm:$0xff] }
 0x7ff   :  { %v4235_v16 = vpop.eup %4234 }
 0x800   :  { %v6660_v50 = vadd.f32 %v2196_v31, %v2195_v36  ;;  %v8148_v31 = vld [vmem:[#allocation60_spill] sm:$0xff]  ;;  %v8151_v36 = vld [vmem:[#allocation35_spill] sm:$0xff] }
 0x802   :  { %4236 = vtanh.f32 %v6660_v50 }
 0x80f   :  { %v4237_v43 = vpop.eup %4236 }
 0x810   :  { %v2199_v45 = vmul.f32 %v4237_v43, %v4235_v16  ;;  %v8152_v16 = vld [vmem:[#allocation64_spill] sm:$0xff]  ;;  %v8153_v43 = vmov 0.0  }
 0x812   :  { %2269 = vmatmul.mubr.f32.vlgmr.msra.gmra.mxu0 %v2199_v45  ;;  %2340 = vmatmul.mubr.f32.vlgmr.msra.gmra.mxu1 %v2199_v45  ;;  %v8154_v45 = vld [vmem:[#allocation62_spill] sm:$0xff] }
 0x813   :  { %2380 = vmatpush1.msra.mxu0 %v6284_v38  ;;  %2451 = vmatpush1.msra.mxu1 %v6289_v29 }
 0x814   :  { %2381 = vmatprep.subr.mxu0 %v6296_v60  ;;  %2452 = vmatprep.subr.mxu1 %v6301_v55 }
 0x815   :  { %2382 = vmatpush1.msra.mxu0 %v6308_v20  ;;  %2453 = vmatpush1.msra.mxu1 %v6313_v58 }
 0x816   :  { %2383 = vmatprep.subr.mxu0 %v6320_v25  ;;  %2454 = vmatprep.subr.mxu1 %v6325_v47 }
 0x817   :  { %2384 = vmatpush1.msra.mxu0 %v6332_v22  ;;  %2455 = vmatpush1.msra.mxu1 %v6337_v1 }
 0x818   :  { %2385 = vmatprep.subr.mxu0 %v6344_v34  ;;  %2456 = vmatprep.subr.mxu1 %v6349_v40 }
 0x819   :  { %2386 = vmatpush1.msra.mxu0 %v6356_v54  ;;  %2457 = vmatpush1.msra.mxu1 %v6361_v52 }
 0x81a   :  { %2387 = vmatprep.subr.mxu0 %v6368_v0  ;;  %2458 = vmatprep.subr.mxu1 %v6373_v62 }
 0x81b   :  { %2388 = vmatpush1.msra.mxu0 %v6380_v63  ;;  %2459 = vmatpush1.msra.mxu1 %v6385_v2 }
 0x81c   :  { %2389 = vmatprep.subr.mxu0 %v6392_v3  ;;  %2460 = vmatprep.subr.mxu1 %v6397_v4 }
 0x81d   :  { %2390 = vmatpush1.msra.mxu0 %v6404_v5  ;;  %2461 = vmatpush1.msra.mxu1 %v6409_v6 }
 0x81e   :  { %2391 = vmatprep.subr.mxu0 %v6416_v8  ;;  %2462 = vmatprep.subr.mxu1 %v6421_v9 }
 0x81f   :  { %2392 = vmatpush1.msra.mxu0 %v6428_v10  ;;  %2463 = vmatpush1.msra.mxu1 %v6433_v11 }
 0x820   :  { %2393 = vmatprep.subr.mxu0 %v6440_v12  ;;  %2464 = vmatprep.subr.mxu1 %v6445_v13 }
 0x821   :  { %2394 = vmatpush1.msra.mxu0 %v6450_v14  ;;  %2465 = vmatpush1.msra.mxu1 %v6457_v15 }
 0x822   :  { %2395 = vmatprep.subr.mxu0 %v6462_v17  ;;  %2466 = vmatprep.subr.mxu1 %v6467_v18 }
 0x823   :  { %2396 = vmatpush1.msra.mxu0 %v6474_v19  ;;  %2467 = vmatpush1.msra.mxu1 %v6479_v28 }
 0x824   :  { %2397 = vmatprep.subr.mxu0 %v6484_v30  ;;  %2468 = vmatprep.subr.mxu1 %v6491_v33 }
 0x825   :  { %2398 = vmatpush1.msra.mxu0 %v6496_v59  ;;  %2469 = vmatpush1.msra.mxu1 %v6501_v23 }
 0x826   :  { %2399 = vmatprep.subr.mxu0 %v6508_v57  ;;  %2470 = vmatprep.subr.mxu1 %v6513_v61 }
 0x827   :  { %2400 = vmatpush1.msra.mxu0 %v6520_v56  ;;  %2471 = vmatpush1.msra.mxu1 %v6525_v48 }
 0x828   :  { %2401 = vmatprep.subr.mxu0 %v6532_v42  ;;  %2472 = vmatprep.subr.mxu1 %v6537_v51 }
 0x829   :  { %2402 = vmatpush1.msra.mxu0 %v6544_v24  ;;  %2473 = vmatpush1.msra.mxu1 %v8137_v37 }
 0x82a   :  { %2403 = vmatprep.subr.mxu0 %v8138_v46  ;;  %2474 = vmatprep.subr.mxu1 %v8139_v39  ;;  %v8160_v39 = vld [vmem:[#allocation78_spill] sm:$0xff] }
 0x82b   :  { %2404 = vmatpush1.msra.mxu0 %v8140_v41  ;;  %2475 = vmatpush1.msra.mxu1 %v8141_v49  ;;  %v8159_v41 = vld [vmem:[#allocation79_spill] sm:$0xff] }
 0x82c   :  { %2405 = vmatprep.subr.mxu0 %v8142_v21  ;;  %2476 = vmatprep.subr.mxu1 %v8143_v53 }
 0x82d   :  { %2406 = vmatpush1.msra.mxu0 %v8144_v27  ;;  %2477 = vmatpush1.msra.mxu1 %v8145_v32  ;;  %v8155_v32 = vld [vmem:[#allocation18_spill] sm:$0xff] }
 0x82e   :  { %2407 = vmatprep.subr.mxu0 %v8146_v44  ;;  %2478 = vmatprep.subr.mxu1 %v8147_v7  ;;  %v8156_v44 = vld [vmem:[#allocation31_spill] sm:$0xff] }
 0x82f   :  { %2408 = vmatpush1.msra.mxu0 %v8148_v31  ;;  %2479 = vmatpush1.msra.mxu1 %v8149_v26  ;;  %v8157_v31 = vld [vmem:[#allocation45_spill] sm:$0xff] }
 0x830   :  { %2409 = vmatprep.subr.mxu0 %v8150_v35  ;;  %2480 = vmatprep.subr.mxu1 %v8151_v36  ;;  %v8158_v35 = vld [vmem:[#allocation47_spill] sm:$0xff] }
 0x831   :  { %2410 = vmatpush1.msra.mxu0 %v8152_v16  ;;  %2443 = vmatprep.mubr.f32.mxu0 %v8153_v43 }
 0x832   :  { %2481 = vmatpush1.msra.mxu1 %v8154_v45  ;;  %2514 = vmatprep.mubr.f32.mxu1 %v8153_v43 }
 0x833   :  { %2554 = vmatprep.subr.mxu0 %v8155_v32  ;;  %2625 = vmatprep.subr.mxu1 %v8156_v44 }
 0x8d2   :  { %v2270_v7 = vpop.f32.mrf.mxu0  ;;  %v2341_v36 = vpop.f32.mrf.mxu1 }
 0x8d3   :  { %v2346_v27 = vadd.f32 %v2270_v7, %v8157_v31  ;;  %v2348_v43 = vadd.f32 %v2341_v36, %v8160_v39  ;;  %v8166_v36 = vld [vmem:[#allocation20_spill] sm:$0xff] }
 0x8d4   :  { %v2272_v26 = vpop.f32.mrf.mxu0  ;;  %v2343_v49 = vpop.f32.mrf.mxu1 }
 0x8d5   :  { %v4006_v53 = vmul.f32 -1.442695, %v2346_v27  ;;  %v2347_v21 = vadd.f32 %v2272_v26, %v8158_v35  ;;  %v2349_v45 = vadd.f32 %v2343_v49, %v8159_v41 }
 0x8d7   :  { %4238 = vpow2.f32 %v4006_v53  ;;  %v4007_v16 = vmul.f32 -1.442695, %v2347_v21  ;;  %v4008_v46 = vmul.f32 -1.442695, %v2349_v45  ;;  %v8168_v45 = vld [vmem:[#allocation38_spill] sm:$0xff] }
 0x8d9   :  { %4240 = vpow2.f32 %v4007_v16 }
 0x8da   :  { %4242 = vtanh.f32 %v2348_v43  ;;  %v8167_v43 = vld [vmem:[#allocation36_spill] sm:$0xff] }
 0x8db   :  { %4244 = vpow2.f32 %v4008_v46  ;;  %v8164_v46 = vld [vmem:[#allocation21_spill] sm:$0xff] }
 0x8e4   :  { %v4239_v32 = vpop.eup %4238 }
 0x8e5   :  { %v2353_v37 = vadd.f32 1.0, %v4239_v32 }
 0x8e6   :  { %v4241_v44 = vpop.eup %4240 }
 0x8e7   :  { %4246 = vrcp.f32 %v2353_v37  ;;  %v2359_v7 = vadd.f32 1.0, %v4241_v44  ;;  %v4243_v27 = vpop.eup %4242  ;;  %v8163_v37 = vld [vmem:[#allocation32_spill] sm:$0xff]  ;;  %v8165_v44 = vld [vmem:[#allocation33_spill] sm:$0xff] }
 0x8e8   :  { %v4245_v31 = vpop.eup %4244 }
 0x8e9   :  { %4248 = vrcp.f32 %v2359_v7  ;;  %v2366_v35 = vadd.f32 1.0, %v4245_v31  ;;  %v8169_v7 = vld [vmem:[#allocation56_spill] sm:$0xff] }
 0x8ea   :  { %v8171_v31 = vld [vmem:[#allocation40_spill] sm:$0xff] }
 0x8eb   :  { %4250 = vrcp.f32 %v2366_v35  ;;  %v8175_v35 = vld [vmem:[#allocation34_spill] sm:$0xff] }
 0x8f4   :  { %v4247_v53 = vpop.eup %4246 }
 0x8f5   :  { %v2370_v26 = vmul.f32 %v4247_v53, %v4243_v27  ;;  %v8170_v27 = vld [vmem:[#allocation54_spill] sm:$0xff] }
 0x8f6   :  { %v4249_v21 = vpop.eup %4248  ;;  %v8172_v53 = vld [vmem:[#allocation42_spill] sm:$0xff] }
 0x8f7   :  { %v2369_v16 = vmul.f32 %v4249_v21, %v6660_v50  ;;  %v8162_v50 = vld [vmem:[#allocation19_spill] sm:$0xff]  ;;  %v8174_v21 = vld [vmem:[#allocation58_spill] sm:$0xff] }
 0x8f8   :  { %v4251_v39 = vpop.eup %4250 }
 0x8f9   :  { %v6734_v41 = vadd.f32 %v2370_v26, %v2369_v16  ;;  %v8173_v26 = vld [vmem:[#allocation60_spill] sm:$0xff]  ;;  %v8176_v16 = vld [vmem:[#allocation35_spill] sm:$0xff] }
 0x8fb   :  { %4252 = vtanh.f32 %v6734_v41 }
 0x908   :  { %v4253_v49 = vpop.eup %4252 }
 0x909   :  { %v6737_v32 = vmul.f32 %v4253_v49, %v4251_v39  ;;  %v8177_v39 = vld [vmem:[#allocation64_spill] sm:$0xff]  ;;  %v8178_v49 = vmov 0.0  }
 0x90b   :  { %8161 = vst [vmem:[#allocation37_spill] sm:$0xff] %v6737_v32  ;;  %2444 = vmatmul.mubr.f32.vlgmr.msra.gmra.mxu0 %v6737_v32  ;;  %2515 = vmatmul.mubr.f32.vlgmr.msra.gmra.mxu1 %v6737_v32  ;;  %v8179_v32 = vld [vmem:[#allocation62_spill] sm:$0xff] }
 0x90c   :  { %2555 = vmatpush1.msra.mxu0 %v6284_v38  ;;  %2626 = vmatpush1.msra.mxu1 %v6289_v29 }
 0x90d   :  { %2556 = vmatprep.subr.mxu0 %v6296_v60  ;;  %2627 = vmatprep.subr.mxu1 %v6301_v55 }
 0x90e   :  { %2557 = vmatpush1.msra.mxu0 %v6308_v20  ;;  %2628 = vmatpush1.msra.mxu1 %v6313_v58 }
 0x90f   :  { %2558 = vmatprep.subr.mxu0 %v6320_v25  ;;  %2629 = vmatprep.subr.mxu1 %v6325_v47 }
 0x910   :  { %2559 = vmatpush1.msra.mxu0 %v6332_v22  ;;  %2630 = vmatpush1.msra.mxu1 %v6337_v1 }
 0x911   :  { %2560 = vmatprep.subr.mxu0 %v6344_v34  ;;  %2631 = vmatprep.subr.mxu1 %v6349_v40 }
 0x912   :  { %2561 = vmatpush1.msra.mxu0 %v6356_v54  ;;  %2632 = vmatpush1.msra.mxu1 %v6361_v52 }
 0x913   :  { %2562 = vmatprep.subr.mxu0 %v6368_v0  ;;  %2633 = vmatprep.subr.mxu1 %v6373_v62 }
 0x914   :  { %2563 = vmatpush1.msra.mxu0 %v6380_v63  ;;  %2634 = vmatpush1.msra.mxu1 %v6385_v2 }
 0x915   :  { %2564 = vmatprep.subr.mxu0 %v6392_v3  ;;  %2635 = vmatprep.subr.mxu1 %v6397_v4 }
 0x916   :  { %2565 = vmatpush1.msra.mxu0 %v6404_v5  ;;  %2636 = vmatpush1.msra.mxu1 %v6409_v6 }
 0x917   :  { %2566 = vmatprep.subr.mxu0 %v6416_v8  ;;  %2637 = vmatprep.subr.mxu1 %v6421_v9 }
 0x918   :  { %2567 = vmatpush1.msra.mxu0 %v6428_v10  ;;  %2638 = vmatpush1.msra.mxu1 %v6433_v11 }
 0x919   :  { %2568 = vmatprep.subr.mxu0 %v6440_v12  ;;  %2639 = vmatprep.subr.mxu1 %v6445_v13 }
 0x91a   :  { %2569 = vmatpush1.msra.mxu0 %v6450_v14  ;;  %2640 = vmatpush1.msra.mxu1 %v6457_v15 }
 0x91b   :  { %2570 = vmatprep.subr.mxu0 %v6462_v17  ;;  %2641 = vmatprep.subr.mxu1 %v6467_v18 }
 0x91c   :  { %2571 = vmatpush1.msra.mxu0 %v6474_v19  ;;  %2642 = vmatpush1.msra.mxu1 %v6479_v28 }
 0x91d   :  { %2572 = vmatprep.subr.mxu0 %v6484_v30  ;;  %2643 = vmatprep.subr.mxu1 %v6491_v33 }
 0x91e   :  { %2573 = vmatpush1.msra.mxu0 %v6496_v59  ;;  %2644 = vmatpush1.msra.mxu1 %v6501_v23 }
 0x91f   :  { %2574 = vmatprep.subr.mxu0 %v6508_v57  ;;  %2645 = vmatprep.subr.mxu1 %v6513_v61 }
 0x920   :  { %2575 = vmatpush1.msra.mxu0 %v6520_v56  ;;  %2646 = vmatpush1.msra.mxu1 %v6525_v48 }
 0x921   :  { %2576 = vmatprep.subr.mxu0 %v6532_v42  ;;  %2647 = vmatprep.subr.mxu1 %v6537_v51 }
 0x922   :  { %2577 = vmatpush1.msra.mxu0 %v6544_v24  ;;  %2648 = vmatpush1.msra.mxu1 %v8162_v50 }
 0x923   :  { %2578 = vmatprep.subr.mxu0 %v8163_v37  ;;  %2649 = vmatprep.subr.mxu1 %v8164_v46  ;;  %v8185_v46 = vld [vmem:[#allocation80_spill] sm:$0xff] }
 0x924   :  { %2579 = vmatpush1.msra.mxu0 %v8165_v44  ;;  %2650 = vmatpush1.msra.mxu1 %v8166_v36  ;;  %v8184_v44 = vld [vmem:[#allocation81_spill] sm:$0xff] }
 0x925   :  { %2580 = vmatprep.subr.mxu0 %v8167_v43  ;;  %2651 = vmatprep.subr.mxu1 %v8168_v45 }
 0x926   :  { %2581 = vmatpush1.msra.mxu0 %v8169_v7  ;;  %2652 = vmatpush1.msra.mxu1 %v8170_v27  ;;  %v8180_v27 = vld [vmem:[#allocation18_spill] sm:$0xff] }
 0x927   :  { %2582 = vmatprep.subr.mxu0 %v8171_v31  ;;  %2653 = vmatprep.subr.mxu1 %v8172_v53  ;;  %v8181_v31 = vld [vmem:[#allocation31_spill] sm:$0xff] }
 0x928   :  { %2583 = vmatpush1.msra.mxu0 %v8173_v26  ;;  %2654 = vmatpush1.msra.mxu1 %v8174_v21  ;;  %v8182_v26 = vld [vmem:[#allocation49_spill] sm:$0xff] }
 0x929   :  { %2584 = vmatprep.subr.mxu0 %v8175_v35  ;;  %2655 = vmatprep.subr.mxu1 %v8176_v16  ;;  %v8183_v35 = vld [vmem:[#allocation51_spill] sm:$0xff] }
 0x92a   :  { %2585 = vmatpush1.msra.mxu0 %v8177_v39  ;;  %2618 = vmatprep.mubr.f32.mxu0 %v8178_v49 }
 0x92b   :  { %2656 = vmatpush1.msra.mxu1 %v8179_v32  ;;  %2689 = vmatprep.mubr.f32.mxu1 %v8178_v49 }
 0x92c   :  { %2729 = vmatprep.subr.mxu0 %v8180_v27  ;;  %2800 = vmatprep.subr.mxu1 %v8181_v31 }
 0x9cb   :  { %v2445_v53 = vpop.f32.mrf.mxu0  ;;  %v2516_v16 = vpop.f32.mrf.mxu1 }
 0x9cc   :  { %v2521_v7 = vadd.f32 %v2445_v53, %v8182_v26  ;;  %v2523_v49 = vadd.f32 %v2516_v16, %v8185_v46  ;;  %v8192_v16 = vld [vmem:[#allocation36_spill] sm:$0xff] }
 0x9cd   :  { %v2447_v21 = vpop.f32.mrf.mxu0  ;;  %v2518_v36 = vpop.f32.mrf.mxu1 }
 0x9ce   :  { %v4009_v45 = vmul.f32 -1.442695, %v2521_v7  ;;  %v2522_v43 = vadd.f32 %v2447_v21, %v8183_v35  ;;  %v2524_v32 = vadd.f32 %v2518_v36, %v8184_v44 }
 0x9d0   :  { %4254 = vpow2.f32 %v4009_v45  ;;  %v4010_v39 = vmul.f32 -1.442695, %v2522_v43  ;;  %v4011_v37 = vmul.f32 -1.442695, %v2524_v32 }
 0x9d2   :  { %4256 = vpow2.f32 %v4010_v39 }
 0x9d3   :  { %4258 = vtanh.f32 %v2523_v49  ;;  %v8193_v49 = vld [vmem:[#allocation38_spill] sm:$0xff] }
 0x9d4   :  { %4260 = vpow2.f32 %v4011_v37  ;;  %v8189_v37 = vld [vmem:[#allocation21_spill] sm:$0xff] }
 0x9dd   :  { %v4255_v27 = vpop.eup %4254 }
 0x9de   :  { %v2528_v50 = vadd.f32 1.0, %v4255_v27  ;;  %v8190_v27 = vld [vmem:[#allocation33_spill] sm:$0xff] }
 0x9df   :  { %v4257_v31 = vpop.eup %4256 }
 0x9e0   :  { %4262 = vrcp.f32 %v2528_v50  ;;  %v2534_v53 = vadd.f32 1.0, %v4257_v31  ;;  %v4259_v7 = vpop.eup %4258  ;;  %v8188_v50 = vld [vmem:[#allocation32_spill] sm:$0xff] }
 0x9e1   :  { %v4261_v26 = vpop.eup %4260  ;;  %v8191_v31 = vld [vmem:[#allocation20_spill] sm:$0xff] }
 0x9e2   :  { %4264 = vrcp.f32 %v2534_v53  ;;  %v2541_v35 = vadd.f32 1.0, %v4261_v26  ;;  %v8194_v53 = vld [vmem:[#allocation56_spill] sm:$0xff] }
 0x9e3   :  { %v8196_v26 = vld [vmem:[#allocation40_spill] sm:$0xff] }
 0x9e4   :  { %4266 = vrcp.f32 %v2541_v35  ;;  %v8200_v35 = vld [vmem:[#allocation34_spill] sm:$0xff] }
 0x9ed   :  { %v4263_v45 = vpop.eup %4262 }
 0x9ee   :  { %v2545_v21 = vmul.f32 %v4263_v45, %v4259_v7  ;;  %v8195_v7 = vld [vmem:[#allocation54_spill] sm:$0xff] }
 0x9ef   :  { %v4265_v43 = vpop.eup %4264  ;;  %v8197_v45 = vld [vmem:[#allocation42_spill] sm:$0xff] }
 0x9f0   :  { %v2544_v39 = vmul.f32 %v4265_v43, %v6734_v41  ;;  %v8187_v41 = vld [vmem:[#allocation19_spill] sm:$0xff]  ;;  %v8199_v43 = vld [vmem:[#allocation58_spill] sm:$0xff] }
 0x9f1   :  { %v4267_v32 = vpop.eup %4266 }
 0x9f2   :  { %v6812_v44 = vadd.f32 %v2545_v21, %v2544_v39  ;;  %v8198_v21 = vld [vmem:[#allocation60_spill] sm:$0xff]  ;;  %v8201_v39 = vld [vmem:[#allocation35_spill] sm:$0xff] }
 0x9f4   :  { %4268 = vtanh.f32 %v6812_v44 }
 0xa01   :  { %v4269_v46 = vpop.eup %4268 }
 0xa02   :  { %v6815_v36 = vmul.f32 %v4269_v46, %v4267_v32  ;;  %v8202_v32 = vld [vmem:[#allocation64_spill] sm:$0xff]  ;;  %v8203_v46 = vmov 0.0  }
 0xa04   :  { %8186 = vst [vmem:[#allocation39_spill] sm:$0xff] %v6815_v36  ;;  %2619 = vmatmul.mubr.f32.vlgmr.msra.gmra.mxu0 %v6815_v36  ;;  %2690 = vmatmul.mubr.f32.vlgmr.msra.gmra.mxu1 %v6815_v36  ;;  %v8204_v36 = vld [vmem:[#allocation62_spill] sm:$0xff] }
 0xa05   :  { %2730 = vmatpush1.msra.mxu0 %v6284_v38  ;;  %2801 = vmatpush1.msra.mxu1 %v6289_v29 }
 0xa06   :  { %2731 = vmatprep.subr.mxu0 %v6296_v60  ;;  %2802 = vmatprep.subr.mxu1 %v6301_v55 }
 0xa07   :  { %2732 = vmatpush1.msra.mxu0 %v6308_v20  ;;  %2803 = vmatpush1.msra.mxu1 %v6313_v58 }
 0xa08   :  { %2733 = vmatprep.subr.mxu0 %v6320_v25  ;;  %2804 = vmatprep.subr.mxu1 %v6325_v47 }
 0xa09   :  { %2734 = vmatpush1.msra.mxu0 %v6332_v22  ;;  %2805 = vmatpush1.msra.mxu1 %v6337_v1 }
 0xa0a   :  { %2735 = vmatprep.subr.mxu0 %v6344_v34  ;;  %2806 = vmatprep.subr.mxu1 %v6349_v40 }
 0xa0b   :  { %2736 = vmatpush1.msra.mxu0 %v6356_v54  ;;  %2807 = vmatpush1.msra.mxu1 %v6361_v52 }
 0xa0c   :  { %2737 = vmatprep.subr.mxu0 %v6368_v0  ;;  %2808 = vmatprep.subr.mxu1 %v6373_v62 }
 0xa0d   :  { %2738 = vmatpush1.msra.mxu0 %v6380_v63  ;;  %2809 = vmatpush1.msra.mxu1 %v6385_v2 }
 0xa0e   :  { %2739 = vmatprep.subr.mxu0 %v6392_v3  ;;  %2810 = vmatprep.subr.mxu1 %v6397_v4 }
 0xa0f   :  { %2740 = vmatpush1.msra.mxu0 %v6404_v5  ;;  %2811 = vmatpush1.msra.mxu1 %v6409_v6 }
 0xa10   :  { %2741 = vmatprep.subr.mxu0 %v6416_v8  ;;  %2812 = vmatprep.subr.mxu1 %v6421_v9 }
 0xa11   :  { %2742 = vmatpush1.msra.mxu0 %v6428_v10  ;;  %2813 = vmatpush1.msra.mxu1 %v6433_v11 }
 0xa12   :  { %2743 = vmatprep.subr.mxu0 %v6440_v12  ;;  %2814 = vmatprep.subr.mxu1 %v6445_v13 }
 0xa13   :  { %2744 = vmatpush1.msra.mxu0 %v6450_v14  ;;  %2815 = vmatpush1.msra.mxu1 %v6457_v15 }
 0xa14   :  { %2745 = vmatprep.subr.mxu0 %v6462_v17  ;;  %2816 = vmatprep.subr.mxu1 %v6467_v18 }
 0xa15   :  { %2746 = vmatpush1.msra.mxu0 %v6474_v19  ;;  %2817 = vmatpush1.msra.mxu1 %v6479_v28 }
 0xa16   :  { %2747 = vmatprep.subr.mxu0 %v6484_v30  ;;  %2818 = vmatprep.subr.mxu1 %v6491_v33 }
 0xa17   :  { %2748 = vmatpush1.msra.mxu0 %v6496_v59  ;;  %2819 = vmatpush1.msra.mxu1 %v6501_v23 }
 0xa18   :  { %2749 = vmatprep.subr.mxu0 %v6508_v57  ;;  %2820 = vmatprep.subr.mxu1 %v6513_v61 }
 0xa19   :  { %2750 = vmatpush1.msra.mxu0 %v6520_v56  ;;  %2821 = vmatpush1.msra.mxu1 %v6525_v48 }
 0xa1a   :  { %2751 = vmatprep.subr.mxu0 %v6532_v42  ;;  %2822 = vmatprep.subr.mxu1 %v6537_v51 }
 0xa1b   :  { %2752 = vmatpush1.msra.mxu0 %v6544_v24  ;;  %2823 = vmatpush1.msra.mxu1 %v8187_v41 }
 0xa1c   :  { %2753 = vmatprep.subr.mxu0 %v8188_v50  ;;  %2824 = vmatprep.subr.mxu1 %v8189_v37  ;;  %v8210_v37 = vld [vmem:[#allocation82_spill] sm:$0xff] }
 0xa1d   :  { %2754 = vmatpush1.msra.mxu0 %v8190_v27  ;;  %2825 = vmatpush1.msra.mxu1 %v8191_v31  ;;  %v8209_v27 = vld [vmem:[#allocation83_spill] sm:$0xff] }
 0xa1e   :  { %2755 = vmatprep.subr.mxu0 %v8192_v16  ;;  %2826 = vmatprep.subr.mxu1 %v8193_v49 }
 0xa1f   :  { %2756 = vmatpush1.msra.mxu0 %v8194_v53  ;;  %2827 = vmatpush1.msra.mxu1 %v8195_v7  ;;  %v8205_v7 = vld [vmem:[#allocation18_spill] sm:$0xff] }
 0xa20   :  { %2757 = vmatprep.subr.mxu0 %v8196_v26  ;;  %2828 = vmatprep.subr.mxu1 %v8197_v45  ;;  %v8206_v26 = vld [vmem:[#allocation31_spill] sm:$0xff] }
 0xa21   :  { %2758 = vmatpush1.msra.mxu0 %v8198_v21  ;;  %2829 = vmatpush1.msra.mxu1 %v8199_v43  ;;  %v8207_v21 = vld [vmem:[#allocation52_spill] sm:$0xff] }
 0xa22   :  { %2759 = vmatprep.subr.mxu0 %v8200_v35  ;;  %2830 = vmatprep.subr.mxu1 %v8201_v39  ;;  %v8208_v35 = vld [vmem:[#allocation53_spill] sm:$0xff] }
 0xa23   :  { %2760 = vmatpush1.msra.mxu0 %v8202_v32  ;;  %2793 = vmatprep.mubr.f32.mxu0 %v8203_v46 }
 0xa24   :  { %2831 = vmatpush1.msra.mxu1 %v8204_v36  ;;  %2864 = vmatprep.mubr.f32.mxu1 %v8203_v46 }
 0xa25   :  { %2904 = vmatprep.subr.mxu0 %v8205_v7  ;;  %2975 = vmatprep.subr.mxu1 %v8206_v26 }
 0xac4   :  { %v2620_v45 = vpop.f32.mrf.mxu0  ;;  %v2691_v39 = vpop.f32.mrf.mxu1 }
 0xac5   :  { %v2696_v53 = vadd.f32 %v2620_v45, %v8207_v21  ;;  %v2698_v46 = vadd.f32 %v2691_v39, %v8210_v37 }
 0xac6   :  { %v2622_v43 = vpop.f32.mrf.mxu0  ;;  %v2693_v31 = vpop.f32.mrf.mxu1 }
 0xac7   :  { %v4012_v49 = vmul.f32 -1.442695, %v2696_v53  ;;  %v2697_v16 = vadd.f32 %v2622_v43, %v8208_v35  ;;  %v2699_v36 = vadd.f32 %v2693_v31, %v8209_v27 }
 0xac9   :  { %4270 = vpow2.f32 %v4012_v49  ;;  %v4013_v32 = vmul.f32 -1.442695, %v2697_v16  ;;  %v4014_v50 = vmul.f32 -1.442695, %v2699_v36 }
 0xacb   :  { %4272 = vpow2.f32 %v4013_v32 }
 0xacc   :  { %4274 = vtanh.f32 %v2698_v46 }
 0xacd   :  { %4276 = vpow2.f32 %v4014_v50 }
 0xad6   :  { %v4271_v7 = vpop.eup %4270 }
 0xad7   :  { %v2703_v41 = vadd.f32 1.0, %v4271_v7  ;;  %v6988_v7 = vld [vmem:[%s7732_s7 + $0x1e0] sm:$0xff] }
 0xad8   :  { %v4273_v26 = vpop.eup %4272 }
 0xad9   :  { %4278 = vrcp.f32 %v2703_v41  ;;  %v2709_v45 = vadd.f32 1.0, %v4273_v26  ;;  %v4275_v53 = vpop.eup %4274  ;;  %v6994_v26 = vld [vmem:[%s7732_s7 + $0x1f0] sm:$0xff] }
 0xada   :  { %v4277_v21 = vpop.eup %4276 }
 0xadb   :  { %4280 = vrcp.f32 %v2709_v45  ;;  %v2716_v35 = vadd.f32 1.0, %v4277_v21  ;;  %v7000_v45 = vld [vmem:[%s7732_s7 + $0x1c8] sm:$0xff]  ;;  %v7012_v21 = vld [vmem:[%s7732_s7 + $0x1c0] sm:$0xff] }
 0xadd   :  { %4282 = vrcp.f32 %v2716_v35  ;;  %v7036_v35 = vld [vmem:[%s7732_s7 + $0x1a0] sm:$0xff] }
 0xae6   :  { %v4279_v49 = vpop.eup %4278 }
 0xae7   :  { %v2720_v43 = vmul.f32 %v4279_v49, %v4275_v53  ;;  %v7006_v53 = vld [vmem:[%s7732_s7 + $0x1d8] sm:$0xff]  ;;  %v7018_v49 = vld [vmem:[%s7732_s7 + $0x1d0] sm:$0xff] }
 0xae8   :  { %v4281_v16 = vpop.eup %4280 }
 0xae9   :  { %v2719_v32 = vmul.f32 %v4281_v16, %v6812_v44  ;;  %v7030_v16 = vld [vmem:[%s7732_s7 + $0x1b8] sm:$0xff] }
 0xaea   :  { %v4283_v36 = vpop.eup %4282 }
 0xaeb   :  { %v6890_v27 = vadd.f32 %v2720_v43, %v2719_v32  ;;  %v7024_v43 = vld [vmem:[%s7732_s7 + $0x1a8] sm:$0xff]  ;;  %v7042_v32 = vld [vmem:[%s7732_s7 + $0x1b0] sm:$0xff] }
 0xaed   :  { %4284 = vtanh.f32 %v6890_v27 }
 0xafa   :  { %v4285_v37 = vpop.eup %4284 }
 0xafb   :  { %v6893_v31 = vmul.f32 %v4285_v37, %v4283_v36  ;;  %v7054_v36 = vld [vmem:[%s7732_s7 + $0x198] sm:$0xff]  ;;  %v7060_v37 = vld [vmem:[%s7732_s7 + $0x180] sm:$0xff] }
 0xafd   :  { %8211 = vst [vmem:[#allocation68_spill] sm:$0xff] %v6893_v31  ;;  %2794 = vmatmul.mubr.f32.vlgmr.msra.gmra.mxu0 %v6893_v31  ;;  %2865 = vmatmul.mubr.f32.vlgmr.msra.gmra.mxu1 %v6893_v31  ;;  %v7342_v31 = vld [vmem:[%s7732_s7 + $0x18] sm:$0xff] }
 0xafe   :  { %2905 = vmatpush1.msra.mxu0 %v6284_v38  ;;  %2976 = vmatpush1.msra.mxu1 %v6289_v29  ;;  %v8212_v38 = vld [vmem:[#allocation19_spill] sm:$0xff]  ;;  %v8213_v29 = vld [vmem:[#allocation32_spill] sm:$0xff]  ;;  %8251 = vst [vmem:[#allocation16_spill] sm:$0xff] %v7342_v31 }
 0xaff   :  { %2906 = vmatprep.subr.mxu0 %v6296_v60  ;;  %2977 = vmatprep.subr.mxu1 %v6301_v55  ;;  %v8214_v60 = vld [vmem:[#allocation21_spill] sm:$0xff] }
 0xb00   :  { %2907 = vmatpush1.msra.mxu0 %v6308_v20  ;;  %2978 = vmatpush1.msra.mxu1 %v6313_v58  ;;  %v8215_v55 = vld [vmem:[#allocation33_spill] sm:$0xff]  ;;  %v8216_v20 = vld [vmem:[#allocation20_spill] sm:$0xff] }
 0xb01   :  { %2908 = vmatprep.subr.mxu0 %v6320_v25  ;;  %2979 = vmatprep.subr.mxu1 %v6325_v47  ;;  %v8217_v58 = vld [vmem:[#allocation36_spill] sm:$0xff]  ;;  %v8218_v25 = vld [vmem:[#allocation38_spill] sm:$0xff] }
 0xb02   :  { %2909 = vmatpush1.msra.mxu0 %v6332_v22  ;;  %2980 = vmatpush1.msra.mxu1 %v6337_v1  ;;  %v8219_v47 = vld [vmem:[#allocation56_spill] sm:$0xff]  ;;  %v8220_v22 = vld [vmem:[#allocation54_spill] sm:$0xff] }
 0xb03   :  { %2910 = vmatprep.subr.mxu0 %v6344_v34  ;;  %2981 = vmatprep.subr.mxu1 %v6349_v40  ;;  %v8221_v1 = vld [vmem:[#allocation40_spill] sm:$0xff]  ;;  %v8222_v34 = vld [vmem:[#allocation42_spill] sm:$0xff] }
 0xb04   :  { %2911 = vmatpush1.msra.mxu0 %v6356_v54  ;;  %2982 = vmatpush1.msra.mxu1 %v6361_v52  ;;  %v8223_v40 = vld [vmem:[#allocation60_spill] sm:$0xff]  ;;  %v8224_v54 = vld [vmem:[#allocation58_spill] sm:$0xff] }
 0xb05   :  { %2912 = vmatprep.subr.mxu0 %v6368_v0  ;;  %2983 = vmatprep.subr.mxu1 %v6373_v62  ;;  %v8225_v52 = vld [vmem:[#allocation34_spill] sm:$0xff]  ;;  %v8226_v0 = vld [vmem:[#allocation35_spill] sm:$0xff]  ;;  %v8227_v62 = vld [vmem:[#allocation64_spill] sm:$0xff] }
 0xb06   :  { %2913 = vmatpush1.msra.mxu0 %v6380_v63  ;;  %2984 = vmatpush1.msra.mxu1 %v6385_v2  ;;  %v8228_v63 = vmov 0.0   ;;  %v8229_v2 = vld [vmem:[#allocation62_spill] sm:$0xff] }
 0xb07   :  { %2914 = vmatprep.subr.mxu0 %v6392_v3  ;;  %2985 = vmatprep.subr.mxu1 %v6397_v4  ;;  %v6964_v3 = vld [vmem:[%s7732_s7 + $0x1e8] sm:$0xff]  ;;  %v6970_v4 = vld [vmem:[%s7732_s7 + $0x1f8] sm:$0xff] }
 0xb08   :  { %2915 = vmatpush1.msra.mxu0 %v6404_v5  ;;  %2986 = vmatpush1.msra.mxu1 %v6409_v6  ;;  %8230 = vst [vmem:[#allocation66_spill] sm:$0xff] %v6964_v3  ;;  %8231 = vst [vmem:[#allocation8_spill] sm:$0xff] %v6970_v4  ;;  %v8232_v6 = vld [vmem:[#allocation55_spill] sm:$0xff] }
 0xb09   :  { %2916 = vmatprep.subr.mxu0 %v6416_v8  ;;  %2987 = vmatprep.subr.mxu1 %v6421_v9 }
 0xb0a   :  { %2917 = vmatpush1.msra.mxu0 %v6428_v10  ;;  %2988 = vmatpush1.msra.mxu1 %v6433_v11  ;;  %v8233_v11 = vld [vmem:[#allocation57_spill] sm:$0xff] }
 0xb0b   :  { %2918 = vmatprep.subr.mxu0 %v6440_v12  ;;  %2989 = vmatprep.subr.mxu1 %v6445_v13 }
 0xb0c   :  { %2919 = vmatpush1.msra.mxu0 %v6450_v14  ;;  %2990 = vmatpush1.msra.mxu1 %v6457_v15 }
 0xb0d   :  { %2920 = vmatprep.subr.mxu0 %v6462_v17  ;;  %2991 = vmatprep.subr.mxu1 %v6467_v18  ;;  %v8234_v17 = vld [vmem:[#allocation85_spill] sm:$0xff] }
 0xb0e   :  { %2921 = vmatpush1.msra.mxu0 %v6474_v19  ;;  %2992 = vmatpush1.msra.mxu1 %v6479_v28  ;;  %v8235_v19 = vld [vmem:[#allocation84_spill] sm:$0xff] }
 0xb0f   :  { %2922 = vmatprep.subr.mxu0 %v6484_v30  ;;  %2993 = vmatprep.subr.mxu1 %v6491_v33 }
 0xb10   :  { %2923 = vmatpush1.msra.mxu0 %v6496_v59  ;;  %2994 = vmatpush1.msra.mxu1 %v6501_v23 }
 0xb11   :  { %2924 = vmatprep.subr.mxu0 %v6508_v57  ;;  %2995 = vmatprep.subr.mxu1 %v6513_v61 }
 0xb12   :  { %2925 = vmatpush1.msra.mxu0 %v6520_v56  ;;  %2996 = vmatpush1.msra.mxu1 %v6525_v48 }
 0xb13   :  { %2926 = vmatprep.subr.mxu0 %v6532_v42  ;;  %2997 = vmatprep.subr.mxu1 %v6537_v51 }
 0xb14   :  { %2927 = vmatpush1.msra.mxu0 %v6544_v24  ;;  %2998 = vmatpush1.msra.mxu1 %v8212_v38  ;;  %v7066_v38 = vld [vmem:[%s7732_s7 + $0x190] sm:$0xff] }
 0xb15   :  { %2928 = vmatprep.subr.mxu0 %v8213_v29  ;;  %2999 = vmatprep.subr.mxu1 %v8214_v60  ;;  %v7072_v29 = vld [vmem:[%s7732_s7 + $0x168] sm:$0xff]  ;;  %v7078_v60 = vld [vmem:[%s7732_s7 + $0x178] sm:$0xff] }
 0xb16   :  { %2929 = vmatpush1.msra.mxu0 %v8215_v55  ;;  %3000 = vmatpush1.msra.mxu1 %v8216_v20  ;;  %v7084_v55 = vld [vmem:[%s7732_s7 + $0x160] sm:$0xff]  ;;  %v7090_v20 = vld [vmem:[%s7732_s7 + $0x170] sm:$0xff] }
 0xb17   :  { %2930 = vmatprep.subr.mxu0 %v8217_v58  ;;  %3001 = vmatprep.subr.mxu1 %v8218_v25  ;;  %v7096_v58 = vld [vmem:[%s7732_s7 + $0x148] sm:$0xff]  ;;  %v7102_v25 = vld [vmem:[%s7732_s7 + $0x158] sm:$0xff] }
 0xb18   :  { %2931 = vmatpush1.msra.mxu0 %v8219_v47  ;;  %3002 = vmatpush1.msra.mxu1 %v8220_v22  ;;  %v7108_v47 = vld [vmem:[%s7732_s7 + $0x140] sm:$0xff]  ;;  %v7114_v22 = vld [vmem:[%s7732_s7 + $0x150] sm:$0xff] }
 0xb19   :  { %2932 = vmatprep.subr.mxu0 %v8221_v1  ;;  %3003 = vmatprep.subr.mxu1 %v8222_v34  ;;  %v7120_v1 = vld [vmem:[%s7732_s7 + $0x128] sm:$0xff]  ;;  %v7126_v34 = vld [vmem:[%s7732_s7 + $0x138] sm:$0xff] }
 0xb1a   :  { %2933 = vmatpush1.msra.mxu0 %v8223_v40  ;;  %3004 = vmatpush1.msra.mxu1 %v8224_v54  ;;  %v7132_v40 = vld [vmem:[%s7732_s7 + $0x120] sm:$0xff]  ;;  %v7138_v54 = vld [vmem:[%s7732_s7 + $0x130] sm:$0xff] }
 0xb1b   :  { %2934 = vmatprep.subr.mxu0 %v8225_v52  ;;  %3005 = vmatprep.subr.mxu1 %v8226_v0  ;;  %v7144_v52 = vld [vmem:[%s7732_s7 + $0x108] sm:$0xff]  ;;  %v7150_v0 = vld [vmem:[%s7732_s7 + $0x118] sm:$0xff] }
 0xb1c   :  { %2935 = vmatpush1.msra.mxu0 %v8227_v62  ;;  %2968 = vmatprep.mubr.f32.mxu0 %v8228_v63  ;;  %v7156_v62 = vld [vmem:[%s7732_s7 + $0x100] sm:$0xff] }
 0xb1d   :  { %3006 = vmatpush1.msra.mxu1 %v8229_v2  ;;  %3039 = vmatprep.mubr.f32.mxu1 %v8228_v63  ;;  %v7162_v2 = vld [vmem:[%s7732_s7 + $0x110] sm:$0xff] }
 0xb1e   :  { %3079 = vmatprep.subr.mxu0 %v6964_v3  ;;  %3150 = vmatprep.subr.mxu1 %v6970_v4 }
 0xbbd   :  { %v2795_v5 = vpop.f32.mrf.mxu0  ;;  %v2866_v13 = vpop.f32.mrf.mxu1 }
 0xbbe   :  { %v2871_v8 = vadd.f32 %v2795_v5, %v8232_v6  ;;  %v2873_v28 = vadd.f32 %v2866_v13, %v8235_v19  ;;  %v7168_v5 = vld [vmem:[%s7732_s7 + $0xe8] sm:$0xff]  ;;  %v7174_v6 = vld [vmem:[%s7732_s7 + $0xf8] sm:$0xff]  ;;  %v7210_v13 = vld [vmem:[%s7732_s7 + $0xd0] sm:$0xff] }
 0xbbf   :  { %v2797_v9 = vpop.f32.mrf.mxu0  ;;  %v2868_v15 = vpop.f32.mrf.mxu1  ;;  %v7240_v19 = vld [vmem:[%s7732_s7 + $0x88] sm:$0xff] }
 0xbc0   :  { %v4015_v10 = vmul.f32 -1.442695, %v2871_v8  ;;  %v2872_v12 = vadd.f32 %v2797_v9, %v8233_v11  ;;  %v2874_v18 = vadd.f32 %v2868_v15, %v8234_v17  ;;  %v7180_v8 = vld [vmem:[%s7732_s7 + $0xe0] sm:$0xff]  ;;  %v7186_v9 = vld [vmem:[%s7732_s7 + $0xf0] sm:$0xff]  ;;  %v7198_v11 = vld [vmem:[%s7732_s7 + $0xd8] sm:$0xff] }
 0xbc1   :  { %v7222_v15 = vld [vmem:[%s7732_s7 + $0xb8] sm:$0xff]  ;;  %v7228_v17 = vld [vmem:[%s7732_s7 + $0xa0] sm:$0xff] }
 0xbc2   :  { %4286 = vpow2.f32 %v4015_v10  ;;  %v4016_v14 = vmul.f32 -1.442695, %v2872_v12  ;;  %v4017_v30 = vmul.f32 -1.442695, %v2874_v18  ;;  %v7192_v10 = vld [vmem:[%s7732_s7 + $0xc8] sm:$0xff]  ;;  %v7204_v12 = vld [vmem:[%s7732_s7 + $0xc0] sm:$0xff] }
 0xbc3   :  { %v7234_v18 = vld [vmem:[%s7732_s7 + $0xb0] sm:$0xff] }
 0xbc4   :  { %4288 = vpow2.f32 %v4016_v14  ;;  %v7216_v14 = vld [vmem:[%s7732_s7 + $0xa8] sm:$0xff] }
 0xbc5   :  { %4290 = vtanh.f32 %v2873_v28  ;;  %v7246_v28 = vld [vmem:[%s7732_s7 + $0x98] sm:$0xff] }
 0xbc6   :  { %4292 = vpow2.f32 %v4017_v30  ;;  %v7252_v30 = vld [vmem:[%s7732_s7 + $0x80] sm:$0xff] }
 0xbcf   :  { %v4287_v33 = vpop.eup %4286 }
 0xbd0   :  { %v2878_v59 = vadd.f32 1.0, %v4287_v33  ;;  %v7258_v33 = vld [vmem:[%s7732_s7 + $0x90] sm:$0xff] }
 0xbd1   :  { %v4289_v23 = vpop.eup %4288  ;;  %8237 = vst [vmem:[#allocation41_spill] sm:$0xff] %v7258_v33 }
 0xbd2   :  { %4294 = vrcp.f32 %v2878_v59  ;;  %v2884_v57 = vadd.f32 1.0, %v4289_v23  ;;  %v4291_v61 = vpop.eup %4290  ;;  %v7264_v59 = vld [vmem:[%s7732_s7 + $0x68] sm:$0xff]  ;;  %v7270_v23 = vld [vmem:[%s7732_s7 + $0x78] sm:$0xff] }
 0xbd3   :  { %v4293_v56 = vpop.eup %4292  ;;  %8238 = vst [vmem:[#allocation43_spill] sm:$0xff] %v7264_v59  ;;  %8239 = vst [vmem:[#allocation72_spill] sm:$0xff] %v7270_v23 }
 0xbd4   :  { %4296 = vrcp.f32 %v2884_v57  ;;  %v2891_v24 = vadd.f32 1.0, %v4293_v56  ;;  %v7276_v57 = vld [vmem:[%s7732_s7 + $0x60] sm:$0xff]  ;;  %v7288_v56 = vld [vmem:[%s7732_s7 + $0x48] sm:$0xff] }
 0xbd5   :  { %8240 = vst [vmem:[#allocation70_spill] sm:$0xff] %v7276_v57  ;;  %8242 = vst [vmem:[#allocation9_spill] sm:$0xff] %v7288_v56 }
 0xbd6   :  { %4298 = vrcp.f32 %v2891_v24  ;;  %v7312_v24 = vld [vmem:[%s7732_s7 + $0x28] sm:$0xff] }
 0xbd7   :  { %8246 = vst [vmem:[#allocation10_spill] sm:$0xff] %v7312_v24 }
 0xbdf   :  { %v4295_v48 = vpop.eup %4294 }
 0xbe0   :  { %v2895_v42 = vmul.f32 %v4295_v48, %v4291_v61  ;;  %v7282_v61 = vld [vmem:[%s7732_s7 + $0x70] sm:$0xff]  ;;  %v7294_v48 = vld [vmem:[%s7732_s7 + $0x58] sm:$0xff] }
 0xbe1   :  { %v4297_v51 = vpop.eup %4296  ;;  %8241 = vst [vmem:[#allocation26_spill] sm:$0xff] %v7282_v61  ;;  %8243 = vst [vmem:[#allocation14_spill] sm:$0xff] %v7294_v48 }
 0xbe2   :  { %v2894_v44 = vmul.f32 %v4297_v51, %v6890_v27  ;;  %v7048_v27 = vld [vmem:[%s7732_s7 + $0x188] sm:$0xff]  ;;  %v7306_v51 = vld [vmem:[%s7732_s7 + $0x50] sm:$0xff] }
 0xbe3   :  { %v4299_v50 = vpop.eup %4298  ;;  %8245 = vst [vmem:[#allocation27_spill] sm:$0xff] %v7306_v51 }
 0xbe4   :  { %v6978_v41 = vadd.f32 %v2895_v42, %v2894_v44  ;;  %v7300_v42 = vld [vmem:[%s7732_s7 + $0x40] sm:$0xff]  ;;  %v7318_v44 = vld [vmem:[%s7732_s7 + $0x38] sm:$0xff] }
 0xbe5   :  { %8244 = vst [vmem:[#allocation22_spill] sm:$0xff] %v7300_v42  ;;  %8247 = vst [vmem:[#allocation15_spill] sm:$0xff] %v7318_v44 }
 0xbe6   :  { %4300 = vtanh.f32 %v6978_v41 }
 0xbf3   :  { %v4301_v39 = vpop.eup %4300 }
 0xbf4   :  { %v6981_v46 = vmul.f32 %v4301_v39, %v4299_v50  ;;  %v7324_v50 = vld [vmem:[%s7732_s7 + $0x20] sm:$0xff]  ;;  %v7330_v39 = vld [vmem:[%s7732_s7 + $0x30] sm:$0xff] }
 0xbf5   :  { %8248 = vst [vmem:[#allocation23_spill] sm:$0xff] %v7324_v50  ;;  %8249 = vst [vmem:[#allocation28_spill] sm:$0xff] %v7330_v39 }
 0xbf6   :  { %8236 = vst [vmem:[#allocation13_spill] sm:$0xff] %v6981_v46  ;;  %2969 = vmatmul.mubr.f32.vlgmr.msra.gmra.mxu0 %v6981_v46  ;;  %3040 = vmatmul.mubr.f32.vlgmr.msra.gmra.mxu1 %v6981_v46  ;;  %v7336_v46 = vld [vmem:[%s7732_s7 + $0x8] sm:$0xff] }
 0xbf7   :  { %3080 = vmatpush1.msra.mxu0 %v6988_v7  ;;  %3151 = vmatpush1.msra.mxu1 %v6994_v26  ;;  %8250 = vst [vmem:[#allocation11_spill] sm:$0xff] %v7336_v46 }
 0xbf8   :  { %3081 = vmatprep.subr.mxu0 %v7000_v45  ;;  %3152 = vmatprep.subr.mxu1 %v7006_v53 }
 0xbf9   :  { %3082 = vmatpush1.msra.mxu0 %v7012_v21  ;;  %3153 = vmatpush1.msra.mxu1 %v7018_v49 }
 0xbfa   :  { %3083 = vmatprep.subr.mxu0 %v7024_v43  ;;  %3154 = vmatprep.subr.mxu1 %v7030_v16 }
 0xbfb   :  { %3084 = vmatpush1.msra.mxu0 %v7036_v35  ;;  %3155 = vmatpush1.msra.mxu1 %v7042_v32 }
 0xbfc   :  { %3085 = vmatprep.subr.mxu0 %v7048_v27  ;;  %3156 = vmatprep.subr.mxu1 %v7054_v36 }
 0xbfd   :  { %3086 = vmatpush1.msra.mxu0 %v7060_v37  ;;  %3157 = vmatpush1.msra.mxu1 %v7066_v38 }
 0xbfe   :  { %3087 = vmatprep.subr.mxu0 %v7072_v29  ;;  %3158 = vmatprep.subr.mxu1 %v7078_v60 }
 0xbff   :  { %3088 = vmatpush1.msra.mxu0 %v7084_v55  ;;  %3159 = vmatpush1.msra.mxu1 %v7090_v20 }
 0xc00   :  { %3089 = vmatprep.subr.mxu0 %v7096_v58  ;;  %3160 = vmatprep.subr.mxu1 %v7102_v25 }
 0xc01   :  { %3090 = vmatpush1.msra.mxu0 %v7108_v47  ;;  %3161 = vmatpush1.msra.mxu1 %v7114_v22 }
 0xc02   :  { %3091 = vmatprep.subr.mxu0 %v7120_v1  ;;  %3162 = vmatprep.subr.mxu1 %v7126_v34 }
 0xc03   :  { %3092 = vmatpush1.msra.mxu0 %v7132_v40  ;;  %3163 = vmatpush1.msra.mxu1 %v7138_v54 }
 0xc04   :  { %3093 = vmatprep.subr.mxu0 %v7144_v52  ;;  %3164 = vmatprep.subr.mxu1 %v7150_v0 }
 0xc05   :  { %3094 = vmatpush1.msra.mxu0 %v7156_v62  ;;  %3165 = vmatpush1.msra.mxu1 %v7162_v2 }
 0xc06   :  { %3095 = vmatprep.subr.mxu0 %v7168_v5  ;;  %3166 = vmatprep.subr.mxu1 %v7174_v6 }
 0xc07   :  { %3096 = vmatpush1.msra.mxu0 %v7180_v8  ;;  %3167 = vmatpush1.msra.mxu1 %v7186_v9 }
 0xc08   :  { %3097 = vmatprep.subr.mxu0 %v7192_v10  ;;  %3168 = vmatprep.subr.mxu1 %v7198_v11 }
 0xc09   :  { %3098 = vmatpush1.msra.mxu0 %v7204_v12  ;;  %3169 = vmatpush1.msra.mxu1 %v7210_v13 }
 0xc0a   :  { %3099 = vmatprep.subr.mxu0 %v7216_v14  ;;  %3170 = vmatprep.subr.mxu1 %v7222_v15 }
 0xc0b   :  { %3100 = vmatpush1.msra.mxu0 %v7228_v17  ;;  %3171 = vmatpush1.msra.mxu1 %v7234_v18 }
 0xc0c   :  { %3101 = vmatprep.subr.mxu0 %v7240_v19  ;;  %3172 = vmatprep.subr.mxu1 %v7246_v28 }
 0xc0d   :  { %3102 = vmatpush1.msra.mxu0 %v7252_v30  ;;  %3173 = vmatpush1.msra.mxu1 %v7258_v33 }
 0xc0e   :  { %3103 = vmatprep.subr.mxu0 %v7264_v59  ;;  %3174 = vmatprep.subr.mxu1 %v7270_v23  ;;  %v8257_v23 = vld [vmem:[#allocation86_spill] sm:$0xff] }
 0xc0f   :  { %3104 = vmatpush1.msra.mxu0 %v7276_v57  ;;  %3175 = vmatpush1.msra.mxu1 %v7282_v61  ;;  %v8256_v57 = vld [vmem:[#allocation87_spill] sm:$0xff] }
 0xc10   :  { %3105 = vmatprep.subr.mxu0 %v7288_v56  ;;  %3176 = vmatprep.subr.mxu1 %v7294_v48 }
 0xc11   :  { %3106 = vmatpush1.msra.mxu0 %v7300_v42  ;;  %3177 = vmatpush1.msra.mxu1 %v7306_v51  ;;  %v8255_v51 = vld [vmem:[#allocation61_spill] sm:$0xff] }
 0xc12   :  { %3107 = vmatprep.subr.mxu0 %v7312_v24  ;;  %3178 = vmatprep.subr.mxu1 %v7318_v44 }
 0xc13   :  { %3108 = vmatpush1.msra.mxu0 %v7324_v50  ;;  %3179 = vmatpush1.msra.mxu1 %v7330_v39  ;;  %v7348_v50 = vld [vmem:[%s7732_s7] sm:$0xff] }
 0xc14   :  { %3109 = vmatprep.subr.mxu0 %v7336_v46  ;;  %3180 = vmatprep.subr.mxu1 %v7342_v31  ;;  %8252 = vst [vmem:[#allocation24_spill] sm:$0xff] %v7348_v50  ;;  %v7355_v46 = vld [vmem:[%s7732_s7 + $0x10] sm:$0xff]  ;;  %v8254_v39 = vld [vmem:[#allocation59_spill] sm:$0xff] }
 0xc15   :  { %3110 = vmatpush1.msra.mxu0 %v7348_v50  ;;  %3143 = vmatprep.mubr.f32.mxu0 %v8228_v63  ;;  %8253 = vst [vmem:[#allocation29_spill] sm:$0xff] %v7355_v46 }
 0xc16   :  { %3181 = vmatpush1.msra.mxu1 %v7355_v46  ;;  %3214 = vmatprep.mubr.f32.mxu1 %v8228_v63 }
 0xc17   :  { %3254 = vmatprep.subr.mxu0 %v6964_v3  ;;  %3325 = vmatprep.subr.mxu1 %v6970_v4 }
 0xcb6   :  { %v2970_v31 = vpop.f32.mrf.mxu0  ;;  %v3041_v48 = vpop.f32.mrf.mxu1 }
 0xcb7   :  { %v3046_v44 = vadd.f32 %v2970_v31, %v8254_v39  ;;  %v3048_v63 = vadd.f32 %v3041_v48, %v8257_v23  ;;  %v8263_v23 = vld [vmem:[#allocation26_spill] sm:$0xff] }
 0xcb8   :  { %v2972_v24 = vpop.f32.mrf.mxu0  ;;  %v3043_v61 = vpop.f32.mrf.mxu1  ;;  %v8265_v48 = vld [vmem:[#allocation14_spill] sm:$0xff] }
 0xcb9   :  { %v4018_v50 = vmul.f32 -1.442695, %v3046_v44  ;;  %v3047_v42 = vadd.f32 %v2972_v24, %v8255_v51  ;;  %v3049_v46 = vadd.f32 %v3043_v61, %v8256_v57  ;;  %v8264_v61 = vld [vmem:[#allocation9_spill] sm:$0xff] }
 0xcbb   :  { %4302 = vpow2.f32 %v4018_v50  ;;  %v4019_v56 = vmul.f32 -1.442695, %v3047_v42  ;;  %v4020_v59 = vmul.f32 -1.442695, %v3049_v46 }
 0xcbd   :  { %4304 = vpow2.f32 %v4019_v56 }
 0xcbe   :  { %4306 = vtanh.f32 %v3048_v63 }
 0xcbf   :  { %4308 = vpow2.f32 %v4020_v59  ;;  %v8262_v59 = vld [vmem:[#allocation70_spill] sm:$0xff] }
 0xcc8   :  { %v4303_v3 = vpop.eup %4302 }
 0xcc9   :  { %v3053_v33 = vadd.f32 1.0, %v4303_v3 }
 0xcca   :  { %v4305_v4 = vpop.eup %4304 }
 0xccb   :  { %4310 = vrcp.f32 %v3053_v33  ;;  %v3059_v31 = vadd.f32 1.0, %v4305_v4  ;;  %v4307_v44 = vpop.eup %4306  ;;  %v8259_v4 = vld [vmem:[#allocation41_spill] sm:$0xff]  ;;  %v8261_v33 = vld [vmem:[#allocation72_spill] sm:$0xff] }
 0xccc   :  { %v4309_v51 = vpop.eup %4308 }
 0xccd   :  { %4312 = vrcp.f32 %v3059_v31  ;;  %v3066_v56 = vadd.f32 1.0, %v4309_v51  ;;  %v8266_v31 = vld [vmem:[#allocation22_spill] sm:$0xff] }
 0xcce   :  { %v8268_v51 = vld [vmem:[#allocation10_spill] sm:$0xff] }
 0xccf   :  { %4314 = vrcp.f32 %v3066_v56  ;;  %v8272_v56 = vld [vmem:[#allocation11_spill] sm:$0xff] }
 0xcd8   :  { %v4311_v24 = vpop.eup %4310 }
 0xcd9   :  { %v3070_v50 = vmul.f32 %v4311_v24, %v4307_v44  ;;  %v8267_v44 = vld [vmem:[#allocation27_spill] sm:$0xff] }
 0xcda   :  { %v4313_v42 = vpop.eup %4312  ;;  %v8269_v24 = vld [vmem:[#allocation15_spill] sm:$0xff] }
 0xcdb   :  { %v3069_v39 = vmul.f32 %v4313_v42, %v6978_v41  ;;  %v8260_v41 = vld [vmem:[#allocation43_spill] sm:$0xff]  ;;  %v8271_v42 = vld [vmem:[#allocation28_spill] sm:$0xff] }
 0xcdc   :  { %v4315_v3 = vpop.eup %4314 }
 0xcdd   :  { %v7366_v57 = vadd.f32 %v3070_v50, %v3069_v39  ;;  %v8270_v50 = vld [vmem:[#allocation23_spill] sm:$0xff]  ;;  %v8273_v39 = vld [vmem:[#allocation16_spill] sm:$0xff] }
 0xcdf   :  { %4316 = vtanh.f32 %v7366_v57 }
 0xcec   :  { %v4317_v63 = vpop.eup %4316 }
 0xced   :  { %v7369_v46 = vmul.f32 %v4317_v63, %v4315_v3  ;;  %v8274_v3 = vld [vmem:[#allocation24_spill] sm:$0xff]  ;;  %v8275_v63 = vmov 0.0  }
 0xcef   :  { %8258 = vst [vmem:[#allocation12_spill] sm:$0xff] %v7369_v46  ;;  %3144 = vmatmul.mubr.f32.vlgmr.msra.gmra.mxu0 %v7369_v46  ;;  %3215 = vmatmul.mubr.f32.vlgmr.msra.gmra.mxu1 %v7369_v46  ;;  %v8276_v46 = vld [vmem:[#allocation29_spill] sm:$0xff] }
 0xcf0   :  { %3255 = vmatpush1.msra.mxu0 %v6988_v7  ;;  %3326 = vmatpush1.msra.mxu1 %v6994_v26 }
 0xcf1   :  { %3256 = vmatprep.subr.mxu0 %v7000_v45  ;;  %3327 = vmatprep.subr.mxu1 %v7006_v53 }
 0xcf2   :  { %3257 = vmatpush1.msra.mxu0 %v7012_v21  ;;  %3328 = vmatpush1.msra.mxu1 %v7018_v49 }
 0xcf3   :  { %3258 = vmatprep.subr.mxu0 %v7024_v43  ;;  %3329 = vmatprep.subr.mxu1 %v7030_v16 }
 0xcf4   :  { %3259 = vmatpush1.msra.mxu0 %v7036_v35  ;;  %3330 = vmatpush1.msra.mxu1 %v7042_v32 }
 0xcf5   :  { %3260 = vmatprep.subr.mxu0 %v7048_v27  ;;  %3331 = vmatprep.subr.mxu1 %v7054_v36 }
 0xcf6   :  { %3261 = vmatpush1.msra.mxu0 %v7060_v37  ;;  %3332 = vmatpush1.msra.mxu1 %v7066_v38 }
 0xcf7   :  { %3262 = vmatprep.subr.mxu0 %v7072_v29  ;;  %3333 = vmatprep.subr.mxu1 %v7078_v60 }
 0xcf8   :  { %3263 = vmatpush1.msra.mxu0 %v7084_v55  ;;  %3334 = vmatpush1.msra.mxu1 %v7090_v20 }
 0xcf9   :  { %3264 = vmatprep.subr.mxu0 %v7096_v58  ;;  %3335 = vmatprep.subr.mxu1 %v7102_v25 }
 0xcfa   :  { %3265 = vmatpush1.msra.mxu0 %v7108_v47  ;;  %3336 = vmatpush1.msra.mxu1 %v7114_v22 }
 0xcfb   :  { %3266 = vmatprep.subr.mxu0 %v7120_v1  ;;  %3337 = vmatprep.subr.mxu1 %v7126_v34 }
 0xcfc   :  { %3267 = vmatpush1.msra.mxu0 %v7132_v40  ;;  %3338 = vmatpush1.msra.mxu1 %v7138_v54 }
 0xcfd   :  { %3268 = vmatprep.subr.mxu0 %v7144_v52  ;;  %3339 = vmatprep.subr.mxu1 %v7150_v0 }
 0xcfe   :  { %3269 = vmatpush1.msra.mxu0 %v7156_v62  ;;  %3340 = vmatpush1.msra.mxu1 %v7162_v2 }
 0xcff   :  { %3270 = vmatprep.subr.mxu0 %v7168_v5  ;;  %3341 = vmatprep.subr.mxu1 %v7174_v6 }
 0xd00   :  { %3271 = vmatpush1.msra.mxu0 %v7180_v8  ;;  %3342 = vmatpush1.msra.mxu1 %v7186_v9 }
 0xd01   :  { %3272 = vmatprep.subr.mxu0 %v7192_v10  ;;  %3343 = vmatprep.subr.mxu1 %v7198_v11 }
 0xd02   :  { %3273 = vmatpush1.msra.mxu0 %v7204_v12  ;;  %3344 = vmatpush1.msra.mxu1 %v7210_v13 }
 0xd03   :  { %3274 = vmatprep.subr.mxu0 %v7216_v14  ;;  %3345 = vmatprep.subr.mxu1 %v7222_v15 }
 0xd04   :  { %3275 = vmatpush1.msra.mxu0 %v7228_v17  ;;  %3346 = vmatpush1.msra.mxu1 %v7234_v18 }
 0xd05   :  { %3276 = vmatprep.subr.mxu0 %v7240_v19  ;;  %3347 = vmatprep.subr.mxu1 %v7246_v28 }
 0xd06   :  { %3277 = vmatpush1.msra.mxu0 %v7252_v30  ;;  %3348 = vmatpush1.msra.mxu1 %v8259_v4 }
 0xd07   :  { %3278 = vmatprep.subr.mxu0 %v8260_v41  ;;  %3349 = vmatprep.subr.mxu1 %v8261_v33  ;;  %v8282_v33 = vld [vmem:[#allocation88_spill] sm:$0xff] }
 0xd08   :  { %3279 = vmatpush1.msra.mxu0 %v8262_v59  ;;  %3350 = vmatpush1.msra.mxu1 %v8263_v23  ;;  %v8281_v59 = vld [vmem:[#allocation89_spill] sm:$0xff] }
 0xd09   :  { %3280 = vmatprep.subr.mxu0 %v8264_v61  ;;  %3351 = vmatprep.subr.mxu1 %v8265_v48 }
 0xd0a   :  { %3281 = vmatpush1.msra.mxu0 %v8266_v31  ;;  %3352 = vmatpush1.msra.mxu1 %v8267_v44  ;;  %v8277_v44 = vld [vmem:[#allocation66_spill] sm:$0xff] }
 0xd0b   :  { %3282 = vmatprep.subr.mxu0 %v8268_v51  ;;  %3353 = vmatprep.subr.mxu1 %v8269_v24  ;;  %v8278_v51 = vld [vmem:[#allocation8_spill] sm:$0xff] }
 0xd0c   :  { %3283 = vmatpush1.msra.mxu0 %v8270_v50  ;;  %3354 = vmatpush1.msra.mxu1 %v8271_v42  ;;  %v8279_v50 = vld [vmem:[#allocation63_spill] sm:$0xff] }
 0xd0d   :  { %3284 = vmatprep.subr.mxu0 %v8272_v56  ;;  %3355 = vmatprep.subr.mxu1 %v8273_v39  ;;  %v8280_v56 = vld [vmem:[#allocation65_spill] sm:$0xff] }
 0xd0e   :  { %3285 = vmatpush1.msra.mxu0 %v8274_v3  ;;  %3318 = vmatprep.mubr.f32.mxu0 %v8275_v63 }
 0xd0f   :  { %3356 = vmatpush1.msra.mxu1 %v8276_v46  ;;  %3389 = vmatprep.mubr.f32.mxu1 %v8275_v63 }
 0xd10   :  { %3429 = vmatprep.subr.mxu0 %v8277_v44  ;;  %3500 = vmatprep.subr.mxu1 %v8278_v51 }
 0xdaf   :  { %v3145_v24 = vpop.f32.mrf.mxu0  ;;  %v3216_v39 = vpop.f32.mrf.mxu1 }
 0xdb0   :  { %v3221_v31 = vadd.f32 %v3145_v24, %v8279_v50  ;;  %v3223_v63 = vadd.f32 %v3216_v39, %v8282_v33 }
 0xdb1   :  { %v3147_v42 = vpop.f32.mrf.mxu0  ;;  %v3218_v23 = vpop.f32.mrf.mxu1 }
 0xdb2   :  { %v4021_v48 = vmul.f32 -1.442695, %v3221_v31  ;;  %v3222_v61 = vadd.f32 %v3147_v42, %v8280_v56  ;;  %v3224_v46 = vadd.f32 %v3218_v23, %v8281_v59 }
 0xdb4   :  { %4318 = vpow2.f32 %v4021_v48  ;;  %v4022_v3 = vmul.f32 -1.442695, %v3222_v61  ;;  %v4023_v41 = vmul.f32 -1.442695, %v3224_v46 }
 0xdb6   :  { %4320 = vpow2.f32 %v4022_v3 }
 0xdb7   :  { %4322 = vtanh.f32 %v3223_v63  ;;  %v3622_v63 = vld [vmem:[%s7734_s9 + $0x70] sm:$0xff] }
 0xdb8   :  { %4324 = vpow2.f32 %v4023_v41 }
 0xdc1   :  { %v4319_v44 = vpop.eup %4318 }
 0xdc2   :  { %v3228_v4 = vadd.f32 1.0, %v4319_v44  ;;  %v8305_v44 = vld [vmem:[#allocation37_spill] sm:$0xff] }
 0xdc3   :  { %v4321_v51 = vpop.eup %4320 }
 0xdc4   :  { %4326 = vrcp.f32 %v3228_v4  ;;  %v3234_v24 = vadd.f32 1.0, %v4321_v51  ;;  %v4323_v31 = vpop.eup %4322  ;;  %v3621_v51 = vld [vmem:[%s7734_s9 + $0x68] sm:$0xff] }
 0xdc5   :  { %v4325_v50 = vpop.eup %4324 }
 0xdc6   :  { %4328 = vrcp.f32 %v3234_v24  ;;  %v3241_v56 = vadd.f32 1.0, %v4325_v50  ;;  %v3620_v24 = vld [vmem:[%s7734_s9 + $0x60] sm:$0xff]  ;;  %v3618_v50 = vld [vmem:[%s7734_s9 + $0x50] sm:$0xff] }
 0xdc8   :  { %4330 = vrcp.f32 %v3241_v56  ;;  %v3614_v56 = vld [vmem:[%s7734_s9 + $0x30] sm:$0xff] }
 0xdd1   :  { %v4327_v48 = vpop.eup %4326 }
 0xdd2   :  { %v3245_v42 = vmul.f32 %v4327_v48, %v4323_v31  ;;  %v3619_v31 = vld [vmem:[%s7734_s9 + $0x58] sm:$0xff]  ;;  %v3617_v48 = vld [vmem:[%s7734_s9 + $0x48] sm:$0xff] }
 0xdd3   :  { %v4329_v61 = vpop.eup %4328 }
 0xdd4   :  { %v3244_v3 = vmul.f32 %v4329_v61, %v7366_v57  ;;  %v3615_v61 = vld [vmem:[%s7734_s9 + $0x38] sm:$0xff] }
 0xdd5   :  { %v4331_v46 = vpop.eup %4330 }
 0xdd6   :  { %v7444_v59 = vadd.f32 %v3245_v42, %v3244_v3  ;;  %v3616_v42 = vld [vmem:[%s7734_s9 + $0x40] sm:$0xff]  ;;  %v3613_v3 = vld [vmem:[%s7734_s9 + $0x28] sm:$0xff] }
 0xdd8   :  { %4332 = vtanh.f32 %v7444_v59 }
 0xde5   :  { %v4333_v33 = vpop.eup %4332 }
 0xde6   :  { %v7447_v23 = vmul.f32 %v4333_v33, %v4331_v46  ;;  %v3611_v46 = vld [vmem:[%s7734_s9 + $0x18] sm:$0xff]  ;;  %v3610_v33 = vld [vmem:[%s7734_s9 + $0x10] sm:$0xff] }
 0xde8   :  { %3319 = vmatmul.mubr.f32.vlgmr.msra.gmra.mxu0 %v7447_v23  ;;  %3390 = vmatmul.mubr.f32.vlgmr.msra.gmra.mxu1 %v7447_v23 }
 0xde9   :  { %3430 = vmatpush1.msra.mxu0 %v6988_v7  ;;  %3501 = vmatpush1.msra.mxu1 %v6994_v26  ;;  %v8283_v7 = vld [vmem:[#allocation41_spill] sm:$0xff]  ;;  %v8284_v26 = vld [vmem:[#allocation43_spill] sm:$0xff] }
 0xdea   :  { %3431 = vmatprep.subr.mxu0 %v7000_v45  ;;  %3502 = vmatprep.subr.mxu1 %v7006_v53  ;;  %v8285_v45 = vld [vmem:[#allocation72_spill] sm:$0xff]  ;;  %v8286_v53 = vld [vmem:[#allocation70_spill] sm:$0xff] }
 0xdeb   :  { %3432 = vmatpush1.msra.mxu0 %v7012_v21  ;;  %3503 = vmatpush1.msra.mxu1 %v7018_v49  ;;  %v8287_v21 = vld [vmem:[#allocation26_spill] sm:$0xff]  ;;  %v8288_v49 = vld [vmem:[#allocation9_spill] sm:$0xff] }
 0xdec   :  { %3433 = vmatprep.subr.mxu0 %v7024_v43  ;;  %3504 = vmatprep.subr.mxu1 %v7030_v16  ;;  %v8289_v43 = vld [vmem:[#allocation14_spill] sm:$0xff] }
 0xded   :  { %3434 = vmatpush1.msra.mxu0 %v7036_v35  ;;  %3505 = vmatpush1.msra.mxu1 %v7042_v32  ;;  %v8290_v16 = vld [vmem:[#allocation22_spill] sm:$0xff]  ;;  %v8291_v35 = vld [vmem:[#allocation27_spill] sm:$0xff] }
 0xdee   :  { %3435 = vmatprep.subr.mxu0 %v7048_v27  ;;  %3506 = vmatprep.subr.mxu1 %v7054_v36  ;;  %v8292_v32 = vld [vmem:[#allocation10_spill] sm:$0xff]  ;;  %v8293_v27 = vld [vmem:[#allocation15_spill] sm:$0xff] }
 0xdef   :  { %3436 = vmatpush1.msra.mxu0 %v7060_v37  ;;  %3507 = vmatpush1.msra.mxu1 %v7066_v38  ;;  %v8294_v36 = vld [vmem:[#allocation23_spill] sm:$0xff]  ;;  %v8295_v37 = vld [vmem:[#allocation28_spill] sm:$0xff] }
 0xdf0   :  { %3437 = vmatprep.subr.mxu0 %v7072_v29  ;;  %3508 = vmatprep.subr.mxu1 %v7078_v60  ;;  %v8296_v38 = vld [vmem:[#allocation11_spill] sm:$0xff]  ;;  %v8297_v29 = vld [vmem:[#allocation16_spill] sm:$0xff] }
 0xdf1   :  { %3438 = vmatpush1.msra.mxu0 %v7084_v55  ;;  %3509 = vmatpush1.msra.mxu1 %v7090_v20  ;;  %v8298_v60 = vld [vmem:[#allocation24_spill] sm:$0xff]  ;;  %v8299_v55 = vmov 0.0   ;;  %v8300_v20 = vld [vmem:[#allocation29_spill] sm:$0xff] }
 0xdf2   :  { %3439 = vmatprep.subr.mxu0 %v7096_v58  ;;  %3510 = vmatprep.subr.mxu1 %v7102_v25  ;;  %v3623_v58 = vld [vmem:[%s7734_s9 + $0x78] sm:$0xff] }
 0xdf3   :  { %3440 = vmatpush1.msra.mxu0 %v7108_v47  ;;  %3511 = vmatpush1.msra.mxu1 %v7114_v22  ;;  %v8301_v47 = vld [vmem:[#allocation67_spill] sm:$0xff] }
 0xdf4   :  { %3441 = vmatprep.subr.mxu0 %v7120_v1  ;;  %3512 = vmatprep.subr.mxu1 %v7126_v34 }
 0xdf5   :  { %3442 = vmatpush1.msra.mxu0 %v7132_v40  ;;  %3513 = vmatpush1.msra.mxu1 %v7138_v54  ;;  %v8302_v40 = vld [vmem:[#allocation69_spill] sm:$0xff] }
 0xdf6   :  { %3443 = vmatprep.subr.mxu0 %v7144_v52  ;;  %3514 = vmatprep.subr.mxu1 %v7150_v0 }
 0xdf7   :  { %3444 = vmatpush1.msra.mxu0 %v7156_v62  ;;  %3515 = vmatpush1.msra.mxu1 %v7162_v2  ;;  %v8303_v2 = vld [vmem:[#allocation91_spill] sm:$0xff] }
 0xdf8   :  { %3445 = vmatprep.subr.mxu0 %v7168_v5  ;;  %3516 = vmatprep.subr.mxu1 %v7174_v6  ;;  %v8304_v6 = vld [vmem:[#allocation90_spill] sm:$0xff] }
 0xdf9   :  { %3446 = vmatpush1.msra.mxu0 %v7180_v8  ;;  %3517 = vmatpush1.msra.mxu1 %v7186_v9 }
 0xdfa   :  { %3447 = vmatprep.subr.mxu0 %v7192_v10  ;;  %3518 = vmatprep.subr.mxu1 %v7198_v11 }
 0xdfb   :  { %3448 = vmatpush1.msra.mxu0 %v7204_v12  ;;  %3519 = vmatpush1.msra.mxu1 %v7210_v13 }
 0xdfc   :  { %3449 = vmatprep.subr.mxu0 %v7216_v14  ;;  %3520 = vmatprep.subr.mxu1 %v7222_v15 }
 0xdfd   :  { %3450 = vmatpush1.msra.mxu0 %v7228_v17  ;;  %3521 = vmatpush1.msra.mxu1 %v7234_v18 }
 0xdfe   :  { %3451 = vmatprep.subr.mxu0 %v7240_v19  ;;  %3522 = vmatprep.subr.mxu1 %v7246_v28 }
 0xdff   :  { %3452 = vmatpush1.msra.mxu0 %v7252_v30  ;;  %3523 = vmatpush1.msra.mxu1 %v8283_v7  ;;  %v3609_v7 = vld [vmem:[%s7734_s9 + $0x8] sm:$0xff] }
 0xe00   :  { %3453 = vmatprep.subr.mxu0 %v8284_v26  ;;  %3524 = vmatprep.subr.mxu1 %v8285_v45  ;;  %v3608_v26 = vld [vmem:[%s7734_s9] sm:$0xff] }
 0xe01   :  { %3454 = vmatpush1.msra.mxu0 %v8286_v53  ;;  %3525 = vmatpush1.msra.mxu1 %v8287_v21  ;;  %v8306_v45 = vld [vmem:[#allocation39_spill] sm:$0xff]  ;;  %v8307_v53 = vld [vmem:[#allocation68_spill] sm:$0xff]  ;;  %v8308_v21 = vld [vmem:[#allocation13_spill] sm:$0xff] }
 0xe02   :  { %3455 = vmatprep.subr.mxu0 %v8288_v49  ;;  %3526 = vmatprep.subr.mxu1 %v8289_v43  ;;  %v8309_v49 = vld [vmem:[#allocation12_spill] sm:$0xff] }
 0xe03   :  { %3456 = vmatpush1.msra.mxu0 %v8290_v16  ;;  %3527 = vmatpush1.msra.mxu1 %v8291_v35  ;;  %v8310_v16 = vld [vmem:[#allocation71_spill] sm:$0xff] }
 0xe04   :  { %3457 = vmatprep.subr.mxu0 %v8292_v32  ;;  %3528 = vmatprep.subr.mxu1 %v8293_v27 }
 0xe05   :  { %3458 = vmatpush1.msra.mxu0 %v8294_v36  ;;  %3529 = vmatpush1.msra.mxu1 %v8295_v37  ;;  %v8311_v36 = vld [vmem:[#allocation73_spill] sm:$0xff] }
 0xe06   :  { %3459 = vmatprep.subr.mxu0 %v8296_v38  ;;  %3530 = vmatprep.subr.mxu1 %v8297_v29 }
 0xe07   :  { %3460 = vmatpush1.msra.mxu0 %v8298_v60  ;;  %3493 = vmatprep.mubr.f32.mxu0 %v8299_v55 }
 0xe08   :  { %3531 = vmatpush1.msra.mxu1 %v8300_v20  ;;  %3564 = vmatprep.mubr.f32.mxu1 %v8299_v55  ;;  %v8312_v55 = vld [vmem:[#allocation93_spill] sm:$0xff] }
 0xe09   :  { %4055 = vmatprep.subr.mxu0 %v3623_v58 }
 0xea8   :  { %v3320_v25 = vpop.f32.mrf.mxu0  ;;  %v3391_v52 = vpop.f32.mrf.mxu1 }
 0xea9   :  { %v3396_v22 = vadd.f32 %v3320_v25, %v8301_v47  ;;  %v3398_v8 = vadd.f32 %v3391_v52, %v8304_v6 }
 0xeaa   :  { %v3322_v1 = vpop.f32.mrf.mxu0  ;;  %v3393_v62 = vpop.f32.mrf.mxu1 }
 0xeab   :  { %v4024_v34 = vmul.f32 -1.442695, %v3396_v22  ;;  %v3397_v54 = vadd.f32 %v3322_v1, %v8302_v40  ;;  %v3399_v5 = vadd.f32 %v3393_v62, %v8303_v2  ;;  %v4030_v62 = vld [vmem:[%s7735_s10] ss:$0 sm:$0xff] }
 0xead   :  { %4334 = vpow2.f32 %v4024_v34  ;;  %v4025_v0 = vmul.f32 -1.442695, %v3397_v54  ;;  %v4026_v9 = vmul.f32 -1.442695, %v3399_v5 }
 0xeaf   :  { %4336 = vpow2.f32 %v4025_v0 }
 0xeb0   :  { %4338 = vtanh.f32 %v3398_v8 }
 0xeb1   :  { %4340 = vpow2.f32 %v4026_v9 }
 0xeba   :  { %v4335_v10 = vpop.eup %4334 }
 0xebb   :  { %v3403_v11 = vadd.f32 1.0, %v4335_v10 }
 0xebc   :  { %v4337_v12 = vpop.eup %4336 }
 0xebd   :  { %4342 = vrcp.f32 %v3403_v11  ;;  %v3409_v13 = vadd.f32 1.0, %v4337_v12  ;;  %v4339_v14 = vpop.eup %4338 }
 0xebe   :  { %v4341_v15 = vpop.eup %4340 }
 0xebf   :  { %4344 = vrcp.f32 %v3409_v13  ;;  %v3416_v28 = vadd.f32 1.0, %v4341_v15 }
 0xec1   :  { %4346 = vrcp.f32 %v3416_v28 }
 0xeca   :  { %v4343_v17 = vpop.eup %4342 }
 0xecb   :  { %v3420_v18 = vmul.f32 %v4343_v17, %v4339_v14 }
 0xecc   :  { %v4345_v19 = vpop.eup %4344 }
 0xecd   :  { %v3419_v30 = vmul.f32 %v4345_v19, %v7444_v59  ;;  %v3612_v59 = vld [vmem:[%s7734_s9 + $0x20] sm:$0xff] }
 0xece   :  { %v4347_v4 = vpop.eup %4346 }
 0xecf   :  { %v7523_v57 = vadd.f32 %v3420_v18, %v3419_v30 }
 0xed1   :  { %4348 = vtanh.f32 %v7523_v57 }
 0xede   :  { %v4349_v41 = vpop.eup %4348 }
 0xedf   :  { %v3423_v39 = vmul.f32 %v4349_v41, %v4347_v4 }
 0xee1   :  { %3494 = vmatmul.mubr.f32.vlgmr.msra.gmra.mxu0 %v3423_v39  ;;  %3565 = vmatmul.mubr.f32.vlgmr.msra.gmra.mxu1 %v3423_v39 }
 0xee2   :  { %4056 = vmatpush3.msra.mxu0 %v3623_v58  ;;  %4087 = vmatprep.mubr.f32.mxu0 %v8305_v44  ;;  %v8313_v58 = vld [vmem:[#allocation92_spill] sm:$0xff] }
 0xee3   :  { %4057 = vmatprep.subr.mxu0 %v3622_v63 }
 0xee4   :  { %4058 = vmatpush3.msra.mxu0 %v3622_v63 }
 0xee5   :  { %4059 = vmatprep.subr.mxu0 %v3621_v51 }
 0xee6   :  { %4060 = vmatpush3.msra.mxu0 %v3621_v51 }
 0xee7   :  { %4061 = vmatprep.subr.mxu0 %v3620_v24 }
 0xee8   :  { %4062 = vmatpush3.msra.mxu0 %v3620_v24 }
 0xee9   :  { %4063 = vmatprep.subr.mxu0 %v3619_v31 }
 0xeea   :  { %4064 = vmatpush3.msra.mxu0 %v3619_v31  ;;  %v7612_v31 = vld [vmem:[%s7727_s2 + $0x8] sm:$0xff] }
 0xeeb   :  { %4065 = vmatprep.subr.mxu0 %v3618_v50  ;;  %vm3883_vm9 = vcmp.ge.s32.totalorder %v7612_v31, 0 }
 0xeec   :  { %4066 = vmatpush3.msra.mxu0 %v3618_v50  ;;  %v7618_v50 = vld [vmem:[%s7727_s2 + $0x10] sm:$0xff] }
 0xeed   :  { %4067 = vmatprep.subr.mxu0 %v3617_v48  ;;  %vm3884_vm12 = vcmp.ge.s32.totalorder %v7618_v50, 0 }
 0xeee   :  { %4068 = vmatpush3.msra.mxu0 %v3617_v48  ;;  %v7624_v48 = vld [vmem:[%s7727_s2] sm:$0xff] }
 0xeef   :  { %4069 = vmatprep.subr.mxu0 %v3616_v42  ;;  %vm3882_vm10 = vcmp.ge.s32.totalorder %v7624_v48, 0 }
 0xef0   :  { %4070 = vmatpush3.msra.mxu0 %v3616_v42  ;;  %v7629_v42 = vld [vmem:[%s7727_s2 + $0x18] sm:$0xff] }
 0xef1   :  { %4071 = vmatprep.subr.mxu0 %v3615_v61  ;;  %vm3885_vm13 = vcmp.ge.s32.totalorder %v7629_v42, 0 }
 0xef2   :  { %4072 = vmatpush3.msra.mxu0 %v3615_v61 }
 0xef3   :  { %4073 = vmatprep.subr.mxu0 %v3614_v56 }
 0xef4   :  { %4074 = vmatpush3.msra.mxu0 %v3614_v56  ;;  %v7638_v56 = vld [vmem:[%s7727_s2 + $0x20] sm:$0xff] }
 0xef5   :  { %4075 = vmatprep.subr.mxu0 %v3613_v3  ;;  %vm3886_vm14 = vcmp.ge.s32.totalorder %v7638_v56, 0 }
 0xef6   :  { %4076 = vmatpush3.msra.mxu0 %v3613_v3 }
 0xef7   :  { %4077 = vmatprep.subr.mxu0 %v3612_v59 }
 0xef8   :  { %4078 = vmatpush3.msra.mxu0 %v3612_v59 }
 0xef9   :  { %4079 = vmatprep.subr.mxu0 %v3611_v46 }
 0xefa   :  { %4080 = vmatpush3.msra.mxu0 %v3611_v46  ;;  %v7648_v46 = vld [vmem:[%s7727_s2 + $0x28] sm:$0xff] }
 0xefb   :  { %4081 = vmatprep.subr.mxu0 %v3610_v33  ;;  %vm3887_vm15 = vcmp.ge.s32.totalorder %v7648_v46, 0 }
 0xefc   :  { %4082 = vmatpush3.msra.mxu0 %v3610_v33 }
 0xefd   :  { %4083 = vmatprep.subr.mxu0 %v3609_v7 }
 0xefe   :  { %4084 = vmatpush3.msra.mxu0 %v3609_v7 }
 0xeff   :  { %4085 = vmatprep.subr.mxu0 %v3608_v26 }
 0xf00   :  { %4086 = vmatpush3.msra.mxu0 %v3608_v26  ;;  %v7658_v26 = vld [vmem:[%s7727_s2 + $0x30] sm:$0xff] }
 0xf01   :  { %4088 = vmatmul.mubr.f32.vlgmr.msra.gmra.mxu0 %v8306_v45  ;;  %vm3888_vm0 = vcmp.ge.s32.totalorder %v7658_v26, 0 }
 0xf02   :  { %4090 = vmatprep.mubr.f32.mxu0 %v8307_v53 }
 0xf05   :  { %4091 = vmatmul.mubr.f32.gmra.mxu0 %v8308_v21 }
 0xf06   :  { %4093 = vmatprep.mubr.f32.mxu0 %v8309_v49  ;;  %v7668_v49 = vld [vmem:[%s7727_s2 + $0x38] sm:$0xff]  ;;  %s4550_s2 = smov [#allocation5]  }
 0xf07   :  { %s3942_s14 = sshll.u32 %s4550_s2, 4  ;;  %s3943_s14 = int_to_ptr.vmem [resolvable:$true] %s3942_s14 }
 0xf08   :  { %s4526_s16 = scalar_lea.vmem %s3943_s14, 16  ;;  %s4530_s1 = scalar_lea.vmem %s3943_s14, 32 }
 0xf09   :  { %4094 = vmatmul.mubr.f32.gmra.mxu0 %v7447_v23  ;;  %p4527_p0 = scmp.ne.s32.totalorder %s3943_s14, %s4526_s16  ;;  %p4531_p1 = scmp.lt.s32.totalorder %s3943_s14, %s3943_s14 }
 0xf0a   :  { %4096 = vmatprep.mubr.f32.mxu0 %v3423_v39  ;;  %v4549_v39 = vmov 0   ;;  %p4532_p2 = scmp.lt.s32.totalorder %s4530_s1, %s4526_s16 }
 0xf0b   :  { %4109 = vset.pattern.permute.xlu1 %v4549_v39  ;;  %4108 = vset.pattern.permute.xlu0 %v4549_v39 }
 0xf0c   :  { %p4533_p3 = por %p4532_p2, %p4531_p1 }
 0xf0e   :  { %p4534_p4 = pnand %p4533_p3, %p4527_p0 }
 0xfa1   :  { %v3495_v43 = vpop.f32.mrf.mxu0  ;;  %v3566_v38 = vpop.f32.mrf.mxu1 }
 0xfa2   :  { %v3571_v35 = vadd.f32 %v3495_v43, %v8310_v16  ;;  %v3573_v25 = vadd.f32 %v3566_v38, %v8313_v58 }
 0xfa3   :  { %v3497_v32 = vpop.f32.mrf.mxu0  ;;  %v3568_v60 = vpop.f32.mrf.mxu1 }
 0xfa4   :  { %v4027_v27 = vmul.f32 -1.442695, %v3571_v35  ;;  %v3572_v37 = vadd.f32 %v3497_v32, %v8311_v36  ;;  %v3574_v20 = vadd.f32 %v3568_v60, %v8312_v55 }
 0xfa6   :  { %4350 = vpow2.f32 %v4027_v27  ;;  %v4028_v29 = vmul.f32 -1.442695, %v3572_v37  ;;  %v4029_v47 = vmul.f32 -1.442695, %v3574_v20 }
 0xfa8   :  { %4352 = vpow2.f32 %v4028_v29 }
 0xfa9   :  { %4354 = vtanh.f32 %v3573_v25 }
 0xfaa   :  { %4356 = vpow2.f32 %v4029_v47 }
 0xfb3   :  { %v4351_v22 = vpop.eup %4350 }
 0xfb4   :  { %v3578_v23 = vadd.f32 1.0, %v4351_v22 }
 0xfb5   :  { %v4353_v1 = vpop.eup %4352 }
 0xfb6   :  { %4358 = vrcp.f32 %v3578_v23  ;;  %v3584_v34 = vadd.f32 1.0, %v4353_v1  ;;  %v4355_v40 = vpop.eup %4354 }
 0xfb7   :  { %v4357_v52 = vpop.eup %4356 }
 0xfb8   :  { %4360 = vrcp.f32 %v3584_v34  ;;  %v3591_v9 = vadd.f32 1.0, %v4357_v52 }
 0xfba   :  { %4362 = vrcp.f32 %v3591_v9 }
 0xfc1   :  { %v4089_v54 = vpop.f32.mrf.mxu0 }
 0xfc2   :  { %v7590_v14 = vadd.f32 %v4089_v54, %v4030_v62 }
 0xfc3   :  { %v4359_v0 = vpop.eup %4358  ;;  %v3697_v2 = vpop.f32.mrf.mxu0 }
 0xfc4   :  { %v3595_v5 = vmul.f32 %v4359_v0, %v4355_v40  ;;  %v7584_v6 = vadd.f32 %v4030_v62, %v3697_v2 }
 0xfc5   :  { %v4361_v8 = vpop.eup %4360  ;;  %v4092_v10 = vpop.f32.mrf.mxu0 }
 0xfc6   :  { %v3594_v11 = vmul.f32 %v4361_v8, %v7523_v57  ;;  %v7587_v12 = vadd.f32 %v4092_v10, %v4030_v62  ;;  %3736 = vmax.xlane.f32.xlu0 %v7584_v6 }
 0xfc7   :  { %v3707_v13 = vpop.f32.mrf.mxu0  ;;  %v4363_v57 = vpop.eup %4362 }
 0xfc8   :  { %3742 = vmax.xlane.f32.xlu1 %v7587_v12  ;;  %v3596_v15 = vadd.f32 %v3595_v5, %v3594_v11  ;;  %v7593_v18 = vadd.f32 %v4030_v62, %v3707_v13  ;;  %v8314_v5 = vlaneseq }
 0xfc9   :  { %v4095_v17 = vpop.f32.mrf.mxu0 }
 0xfca   :  { %3738 = vmax.xlane.f32.xlu0 %v7590_v14  ;;  %4364 = vtanh.f32 %v3596_v15  ;;  %v7599_v30 = vadd.f32 %v4095_v17, %v4030_v62  ;;  %v3825_v8 = vand.u32 127, %v8314_v5 }
 0xfcb   :  { %v3717_v19 = vpop.f32.mrf.mxu0 }
 0xfcc   :  { %v7596_v28 = vadd.f32 %v4030_v62, %v3717_v19  ;;  %3740 = vmax.xlane.f32.xlu1 %v7593_v18 }
 0xfce   :  { %3744 = vmax.xlane.f32.xlu0 %v7596_v28 }
 0xfd0   :  { %3746 = vmax.xlane.f32.xlu1 %v7599_v30 }
 0xfd7   :  { %v4365_v4 = vpop.eup %4364 }
 0xfd8   :  { %v3598_v41 = vmul.f32 %v4365_v4, %v4363_v57 }
 0xfda   :  { %4097 = vmatmul.mubr.f32.gmra.mxu0 %v3598_v41 }
0x104f   :  { %v7631_v61 = vpop.xlane.xlu0 %3736 }
0x1050   :  { %v3752_v27 = vsub.f32 %v7584_v6, %v7631_v61 }
0x1051   :  { %v7640_v3 = vpop.xlane.xlu1 %3742 }
0x1052   :  { %v3760_v37 = vmul.f32 1.442695, %v3752_v27  ;;  %v3755_v38 = vsub.f32 %v7587_v12, %v7640_v3 }
0x1053   :  { %v7643_v59 = vpop.xlane.xlu0 %3738 }
0x1054   :  { %v3753_v33 = vsub.f32 %v7590_v14, %v7643_v59  ;;  %v3766_v55 = vmul.f32 1.442695, %v3755_v38 }
0x1055   :  { %v7653_v7 = vpop.xlane.xlu1 %3740 }
0x1056   :  { %v3762_v45 = vmul.f32 1.442695, %v3753_v33  ;;  %v3754_v53 = vsub.f32 %v7593_v18, %v7653_v7 }
0x1057   :  { %v7663_v21 = vpop.xlane.xlu0 %3744 }
0x1058   :  { %4366 = vpow2.f32 %v3762_v45  ;;  %v3764_v43 = vmul.f32 1.442695, %v3754_v53  ;;  %v3756_v16 = vsub.f32 %v7596_v28, %v7663_v21 }
0x1059   :  { %v7677_v29 = vpop.xlane.xlu1 %3746 }
0x105a   :  { %4368 = vpow2.f32 %v3764_v43  ;;  %v3768_v35 = vmul.f32 1.442695, %v3756_v16  ;;  %v3757_v20 = vsub.f32 %v7599_v30, %v7677_v29 }
0x105c   :  { %4370 = vpow2.f32 %v3768_v35  ;;  %v3770_v58 = vmul.f32 1.442695, %v3757_v20 }
0x105d   :  { %4372 = vpow2.f32 %v3760_v37 }
0x105e   :  { %4374 = vpow2.f32 %v3766_v55 }
0x105f   :  { %4376 = vpow2.f32 %v3770_v58 }
0x1065   :  { %v4367_v32 = vpop.eup %4366 }
0x1067   :  { %v4369_v36 = vpop.eup %4368 }
0x1069   :  { %v4371_v60 = vpop.eup %4370 }
0x106a   :  { %v4373_v25 = vpop.eup %4372 }
0x106b   :  { %v4375_v47 = vpop.eup %4374 }
0x106c   :  { %v4377_v22 = vpop.eup %4376 }
0x109a   :  { %v4098_v63 = vpop.f32.mrf.mxu0 }
0x109b   :  { %v7603_v44 = vadd.f32 %v4098_v63, %v4030_v62 }
0x109c   :  { %v3727_v51 = vpop.f32.mrf.mxu0 }
0x109d   :  { %v7605_v24 = vadd.f32 %v4030_v62, %v3727_v51  ;;  %3750 = vmax.xlane.f32.xlu1 %v7603_v44 }
0x109f   :  { %3748 = vmax.xlane.f32.xlu0 %v7605_v24 }
0x10ae   :  { %3830 = vperm.xlu1 %4109, %v7612_v31  }
0x10b2   :  { %3833 = vperm.xlu1 %4109, %v7618_v50  }
0x10b5   :  { %3827 = vperm.xlu0 %4108, %v7624_v48  }
0x10b6   :  { %3836 = vperm.xlu1 %4109, %v7629_v42  }
0x10ba   :  { %3839 = vperm.xlu1 %4109, %v7638_v56  }
0x10be   :  { %3842 = vperm.xlu1 %4109, %v7648_v46  }
0x10c2   :  { %3845 = vperm.xlu1 %4109, %v7658_v26  }
0x10c6   :  { %3848 = vperm.xlu1 %4109, %v7668_v49  }
0x10d4   :  { %3778 = vadd.xlane.f32.xlu0 %v4367_v32 }
0x10d8   :  { %3780 = vadd.xlane.f32.xlu0 %v4369_v36 }
0x10dc   :  { %3784 = vadd.xlane.f32.xlu0 %v4371_v60 }
0x10ea   :  { %3776 = vadd.xlane.f32.xlu1 %v4373_v25 }
0x10ee   :  { %3782 = vadd.xlane.f32.xlu1 %v4375_v47 }
0x10f2   :  { %3786 = vadd.xlane.f32.xlu1 %v4377_v22 }
0x1126   :  { %v7681_v23 = vpop.xlane.xlu1 %3750 }
0x1127   :  { %v3759_v1 = vsub.f32 %v7603_v44, %v7681_v23 }
0x1128   :  { %v7685_v34 = vpop.xlane.xlu0 %3748 }
0x1129   :  { %v3774_v40 = vmul.f32 1.442695, %v3759_v1  ;;  %v3758_v54 = vsub.f32 %v7605_v24, %v7685_v34 }
0x112a   :  { %v3831_v52 = vpop.permute.xlu1 %3830 }
0x112b   :  { %4378 = vpow2.f32 %v3774_v40  ;;  %v3772_v0 = vmul.f32 1.442695, %v3758_v54  ;;  %vm3851_vm1 = vcmp.eq.s32.totalorder %v3825_v8, %v3831_v52 }
0x112c   :  { %v3859_v17 = vsel %vm3851_vm1, %v7590_v14, 0.0  ;;  %vm3889_vm1 = vcmp.ge.s32.totalorder %v7668_v49, 0 }
0x112d   :  { %4380 = vpow2.f32 %v3772_v0 }
0x112e   :  { %v3834_v62 = vpop.permute.xlu1 %3833 }
0x112f   :  { %vm3852_vm4 = vcmp.eq.s32.totalorder %v3825_v8, %v3834_v62 }
0x1130   :  { %v3828_v11 = vpop.permute.xlu0 %3827  ;;  %v3860_v39 = vsel %vm3852_vm4, %v7593_v18, 0.0 }
0x1131   :  { %vm3850_vm2 = vcmp.eq.s32.totalorder %v3825_v8, %v3828_v11 }
0x1132   :  { %v3837_v2 = vpop.permute.xlu1 %3836  ;;  %v3858_v57 = vsel %vm3850_vm2, %v7584_v6, 0.0  ;;  %vm3934_vm2 = vcmask 0  }
0x1133   :  { %vm3853_vm3 = vcmp.eq.s32.totalorder %v3825_v8, %v3837_v2 }
0x1134   :  { %v3861_v4 = vsel %vm3853_vm3, %v7587_v12, 0.0 }
0x1136   :  { %v3840_v9 = vpop.permute.xlu1 %3839 }
0x1137   :  { %vm3854_vm6 = vcmp.eq.s32.totalorder %v3825_v8, %v3840_v9 }
0x1138   :  { %v4379_v10 = vpop.eup %4378  ;;  %v3862_v14 = vsel %vm3854_vm6, %v7596_v28, 0.0 }
0x1139   :  { %3790 = vadd.xlane.f32.xlu1 %v4379_v10 }
0x113a   :  { %v4381_v13 = vpop.eup %4380  ;;  %v3843_v15 = vpop.permute.xlu1 %3842 }
0x113b   :  { %3788 = vadd.xlane.f32.xlu0 %v4381_v13  ;;  %vm3855_vm5 = vcmp.eq.s32.totalorder %v3825_v8, %v3843_v15 }
0x113c   :  { %v3863_v63 = vsel %vm3855_vm5, %v7599_v30, 0.0 }
0x113d   :  { %3868 = vadd.xlane.f32.xlu1 %v3859_v17 }
0x113e   :  { %v3846_v19 = vpop.permute.xlu1 %3845 }
0x113f   :  { %3866 = vadd.xlane.f32.xlu0 %v3858_v57  ;;  %vm3856_vm8 = vcmp.eq.s32.totalorder %v3825_v8, %v3846_v19 }
0x1140   :  { %v3864_v12 = vsel %vm3856_vm8, %v7605_v24, 0.0 }
0x1141   :  { %3872 = vadd.xlane.f32.xlu1 %v3861_v4 }
0x1142   :  { %v3849_v41 = vpop.permute.xlu1 %3848 }
0x1143   :  { %3870 = vadd.xlane.f32.xlu0 %v3860_v39  ;;  %vm3857_vm7 = vcmp.eq.s32.totalorder %v3825_v8, %v3849_v41 }
0x1144   :  { %v3865_v6 = vsel %vm3857_vm7, %v7603_v44, 0.0 }
0x1145   :  { %3876 = vadd.xlane.f32.xlu1 %v3863_v63 }
0x1147   :  { %3874 = vadd.xlane.f32.xlu0 %v3862_v14 }
0x1149   :  { %3880 = vadd.xlane.f32.xlu1 %v3865_v6 }
0x114b   :  { %3878 = vadd.xlane.f32.xlu0 %v3864_v12 }
0x115d   :  { %v3779_v51 = vpop.xlane.xlu0 %3778 }
0x115e   :  { %4382 = vlog2.f32 %v3779_v51 }
0x1161   :  { %v3781_v18 = vpop.xlane.xlu0 %3780 }
0x1165   :  { %v3785_v30 = vpop.xlane.xlu0 %3784 }
0x116b   :  { %v4383_v28 = vpop.eup %4382 }
0x116c   :  { %v3795_v16 = vmul.f32 0.6931472, %v4383_v28 }
0x116e   :  { %v3809_v37 = vadd.f32 %v3795_v16, %v7643_v59 }
0x1173   :  { %v3777_v33 = vpop.xlane.xlu1 %3776 }
0x1174   :  { %4384 = vlog2.f32 %v3777_v33 }
0x1177   :  { %v3783_v45 = vpop.xlane.xlu1 %3782 }
0x1178   :  { %4386 = vlog2.f32 %v3783_v45 }
0x1179   :  { %4388 = vlog2.f32 %v3781_v18 }
0x117a   :  { %4390 = vlog2.f32 %v3785_v30 }
0x117b   :  { %v3787_v53 = vpop.xlane.xlu1 %3786 }
0x117c   :  { %4392 = vlog2.f32 %v3787_v53 }
0x1181   :  { %v4385_v43 = vpop.eup %4384 }
0x1182   :  { %v3793_v24 = vmul.f32 0.6931472, %v4385_v43 }
0x1184   :  { %v3808_v58 = vadd.f32 %v3793_v24, %v7631_v61 }
0x1185   :  { %v4387_v44 = vpop.eup %4386 }
0x1186   :  { %v4389_v32 = vpop.eup %4388  ;;  %v3799_v36 = vmul.f32 0.6931472, %v4387_v44 }
0x1187   :  { %v3797_v38 = vmul.f32 0.6931472, %v4389_v32  ;;  %v4391_v55 = vpop.eup %4390 }
0x1188   :  { %v3811_v1 = vadd.f32 %v3799_v36, %v7640_v3  ;;  %v3801_v40 = vmul.f32 0.6931472, %v4391_v55 }
0x1189   :  { %v4393_v25 = vpop.eup %4392  ;;  %v3810_v59 = vadd.f32 %v3797_v38, %v7653_v7 }
0x118a   :  { %v3803_v52 = vmul.f32 0.6931472, %v4393_v25  ;;  %v3812_v8 = vadd.f32 %v3801_v40, %v7663_v21 }
0x118c   :  { %v3813_v11 = vadd.f32 %v3803_v52, %v7677_v29 }
0x11c2   :  { %v3791_v35 = vpop.xlane.xlu1 %3790 }
0x11c3   :  { %4394 = vlog2.f32 %v3791_v35 }
0x11c4   :  { %v3789_v27 = vpop.xlane.xlu0 %3788 }
0x11c5   :  { %4396 = vlog2.f32 %v3789_v27 }
0x11c6   :  { %v3869_v60 = vpop.xlane.xlu1 %3868 }
0x11c7   :  { %v3891_v20 = vsub.f32 %v3809_v37, %v3869_v60 }
0x11c8   :  { %v3867_v47 = vpop.xlane.xlu0 %3866 }
0x11c9   :  { %v3890_v22 = vsub.f32 %v3808_v58, %v3867_v47  ;;  %v3899_v0 = vsel %vm3883_vm9, %v3891_v20, 0.0 }
0x11ca   :  { %v3873_v54 = vpop.xlane.xlu1 %3872  ;;  %v3908_v5 = vsel %vm3906_vm11, %v3899_v0, 0.0 }
0x11cb   :  { %v3898_v62 = vsel %vm3882_vm10, %v3890_v22, 0.0  ;;  %v3893_v2 = vsub.f32 %v3811_v1, %v3873_v54 }
0x11cc   :  { %v3907_v31 = vsel %vm3906_vm11, %v3898_v62, 0.0  ;;  %v3871_v48 = vpop.xlane.xlu0 %3870 }
0x11cd   :  { %v3892_v61 = vsub.f32 %v3810_v59, %v3871_v48  ;;  %v3909_v9 = vadd.f32 %v3908_v5, %v3907_v31  ;;  %v3901_v10 = vsel %vm3885_vm13, %v3893_v2, 0.0 }
0x11ce   :  { %v3877_v3 = vpop.xlane.xlu1 %3876  ;;  %v3912_v21 = vsel %vm3906_vm11, %v3901_v10, 0.0 }
0x11cf   :  { %v3900_v7 = vsel %vm3884_vm12, %v3892_v61, 0.0  ;;  %v3895_v19 = vsub.f32 %v3813_v11, %v3877_v3 }
0x11d0   :  { %v4395_v13 = vpop.eup %4394  ;;  %v3910_v50 = vsel %vm3906_vm11, %v3900_v7, 0.0  ;;  %v3875_v42 = vpop.xlane.xlu0 %3874 }
0x11d1   :  { %v3807_v15 = vmul.f32 0.6931472, %v4395_v13  ;;  %v3911_v17 = vadd.f32 %v3910_v50, %v3909_v9  ;;  %v3894_v57 = vsub.f32 %v3812_v8, %v3875_v42  ;;  %v3903_v6 = vsel %vm3887_vm15, %v3895_v19, 0.0 }
0x11d2   :  { %v4397_v4 = vpop.eup %4396  ;;  %v3881_v56 = vpop.xlane.xlu1 %3880  ;;  %v3916_v45 = vsel %vm3906_vm11, %v3903_v6, 0.0 }
0x11d3   :  { %v3805_v41 = vmul.f32 0.6931472, %v4397_v4  ;;  %v3913_v39 = vadd.f32 %v3912_v21, %v3911_v17  ;;  %v3902_v63 = vsel %vm3886_vm14, %v3894_v57, 0.0  ;;  %v3815_v29 = vadd.f32 %v3807_v15, %v7681_v23 }
0x11d4   :  { %v3914_v14 = vsel %vm3906_vm11, %v3902_v63, 0.0  ;;  %v3879_v46 = vpop.xlane.xlu0 %3878 }
0x11d5   :  { %v3915_v12 = vadd.f32 %v3914_v14, %v3913_v39  ;;  %v3897_v51 = vsub.f32 %v3815_v29, %v3881_v56  ;;  %v3814_v33 = vadd.f32 %v3805_v41, %v7685_v34 }
0x11d7   :  { %v3896_v18 = vsub.f32 %v3814_v33, %v3879_v46  ;;  %v3905_v30 = vsel %vm3889_vm1, %v3897_v51, 0.0  ;;  %v3917_v28 = vadd.f32 %v3916_v45, %v3915_v12 }
0x11d8   :  { %v3920_v16 = vsel %vm3906_vm11, %v3905_v30, 0.0 }
0x11d9   :  { %v3904_v53 = vsel %vm3888_vm0, %v3896_v18, 0.0 }
0x11da   :  { %v3918_v23 = vsel %vm3906_vm11, %v3904_v53, 0.0 }
0x11db   :  { %v3919_v43 = vadd.f32 %v3918_v23, %v3917_v28 }
0x11dd   :  { %v3921_v44 = vadd.f32 %v3920_v16, %v3919_v43 }
0x11df   :  { %3922 = vadd.xlane.f32.xlu0 %v3921_v44 }
0x1268   :  { %v3923_v35 = vpop.xlane.xlu0 %3922 }
0x1269   :  { %v3924_v34 = vrot.slane %v3923_v35, 4 }
0x126b   :  { %v3925_v32 = vadd.f32 %v3924_v34, %v3923_v35 }
0x126d   :  { %v3926_v26 = vrot.slane %v3925_v32, 2 }
0x126f   :  { %v3927_v24 = vadd.f32 %v3926_v26, %v3925_v32 }
0x1271   :  { %v3928_v49 = vrot.slane %v3927_v24, 1 }
0x1273   :  { %v3929_v27 = vadd.f32 %v3928_v49, %v3927_v24 }
0x1275   :  { %4103 = vpush %v3929_v27 }
0x12a6   :  { %s4104_s15 = spop %4103 }
0x12a7   :  { %s3931_s0 = smul.f32 0.0625, %s4104_s15 }
0x12a9   :  { %v3932_v36 = vstv %s3931_s0 }
0x12aa   :  { %3935 = vst.msk [vmem:[#allocation5] sm:$0x1] %vm3934_vm2, %v3932_v36 }
0x12ab   :  { %4537 = shalt.err (!%p4534_p4)
}
0x12ac   :  { %3945 = dma.vmem_to_hbm [thread:$0]  %s3943_s14, 16, %s7736_s11, [#allocation6]  }
0x12ad   :  { %4546 = dma.done.wait [#allocation6], 16  }
0x12ae   :  { %4547 = vsyncadd [#allocation6], 4294967280 }
0x12af   :  { %3949 = vsyncpa [#allocation6], 1 }

</bundles_post_ra>
